<compile_context>
chip_gen: v5e
topology: v5e:2x2
jax: 0.10.0
libtpu: 0.0.40
codegen_flags: <defaults>
</compile_context>

<pallas_src>
import functools

import jax
import jax.numpy as jnp
import numpy as np
from jax import lax
from jax.experimental import pallas as pl
from jax.experimental.pallas import tpu as pltpu


def _voxel_head_kernel(xc_ref, w1_ref, b1_ref, w2_ref, b2_ref,
                       wt_ref, bt_ref, wp_ref, bp_ref,
                       o_ref, pad_ref, *, H, W, P):
    """One image per grid step.

    xc_ref : (1, H*W, 9*Cin) bf16   -- conv1 im2col columns
    w1_ref : (9*Cin, Cd)     bf16
    w2_ref : (3, 3*Cd, Cd)   bf16   -- per-dw weight slabs, contraction (dh,ci)
    wt_ref : (Cd, 4*Cd)      bf16   -- 4 deconv taps concatenated on out axis
    wp_ref : (4*Cd, 4*D)     bf16   -- block-diagonal 1x1 predictor
    biases : f32, (1, C) shaped
    o_ref  : (1, H*W, 4*D)   f32    -- lane-dense output slab
    pad_ref: (H*W + 2*P, Cd) f32    -- flat zero-padded activation scratch
    """
    N = H * W
    Cd = w1_ref.shape[1]
    bf16 = jnp.bfloat16
    f32 = jnp.float32

    # ---------------- conv1 + ReLU: single MXU matmul (K = 9*Cin) -----------
    h1 = jnp.dot(xc_ref[0], w1_ref[...], preferred_element_type=f32)
    h1 = jnp.maximum(h1 + b1_ref[...], 0.0)              # (N, Cd) f32

    # ---------------- conv2 + ReLU: flat-padded scratch, 3 K=96 matmuls -----
    # Zero the (8-aligned) borders every step (cheap; safe under megacore
    # grid partitioning), then overwrite the interior with h1.
    zeros_pad = jnp.zeros((P, Cd), f32)
    pad_ref[0:P, :] = zeros_pad
    pad_ref[P + N:P + N + P, :] = zeros_pad
    pad_ref[P:P + N, :] = h1

    # Column index of every flattened output pixel (for W-boundary masking;
    # the H boundaries are handled automatically by the zero pad rows).
    w_idx = lax.broadcasted_iota(jnp.int32, (N, 1), 0) % W

    acc = None
    for ow in (-1, 0, 1):                                 # column offset taps
        base = P + ow
        # Stack the three row offsets along the channel axis -> K = 3*Cd.
        stk = jnp.concatenate(
            [pad_ref[base + oh * W: base + oh * W + N, :] for oh in (-1, 0, 1)],
            axis=1)                                       # (N, 3*Cd) f32
        if ow == -1:
            stk = jnp.where(w_idx >= 1, stk, 0.0)
        elif ow == 1:
            stk = jnp.where(w_idx <= W - 2, stk, 0.0)
        part = jnp.dot(stk.astype(bf16), w2_ref[ow + 1],
                       preferred_element_type=f32)        # (N, Cd)
        acc = part if acc is None else acc + part
    h2 = jnp.maximum(acc + b2_ref[...], 0.0)              # (N, Cd) f32

    # ------------- ConvTranspose2d(2x2, s2) + ReLU, all 4 taps fused --------
    t = jnp.dot(h2.astype(bf16), wt_ref[...], preferred_element_type=f32)
    t = jnp.maximum(t + bt_ref[...], 0.0)                 # (N, 4*Cd) f32

    # ------------- 1x1 predictor as a block-diagonal matmul -----------------
    v = jnp.dot(t.astype(bf16), wp_ref[...],
                preferred_element_type=f32) + bp_ref[...]  # (N, 4*D) f32
    o_ref[0] = v


@jax.jit
def voxel_head_forward(x_nchw, params):
    """x_nchw: (B, Cin, H, W) float32 -> voxel (B, 1, D, 2H, 2W) float32."""
    B, Cin, H, W = x_nchw.shape
    Cd = params["w1"].shape[-1]
    D = params["wp"].shape[-1]
    N = H * W
    P = ((W + 1 + 7) // 8) * 8            # pad rows (>= W+1, sublane-aligned)
    bf16 = jnp.bfloat16

    # ---------------- layout prep (pure data movement, done by XLA) ---------
    x_nhwc = jnp.transpose(x_nchw, (0, 2, 3, 1))
    xp = jnp.pad(x_nhwc, ((0, 0), (1, 1), (1, 1), (0, 0)))
    # conv1 im2col: columns ordered (dh, dw, ci) to match w1.reshape below.
    x_cols = jnp.concatenate(
        [xp[:, dh:dh + H, dw:dw + W, :] for dh in range(3) for dw in range(3)],
        axis=-1).reshape(B, N, 9 * Cin).astype(bf16)

    w1c = params["w1"].reshape(9 * Cin, Cd).astype(bf16)              # (36, Cd)
    # per-dw slabs with contraction over (dh, ci): (3, 3*Cd, Cd)
    w2s = jnp.transpose(params["w2"], (1, 0, 2, 3)).reshape(3, 3 * Cd, Cd)
    w2s = w2s.astype(bf16)
    # 4 deconv taps (di,dj) concatenated on the output axis: (Cd, 4*Cd)
    wt_cat = jnp.transpose(params["wt"], (2, 0, 1, 3)).reshape(Cd, 4 * Cd)
    wt_cat = wt_cat.astype(bf16)
    bt_cat = jnp.tile(params["bt"], (1, 4))                           # (1, 4*Cd)
    # 1x1 predictor applied per tap -> block diagonal (4*Cd, 4*D)
    wp_blk = jnp.kron(jnp.eye(4, dtype=params["wp"].dtype),
                      params["wp"]).astype(bf16)
    bp_cat = jnp.tile(params["bp"], (1, 4))                           # (1, 4*D)

    kernel = functools.partial(_voxel_head_kernel, H=H, W=W, P=P)

    def full_spec(a):
        return pl.BlockSpec(a.shape, lambda b, n=a.ndim: (0,) * n)

    out = pl.pallas_call(
        kernel,
        out_shape=jax.ShapeDtypeStruct((B, N, 4 * D), jnp.float32),
        grid=(B,),
        in_specs=[
            pl.BlockSpec((1, N, 9 * Cin), lambda b: (b, 0, 0)),
            full_spec(w1c), full_spec(params["b1"]),
            full_spec(w2s), full_spec(params["b2"]),
            full_spec(wt_cat), full_spec(bt_cat),
            full_spec(wp_blk), full_spec(bp_cat),
        ],
        out_specs=pl.BlockSpec((1, N, 4 * D), lambda b: (b, 0, 0)),
        scratch_shapes=[pltpu.VMEM((N + 2 * P, Cd), jnp.float32)],
        compiler_params=pltpu.CompilerParams(
            dimension_semantics=("parallel",)),
    )(x_cols, w1c, params["b1"], w2s, params["b2"],
      wt_cat, bt_cat, wp_blk, bp_cat)

    # Sub-pixel interleave (layout glue): (B, N, 4*D) -> (B, 1, D, 2H, 2W).
    o = out.reshape(B, H, W, 2, 2, D)                    # [b, i, j, di, dj, d]
    o = jnp.transpose(o, (0, 5, 1, 3, 2, 4))             # [b, d, i, di, j, dj]
    o = o.reshape(B, D, 2 * H, 2 * W)
    return o[:, None]                                    # (B, 1, D, 2H, 2W)


@jax.jit
def reference_forward(x_nchw, params):
    """Plain-JAX f32 reference with PyTorch conv semantics for verification."""
    hp = lax.Precision.HIGHEST
    w1 = jnp.transpose(params["w1"], (3, 2, 0, 1))       # HWIO -> OIHW
    w2 = jnp.transpose(params["w2"], (3, 2, 0, 1))
    y = lax.conv_general_dilated(x_nchw, w1, (1, 1), ((1, 1), (1, 1)),
                                 dimension_numbers=("NCHW", "OIHW", "NCHW"),
                                 precision=hp)
    y = jnp.maximum(y + params["b1"].reshape(1, -1, 1, 1), 0.0)
    y = lax.conv_general_dilated(y, w2, (1, 1), ((1, 1), (1, 1)),
                                 dimension_numbers=("NCHW", "OIHW", "NCHW"),
                                 precision=hp)
    y = jnp.maximum(y + params["b2"].reshape(1, -1, 1, 1), 0.0)
    B, Cd, H, W = y.shape
    # ConvTranspose2d k=2 s=2: out[b,o,2h+i,2w+j] = sum_c y[b,c,h,w]*wt[i,j,c,o]
    t = jnp.einsum("bchw,ijco->bohiwj", y, params["wt"], precision=hp)
    t = t.reshape(B, Cd, 2 * H, 2 * W) + params["bt"].reshape(1, -1, 1, 1)
    t = jnp.maximum(t, 0.0)
    v = jnp.einsum("bchw,cd->bdhw", t, params["wp"],
                   precision=hp) + params["bp"].reshape(1, -1, 1, 1)
    D = params["wp"].shape[1]
    return v.reshape(B, 1, D, 2 * H, 2 * W)


def make_params(key, Cin, Cd, D):
    """Deterministic synthetic init mimicking c2_msra_fill / normal(std=1e-3)."""
    ks = jax.random.split(key, 4)

    def msra(k, shape, fan_out):
        return jax.random.normal(k, shape, jnp.float32) * np.float32(
            np.sqrt(2.0 / fan_out))

    return dict(
        w1=msra(ks[0], (3, 3, Cin, Cd), Cd * 9), b1=jnp.zeros((1, Cd), jnp.float32),
        w2=msra(ks[1], (3, 3, Cd, Cd), Cd * 9),  b2=jnp.zeros((1, Cd), jnp.float32),
        wt=msra(ks[2], (2, 2, Cd, Cd), Cd * 4),  bt=jnp.zeros((1, Cd), jnp.float32),
        wp=jax.random.normal(ks[3], (Cd, D), jnp.float32) * np.float32(1e-3),
        bp=jnp.zeros((1, D), jnp.float32),
    )


if __name__ == "__main__":
    key = jax.random.PRNGKey(0)
    kx, kp = jax.random.split(key)
    B, Cin, H, W = 2, 4, 16, 16       # input feature map (B, C, H, W)
    conv_dims, num_depth = 32, 8      # CONV_DIM, VOXEL_SIZE; CLASS_AGNOSTIC=True

    x = jax.random.normal(kx, (B, Cin, H, W), jnp.float32)
    params = make_params(kp, Cin, conv_dims, num_depth)

    voxel = jax.block_until_ready(voxel_head_forward(x, params))
    ref = jax.block_until_ready(reference_forward(x, params))

    assert voxel.shape == (B, 1, num_depth, 2 * H, 2 * W), voxel.shape
    # Kernel uses bf16 MXU inputs with f32 accumulation; reference is full f32,
    # so the tolerance is set for bf16-level agreement.
    np.testing.assert_allclose(np.asarray(voxel), np.asarray(ref),
                               rtol=1e-2, atol=2e-3)
    print("KERNEL_OK")
</pallas_src>

<mosaic_0001>
module attributes {stable_mosaic.version = 11 : i64} {
  func.func @_voxel_head_kernel(%arg0: i32, %arg1: memref<1x256x36xbf16, #tpu.memory_space<vmem>>, %arg2: memref<36x32xbf16, #tpu.memory_space<vmem>>, %arg3: memref<1x32xf32, #tpu.memory_space<vmem>>, %arg4: memref<3x96x32xbf16, #tpu.memory_space<vmem>>, %arg5: memref<1x32xf32, #tpu.memory_space<vmem>>, %arg6: memref<32x128xbf16, #tpu.memory_space<vmem>>, %arg7: memref<1x128xf32, #tpu.memory_space<vmem>>, %arg8: memref<128x32xbf16, #tpu.memory_space<vmem>>, %arg9: memref<1x32xf32, #tpu.memory_space<vmem>>, %arg10: memref<1x256x32xf32, #tpu.memory_space<vmem>>, %arg11: memref<304x32xf32, #tpu.memory_space<vmem>>) attributes {dimension_semantics = [#tpu.dimension_semantics<parallel>], iteration_bounds = array<i64: 2>, scalar_prefetch = 0 : i64, scratch_operands = 1 : i64, tpu.core_type = #tpu.core_type<tc>, window_params = [{transform_indices = @transform_0, window_bounds = array<i64: 1, 256, 36>}, {pipeline_mode = #tpu.pipeline_mode<synchronous>, transform_indices = @transform_1, window_bounds = array<i64: 36, 32>}, {pipeline_mode = #tpu.pipeline_mode<synchronous>, transform_indices = @transform_2, window_bounds = array<i64: 1, 32>}, {pipeline_mode = #tpu.pipeline_mode<synchronous>, transform_indices = @transform_3, window_bounds = array<i64: 3, 96, 32>}, {pipeline_mode = #tpu.pipeline_mode<synchronous>, transform_indices = @transform_4, window_bounds = array<i64: 1, 32>}, {pipeline_mode = #tpu.pipeline_mode<synchronous>, transform_indices = @transform_5, window_bounds = array<i64: 32, 128>}, {pipeline_mode = #tpu.pipeline_mode<synchronous>, transform_indices = @transform_6, window_bounds = array<i64: 1, 128>}, {pipeline_mode = #tpu.pipeline_mode<synchronous>, transform_indices = @transform_7, window_bounds = array<i64: 128, 32>}, {pipeline_mode = #tpu.pipeline_mode<synchronous>, transform_indices = @transform_8, window_bounds = array<i64: 1, 32>}, {transform_indices = @transform_9, window_bounds = array<i64: 1, 256, 32>}]} {
    %c0 = arith.constant 0 : index
    %c0_0 = arith.constant 0 : index
    %c0_1 = arith.constant 0 : index
    %0 = vector.load %arg1[%c0, %c0_0, %c0_1] : memref<1x256x36xbf16, #tpu.memory_space<vmem>>, vector<1x256x36xbf16>
    %1 = vector.shape_cast %0 : vector<1x256x36xbf16> to vector<256x36xbf16>
    %c0_2 = arith.constant 0 : index
    %c0_3 = arith.constant 0 : index
    %2 = vector.load %arg2[%c0_2, %c0_3] : memref<36x32xbf16, #tpu.memory_space<vmem>>, vector<36x32xbf16>
    %cst = arith.constant dense<0.000000e+00> : vector<256x32xf32>
    %3 = tpu.matmul %1, %2, %cst {dimension_numbers = #tpu.dot_dimension_numbers<[1], [0], [0], [1], [0, 0, 1, 1], [], []>} : vector<256x36xbf16>, vector<36x32xbf16>, vector<256x32xf32> -> vector<256x32xf32>
    %c0_4 = arith.constant 0 : index
    %c0_5 = arith.constant 0 : index
    %4 = vector.load %arg3[%c0_4, %c0_5] : memref<1x32xf32, #tpu.memory_space<vmem>>, vector<1x32xf32>
    %5 = vector.broadcast %4 : vector<1x32xf32> to vector<256x32xf32>
    %6 = arith.addf %3, %5 : vector<256x32xf32>
    %cst_6 = arith.constant 0.000000e+00 : f32
    %7 = vector.broadcast %cst_6 : f32 to vector<256x32xf32>
    %8 = arith.maximumf %6, %7 : vector<256x32xf32>
    %cst_7 = arith.constant 0.000000e+00 : f32
    %9 = vector.broadcast %cst_7 : f32 to vector<24x32xf32>
    %c0_8 = arith.constant 0 : index
    %c0_9 = arith.constant 0 : index
    %10 = vector.load %arg11[%c0_8, %c0_9] : memref<304x32xf32, #tpu.memory_space<vmem>>, vector<24x32xf32>
    tpu.vector_store %arg11[%c0_8, %c0_9], %9 {strides = array<i32>} : memref<304x32xf32, #tpu.memory_space<vmem>>, vector<24x32xf32>,
    %c280 = arith.constant 280 : index
    %c0_10 = arith.constant 0 : index
    %11 = vector.load %arg11[%c280, %c0_10] : memref<304x32xf32, #tpu.memory_space<vmem>>, vector<24x32xf32>
    tpu.vector_store %arg11[%c280, %c0_10], %9 {strides = array<i32>} : memref<304x32xf32, #tpu.memory_space<vmem>>, vector<24x32xf32>,
    %c24 = arith.constant 24 : index
    %c0_11 = arith.constant 0 : index
    %12 = vector.load %arg11[%c24, %c0_11] : memref<304x32xf32, #tpu.memory_space<vmem>>, vector<256x32xf32>
    tpu.vector_store %arg11[%c24, %c0_11], %8 {strides = array<i32>} : memref<304x32xf32, #tpu.memory_space<vmem>>, vector<256x32xf32>,
    %13 = tpu.iota {dimensions = array<i32: 0>} : vector<256x1xi32>
    %c16_i32 = arith.constant 16 : i32
    %c0_i32 = arith.constant 0 : i32
    %14 = arith.cmpi eq, %c16_i32, %c0_i32 : i32
    %c1_i32 = arith.constant 1 : i32
    %15 = arith.select %14, %c1_i32, %c16_i32 : i32
    %16 = vector.broadcast %15 : i32 to vector<256x1xi32>
    %17 = arith.remsi %13, %16 : vector<256x1xi32>
    %c0_i32_12 = arith.constant 0 : i32
    %18 = vector.broadcast %c0_i32_12 : i32 to vector<256x1xi32>
    %19 = arith.cmpi ne, %17, %18 : vector<256x1xi32>
    %c0_i32_13 = arith.constant 0 : i32
    %20 = vector.broadcast %c0_i32_13 : i32 to vector<256x1xi32>
    %21 = arith.cmpi slt, %17, %20 : vector<256x1xi32>
    %c0_i32_14 = arith.constant 0 : i32
    %22 = arith.cmpi slt, %15, %c0_i32_14 : i32
    %23 = vector.broadcast %22 : i1 to vector<256x1xi1>
    %24 = vector.broadcast %23 : vector<256x1xi1> to vector<256x1xi1>
    %25 = arith.xori %21, %24 : vector<256x1xi1>
    %26 = arith.andi %25, %19 : vector<256x1xi1>
    %27 = vector.broadcast %15 : i32 to vector<256x1xi32>
    %28 = arith.addi %17, %27 : vector<256x1xi32>
    %29 = arith.select %26, %28, %17 : vector<256x1xi1>, vector<256x1xi32>
    %c7 = arith.constant 7 : index
    %c0_15 = arith.constant 0 : index
    %30 = vector.load %arg11[%c7, %c0_15] : memref<304x32xf32, #tpu.memory_space<vmem>>, vector<256x32xf32>
    %c23 = arith.constant 23 : index
    %c0_16 = arith.constant 0 : index
    %31 = vector.load %arg11[%c23, %c0_16] : memref<304x32xf32, #tpu.memory_space<vmem>>, vector<256x32xf32>
    %c39 = arith.constant 39 : index
    %c0_17 = arith.constant 0 : index
    %32 = vector.load %arg11[%c39, %c0_17] : memref<304x32xf32, #tpu.memory_space<vmem>>, vector<256x32xf32>
    %33 = tpu.concatenate %30, %31, %32 in 1 : vector<256x32xf32>, vector<256x32xf32>, vector<256x32xf32> -> vector<256x96xf32>
    %c1_i32_18 = arith.constant 1 : i32
    %34 = vector.broadcast %c1_i32_18 : i32 to vector<256x1xi32>
    %35 = arith.cmpi sge, %29, %34 : vector<256x1xi32>
    %cst_19 = arith.constant 0.000000e+00 : f32
    %36 = vector.shape_cast %35 : vector<256x1xi1> to vector<256x1xi1>
    %37 = vector.broadcast %36 : vector<256x1xi1> to vector<256x96xi1>
    %38 = vector.broadcast %cst_19 : f32 to vector<256x96xf32>
    %39 = arith.select %37, %33, %38 : vector<256x96xi1>, vector<256x96xf32>
    %40 = arith.truncf %39 : vector<256x96xf32> to vector<256x96xbf16>
    %c0_20 = arith.constant 0 : index
    %c0_21 = arith.constant 0 : index
    %c0_22 = arith.constant 0 : index
    %41 = vector.load %arg4[%c0_20, %c0_21, %c0_22] : memref<3x96x32xbf16, #tpu.memory_space<vmem>>, vector<1x96x32xbf16>
    %42 = vector.shape_cast %41 : vector<1x96x32xbf16> to vector<96x32xbf16>
    %cst_23 = arith.constant dense<0.000000e+00> : vector<256x32xf32>
    %43 = tpu.matmul %40, %42, %cst_23 {dimension_numbers = #tpu.dot_dimension_numbers<[1], [0], [0], [1], [0, 0, 1, 1], [], []>} : vector<256x96xbf16>, vector<96x32xbf16>, vector<256x32xf32> -> vector<256x32xf32>
    %c8 = arith.constant 8 : index
    %c0_24 = arith.constant 0 : index
    %44 = vector.load %arg11[%c8, %c0_24] : memref<304x32xf32, #tpu.memory_space<vmem>>, vector<256x32xf32>
    %c24_25 = arith.constant 24 : index
    %c0_26 = arith.constant 0 : index
    %45 = vector.load %arg11[%c24_25, %c0_26] : memref<304x32xf32, #tpu.memory_space<vmem>>, vector<256x32xf32>
    %c40 = arith.constant 40 : index
    %c0_27 = arith.constant 0 : index
    %46 = vector.load %arg11[%c40, %c0_27] : memref<304x32xf32, #tpu.memory_space<vmem>>, vector<256x32xf32>
    %47 = tpu.concatenate %44, %45, %46 in 1 : vector<256x32xf32>, vector<256x32xf32>, vector<256x32xf32> -> vector<256x96xf32>
    %48 = arith.truncf %47 : vector<256x96xf32> to vector<256x96xbf16>
    %c1 = arith.constant 1 : index
    %c0_28 = arith.constant 0 : index
    %c0_29 = arith.constant 0 : index
    %49 = vector.load %arg4[%c1, %c0_28, %c0_29] : memref<3x96x32xbf16, #tpu.memory_space<vmem>>, vector<1x96x32xbf16>
    %50 = vector.shape_cast %49 : vector<1x96x32xbf16> to vector<96x32xbf16>
    %cst_30 = arith.constant dense<0.000000e+00> : vector<256x32xf32>
    %51 = tpu.matmul %48, %50, %cst_30 {dimension_numbers = #tpu.dot_dimension_numbers<[1], [0], [0], [1], [0, 0, 1, 1], [], []>} : vector<256x96xbf16>, vector<96x32xbf16>, vector<256x32xf32> -> vector<256x32xf32>
    %52 = arith.addf %43, %51 : vector<256x32xf32>
    %c9 = arith.constant 9 : index
    %c0_31 = arith.constant 0 : index
    %53 = vector.load %arg11[%c9, %c0_31] : memref<304x32xf32, #tpu.memory_space<vmem>>, vector<256x32xf32>
    %c25 = arith.constant 25 : index
    %c0_32 = arith.constant 0 : index
    %54 = vector.load %arg11[%c25, %c0_32] : memref<304x32xf32, #tpu.memory_space<vmem>>, vector<256x32xf32>
    %c41 = arith.constant 41 : index
    %c0_33 = arith.constant 0 : index
    %55 = vector.load %arg11[%c41, %c0_33] : memref<304x32xf32, #tpu.memory_space<vmem>>, vector<256x32xf32>
    %56 = tpu.concatenate %53, %54, %55 in 1 : vector<256x32xf32>, vector<256x32xf32>, vector<256x32xf32> -> vector<256x96xf32>
    %c14_i32 = arith.constant 14 : i32
    %57 = vector.broadcast %c14_i32 : i32 to vector<256x1xi32>
    %58 = arith.cmpi sle, %29, %57 : vector<256x1xi32>
    %cst_34 = arith.constant 0.000000e+00 : f32
    %59 = vector.shape_cast %58 : vector<256x1xi1> to vector<256x1xi1>
    %60 = vector.broadcast %59 : vector<256x1xi1> to vector<256x96xi1>
    %61 = vector.broadcast %cst_34 : f32 to vector<256x96xf32>
    %62 = arith.select %60, %56, %61 : vector<256x96xi1>, vector<256x96xf32>
    %63 = arith.truncf %62 : vector<256x96xf32> to vector<256x96xbf16>
    %c2 = arith.constant 2 : index
    %c0_35 = arith.constant 0 : index
    %c0_36 = arith.constant 0 : index
    %64 = vector.load %arg4[%c2, %c0_35, %c0_36] : memref<3x96x32xbf16, #tpu.memory_space<vmem>>, vector<1x96x32xbf16>
    %65 = vector.shape_cast %64 : vector<1x96x32xbf16> to vector<96x32xbf16>
    %cst_37 = arith.constant dense<0.000000e+00> : vector<256x32xf32>
    %66 = tpu.matmul %63, %65, %cst_37 {dimension_numbers = #tpu.dot_dimension_numbers<[1], [0], [0], [1], [0, 0, 1, 1], [], []>} : vector<256x96xbf16>, vector<96x32xbf16>, vector<256x32xf32> -> vector<256x32xf32>
    %67 = arith.addf %52, %66 : vector<256x32xf32>
    %c0_38 = arith.constant 0 : index
    %c0_39 = arith.constant 0 : index
    %68 = vector.load %arg5[%c0_38, %c0_39] : memref<1x32xf32, #tpu.memory_space<vmem>>, vector<1x32xf32>
    %69 = vector.broadcast %68 : vector<1x32xf32> to vector<256x32xf32>
    %70 = arith.addf %67, %69 : vector<256x32xf32>
    %cst_40 = arith.constant 0.000000e+00 : f32
    %71 = vector.broadcast %cst_40 : f32 to vector<256x32xf32>
    %72 = arith.maximumf %70, %71 : vector<256x32xf32>
    %73 = arith.truncf %72 : vector<256x32xf32> to vector<256x32xbf16>
    %c0_41 = arith.constant 0 : index
    %c0_42 = arith.constant 0 : index
    %74 = vector.load %arg6[%c0_41, %c0_42] : memref<32x128xbf16, #tpu.memory_space<vmem>>, vector<32x128xbf16>
    %cst_43 = arith.constant dense<0.000000e+00> : vector<256x128xf32>
    %75 = tpu.matmul %73, %74, %cst_43 {dimension_numbers = #tpu.dot_dimension_numbers<[1], [0], [0], [1], [0, 0, 1, 1], [], []>} : vector<256x32xbf16>, vector<32x128xbf16>, vector<256x128xf32> -> vector<256x128xf32>
    %c0_44 = arith.constant 0 : index
    %c0_45 = arith.constant 0 : index
    %76 = vector.load %arg7[%c0_44, %c0_45] : memref<1x128xf32, #tpu.memory_space<vmem>>, vector<1x128xf32>
    %77 = vector.broadcast %76 : vector<1x128xf32> to vector<256x128xf32>
    %78 = arith.addf %75, %77 : vector<256x128xf32>
    %cst_46 = arith.constant 0.000000e+00 : f32
    %79 = vector.broadcast %cst_46 : f32 to vector<256x128xf32>
    %80 = arith.maximumf %78, %79 : vector<256x128xf32>
    %81 = arith.truncf %80 : vector<256x128xf32> to vector<256x128xbf16>
    %c0_47 = arith.constant 0 : index
    %c0_48 = arith.constant 0 : index
    %82 = vector.load %arg8[%c0_47, %c0_48] : memref<128x32xbf16, #tpu.memory_space<vmem>>, vector<128x32xbf16>
    %cst_49 = arith.constant dense<0.000000e+00> : vector<256x32xf32>
    %83 = tpu.matmul %81, %82, %cst_49 {dimension_numbers = #tpu.dot_dimension_numbers<[1], [0], [0], [1], [0, 0, 1, 1], [], []>} : vector<256x128xbf16>, vector<128x32xbf16>, vector<256x32xf32> -> vector<256x32xf32>
    %c0_50 = arith.constant 0 : index
    %c0_51 = arith.constant 0 : index
    %84 = vector.load %arg9[%c0_50, %c0_51] : memref<1x32xf32, #tpu.memory_space<vmem>>, vector<1x32xf32>
    %85 = vector.broadcast %84 : vector<1x32xf32> to vector<256x32xf32>
    %86 = arith.addf %83, %85 : vector<256x32xf32>
    %c0_52 = arith.constant 0 : index
    %c0_53 = arith.constant 0 : index
    %c0_54 = arith.constant 0 : index
    %87 = vector.load %arg10[%c0_52, %c0_53, %c0_54] : memref<1x256x32xf32, #tpu.memory_space<vmem>>, vector<1x256x32xf32>
    %88 = vector.shape_cast %87 : vector<1x256x32xf32> to vector<256x32xf32>
    %89 = vector.shape_cast %86 : vector<256x32xf32> to vector<1x256x32xf32>
    tpu.vector_store %arg10[%c0_52, %c0_53, %c0_54], %89 {strides = array<i32>} : memref<1x256x32xf32, #tpu.memory_space<vmem>>, vector<1x256x32xf32>,
    return
  }
  func.func @transform_0(%arg0: i32) -> (i32, i32, i32) {
    %c0_i32 = arith.constant 0 : i32
    %c0_i32_0 = arith.constant 0 : i32
    %c0_i32_1 = arith.constant 0 : i32
    return %arg0, %c0_i32, %c0_i32_0 : i32, i32, i32
  }
  func.func @transform_1(%arg0: i32) -> (i32, i32) {
    %c0_i32 = arith.constant 0 : i32
    %c0_i32_0 = arith.constant 0 : i32
    %c0_i32_1 = arith.constant 0 : i32
    return %c0_i32, %c0_i32_0 : i32, i32
  }
  func.func @transform_2(%arg0: i32) -> (i32, i32) {
    %c0_i32 = arith.constant 0 : i32
    %c0_i32_0 = arith.constant 0 : i32
    %c0_i32_1 = arith.constant 0 : i32
    return %c0_i32, %c0_i32_0 : i32, i32
  }
  func.func @transform_3(%arg0: i32) -> (i32, i32, i32) {
    %c0_i32 = arith.constant 0 : i32
    %c0_i32_0 = arith.constant 0 : i32
    %c0_i32_1 = arith.constant 0 : i32
    %c0_i32_2 = arith.constant 0 : i32
    return %c0_i32, %c0_i32_0, %c0_i32_1 : i32, i32, i32
  }
  func.func @transform_4(%arg0: i32) -> (i32, i32) {
    %c0_i32 = arith.constant 0 : i32
    %c0_i32_0 = arith.constant 0 : i32
    %c0_i32_1 = arith.constant 0 : i32
    return %c0_i32, %c0_i32_0 : i32, i32
  }
  func.func @transform_5(%arg0: i32) -> (i32, i32) {
    %c0_i32 = arith.constant 0 : i32
    %c0_i32_0 = arith.constant 0 : i32
    %c0_i32_1 = arith.constant 0 : i32
    return %c0_i32, %c0_i32_0 : i32, i32
  }
  func.func @transform_6(%arg0: i32) -> (i32, i32) {
    %c0_i32 = arith.constant 0 : i32
    %c0_i32_0 = arith.constant 0 : i32
    %c0_i32_1 = arith.constant 0 : i32
    return %c0_i32, %c0_i32_0 : i32, i32
  }
  func.func @transform_7(%arg0: i32) -> (i32, i32) {
    %c0_i32 = arith.constant 0 : i32
    %c0_i32_0 = arith.constant 0 : i32
    %c0_i32_1 = arith.constant 0 : i32
    return %c0_i32, %c0_i32_0 : i32, i32
  }
  func.func @transform_8(%arg0: i32) -> (i32, i32) {
    %c0_i32 = arith.constant 0 : i32
    %c0_i32_0 = arith.constant 0 : i32
    %c0_i32_1 = arith.constant 0 : i32
    return %c0_i32, %c0_i32_0 : i32, i32
  }
  func.func @transform_9(%arg0: i32) -> (i32, i32, i32) {
    %c0_i32 = arith.constant 0 : i32
    %c0_i32_0 = arith.constant 0 : i32
    %c0_i32_1 = arith.constant 0 : i32
    return %arg0, %c0_i32, %c0_i32_0 : i32, i32, i32
  }
}

</mosaic_0001>

<bundles_post_ra>
// kernel: voxel_head_forward.1
= control target key start
LH: loop header
LB: loop body
LE: loop exit
PB: predicated region body
PF: predicated region fallthrough
CT: control target
= control target key end

     0   :  { %s4472_s30 = smov 0   ;;  %s5905_s0 = inlined_call_operand.vmem [shape: bf16[2,256,36], index: 0, kind: input, shape index: {}]   ;;  %s5906_s1 = inlined_call_operand.vmem [shape: bf16[36,32], index: 1, kind: input, shape index: {}]   ;;  %s5907_s2 = inlined_call_operand.vmem [shape: f32[1,32], index: 2, kind: input, shape index: {}]   ;;  %s5908_s3 = inlined_call_operand.vmem [shape: bf16[3,96,32], index: 3, kind: input, shape index: {}]   ;;  %s5909_s4 = inlined_call_operand.vmem [shape: f32[1,32], index: 4, kind: input, shape index: {}]   ;;  %s5910_s5 = inlined_call_operand.vmem [shape: bf16[32,128], index: 5, kind: input, shape index: {}]   ;;  %s5911_s6 = inlined_call_operand.vmem [shape: f32[1,128], index: 6, kind: input, shape index: {}]   ;;  %s5912_s7 = inlined_call_operand.vmem [shape: bf16[128,32], index: 7, kind: input, shape index: {}]   ;;  %s5913_s8 = inlined_call_operand.vmem [shape: f32[1,32], index: 8, kind: input, shape index: {}]   ;;  %s5914_s9 = inlined_call_operand.vmem [shape: f32[2,256,32], index: 9, kind: output, shape index: {}]  }
   0x1 LB: > { %s3506_s10 = sadd.s32 4294967295, %s4417_s30   ;;  %p3510_p0 = scmp.ge.s32.totalorder %s4417_s30, 1  ;;  %s4417_s30 = sphi %s4472_s30, %s19_s30  }
   0x2   : > { %p287_p1 = scmp.lt.s32.totalorder %s4417_s30, 3 }
   0x4   : > { %p288_p2 = pnand %p3510_p0, %p287_p1 }
   0x6   : > { %291 = sbr.rel (%p288_p2) target bundleno = 1227 (0x4cb), region = 56 }
   0xb   : > { %v370_v0 = vld [vmem:[%s5906_s1 + $0x10] sm:$0x3]  ;;  %p323_p3 = scmp.lt.s32.totalorder %s3506_s10, 1  ;;  %vm519_vm0 = vcmask 1041408   ;;  %v3824_v4 = vld [vmem:[%s5906_s1 + $0x8] sm:$0xff]  ;;  %v3823_v5 = vld [vmem:[%s5906_s1] sm:$0xff] }
   0xc   : > { %v464_v1 = vunpack.c.l.b16 %v370_v0  ;;  %vm470_vm1 = vcmask 293888   ;;  %vm644_vm2 = vcmask 261120   ;;  %v4419_v20 = vmov 0.0   ;;  %v4536_v22 = vld [vmem:[%s5907_s2] ss:$0 sm:$0xff]  ;;  %s4420_s23 = smov 32  }
   0xd   : > { %s5958_s10 = smov (!%p323_p3, %s3506_s10), 1  ;;  %647 = vst.msk [vmem:[#allocation2 + $0x10] sm:$0xff] %vm644_vm2, %v4419_v20  ;;  %s4421_s24 = smov 64   ;;  %vm1394_vm3 = vcmask 523264   ;;  %vm1974_vm6 = vcmask 785408  }
   0xe   : > { %v467_v2 = vpack.c.b16 %v464_v1, %v464_v1  ;;  %s3805_s15 = sshll.u32 %s5958_s10, 7  ;;  %645 = vst.msk [vmem:[#allocation2] sm:$0xff] %vm644_vm2, %v4419_v20  ;;  %s3806_s11 = sshll.u32 %s5958_s10, 8 }
   0xf   : > { %s4495_s20 = scalar_lea.vmem %s5905_s0, %s3805_s15  ;;  %646 = vst.msk [vmem:[#allocation2 + $0x8] sm:$0xff] %vm644_vm2, %v4419_v20  ;;  %s5790_s16 = scalar_lea.vmem %s5914_s9, %s3806_s11 }
  0x10   : > { %v521_v3 = vsel %vm519_vm0, %v467_v2, 0  ;;  %v3807_v6 = vld [vmem:[%s4495_s20] sm:$0xff]  ;;  %v3816_v7 = vld [vmem:[%s4495_s20 + $0x48] sm:$0xff]  ;;  %v3817_v9 = vld [vmem:[%s4495_s20 + $0x50] sm:$0xff]  ;;  %648 = vst.msk [vmem:[#allocation2 + $0x118] sm:$0xff] %vm644_vm2, %v4419_v20 }
  0x11   : > { %528 = vmatpush.bf16.msra.mxu0 %v521_v3  ;;  %3853 = vmatpush.bf16.msra.mxu3 %v521_v3  ;;  %v3808_v8 = vld [vmem:[%s4495_s20 + $0x8] sm:$0xff]  ;;  %v3809_v10 = vld [vmem:[%s4495_s20 + $0x10] sm:$0xff]  ;;  %v3818_v11 = vld [vmem:[%s4495_s20 + $0x58] sm:$0xff]  ;;  %649 = vst.msk [vmem:[#allocation2 + $0x120] sm:$0xff] %vm644_vm2, %v4419_v20 }
  0x12   : > { %v3810_v12 = vld [vmem:[%s4495_s20 + $0x18] sm:$0xff]  ;;  %v3819_v13 = vld [vmem:[%s4495_s20 + $0x60] sm:$0xff]  ;;  %v3820_v15 = vld [vmem:[%s4495_s20 + $0x68] sm:$0xff]  ;;  %650 = vst.msk [vmem:[#allocation2 + $0x128] sm:$0xff] %vm644_vm2, %v4419_v20 }
  0x13   : > { %v3811_v14 = vld [vmem:[%s4495_s20 + $0x20] sm:$0xff]  ;;  %v3812_v16 = vld [vmem:[%s4495_s20 + $0x28] sm:$0xff]  ;;  %v3821_v17 = vld [vmem:[%s4495_s20 + $0x70] sm:$0xff] }
  0x14   : > { %v3813_v18 = vld [vmem:[%s4495_s20 + $0x30] sm:$0xff]  ;;  %v3822_v19 = vld [vmem:[%s4495_s20 + $0x78] sm:$0xff]  ;;  %v3815_v23 = vld [vmem:[%s4495_s20 + $0x40] sm:$0xff] }
  0x15   : > { %529 = vmatpush.bf16.msra.mxu0 %v3824_v4  ;;  %3854 = vmatpush.bf16.msra.mxu3 %v3824_v4  ;;  %v3814_v21 = vld [vmem:[%s4495_s20 + $0x38] sm:$0xff] }
  0x19   : > { %530 = vmatpush.bf16.msra.mxu0 %v3823_v5  ;;  %3855 = vmatpush.bf16.msra.mxu3 %v3823_v5 }
  0x1c   : > { %3587 = vmatmul.msk.bf16.vlgmr.msra.gmra.mxu0 %vm470_vm1, %v3807_v6  ;;  %3596 = vmatmul.msk.bf16.vlgmr.msra.gmra.mxu3 %vm470_vm1, %v3816_v7 }
  0x2c   : > { %3588 = vmatmul.msk.bf16.gmra.mxu0 %vm470_vm1, %v3808_v8  ;;  %3597 = vmatmul.msk.bf16.gmra.mxu3 %vm470_vm1, %v3817_v9 }
  0x3c   : > { %3589 = vmatmul.msk.bf16.gmra.mxu0 %vm470_vm1, %v3809_v10  ;;  %3598 = vmatmul.msk.bf16.gmra.mxu3 %vm470_vm1, %v3818_v11 }
  0x4c   : > { %3590 = vmatmul.msk.bf16.gmra.mxu0 %vm470_vm1, %v3810_v12  ;;  %3599 = vmatmul.msk.bf16.gmra.mxu3 %vm470_vm1, %v3819_v13 }
  0x5c   : > { %3591 = vmatmul.msk.bf16.gmra.mxu0 %vm470_vm1, %v3811_v14  ;;  %3600 = vmatmul.msk.bf16.gmra.mxu3 %vm470_vm1, %v3820_v15 }
  0x6c   : > { %3592 = vmatmul.msk.bf16.gmra.mxu0 %vm470_vm1, %v3812_v16  ;;  %3601 = vmatmul.msk.bf16.gmra.mxu3 %vm470_vm1, %v3821_v17 }
  0x7c   : > { %3593 = vmatmul.msk.bf16.gmra.mxu0 %vm470_vm1, %v3813_v18  ;;  %3602 = vmatmul.msk.bf16.gmra.mxu3 %vm470_vm1, %v3822_v19 }
  0x8c   : > { %3594 = vmatmul.msk.bf16.gmra.mxu0 %vm470_vm1, %v3814_v21 }
  0x99   : > { %v532_v24 = vpop.f32.mrf.mxu0 }
  0x9a   : > { %v533_v25 = vadd.f32 %v4536_v22, %v532_v24 }
  0x9c   : > { %v612_v26 = vmax.f32 %v533_v25, 0.0  ;;  %3595 = vmatmul.msk.bf16.gmra.mxu0 %vm470_vm1, %v3815_v23 }
  0x9e   : > { %651 = vst.msk [vmem:[#allocation2 + $0x18] sm:$0xff] %vm644_vm2, %v612_v26 }
  0x9f   : > { %v577_v27 = vpop.f32.mrf.mxu3 }
  0xa0   : > { %v578_v28 = vadd.f32 %v4536_v22, %v577_v27 }
  0xa1   : > { %v534_v29 = vpop.f32.mrf.mxu0 }
  0xa2   : > { %v630_v30 = vmax.f32 %v578_v28, 0.0  ;;  %v535_v31 = vadd.f32 %v4536_v22, %v534_v29 }
  0xa4   : > { %669 = vst.msk [vmem:[#allocation2 + $0xa8] sm:$0xff] %vm644_vm2, %v630_v30  ;;  %v613_v32 = vmax.f32 %v535_v31, 0.0 }
  0xa6   : > { %652 = vst.msk [vmem:[#allocation2 + $0x20] sm:$0xff] %vm644_vm2, %v613_v32 }
  0xa7   : > { %v579_v33 = vpop.f32.mrf.mxu3 }
  0xa8   : > { %v580_v34 = vadd.f32 %v4536_v22, %v579_v33 }
  0xa9   : > { %v537_v35 = vpop.f32.mrf.mxu0 }
  0xaa   : > { %v631_v36 = vmax.f32 %v580_v34, 0.0  ;;  %v538_v37 = vadd.f32 %v4536_v22, %v537_v35 }
  0xab   : > { %v4551_v42 = vld [vmem:[#allocation2 + $0xa8] sm:$0xff] }
  0xac   : > { %670 = vst.msk [vmem:[#allocation2 + $0xb0] sm:$0xff] %vm644_vm2, %v631_v36  ;;  %v614_v38 = vmax.f32 %v538_v37, 0.0 }
  0xae   : > { %653 = vst.msk [vmem:[#allocation2 + $0x28] sm:$0xff] %vm644_vm2, %v614_v38 }
  0xaf   : > { %v582_v39 = vpop.f32.mrf.mxu3 }
  0xb0   : > { %v583_v40 = vadd.f32 %v4536_v22, %v582_v39 }
  0xb1   : > { %v539_v41 = vpop.f32.mrf.mxu0 }
  0xb2   : > { %v632_v43 = vmax.f32 %v583_v40, 0.0  ;;  %v540_v44 = vadd.f32 %v4536_v22, %v539_v41 }
  0xb3   : > { %v4554_v45 = vld [vmem:[#allocation2 + $0xb0] sm:$0xff] }
  0xb4   : > { %671 = vst.msk [vmem:[#allocation2 + $0xb8] sm:$0xff] %vm644_vm2, %v632_v43  ;;  %v615_v46 = vmax.f32 %v540_v44, 0.0  ;;  %v4559_v47 = vpack.i.bf16 %v4554_v45, %v4551_v42 }
  0xb6   : > { %654 = vst.msk [vmem:[#allocation2 + $0x30] sm:$0xff] %vm644_vm2, %v615_v46  ;;  %3884 = vrot.lane.b32.xlu1 %v4559_v47, %s4420_s23 }
  0xb7   : > { %v584_v48 = vpop.f32.mrf.mxu3 }
  0xb8   : > { %v585_v49 = vadd.f32 %v4536_v22, %v584_v48 }
  0xb9   : > { %v542_v50 = vpop.f32.mrf.mxu0 }
  0xba   : > { %v633_v51 = vmax.f32 %v585_v49, 0.0  ;;  %v543_v52 = vadd.f32 %v4536_v22, %v542_v50 }
  0xbb   : > { %v1605_v57 = vld [vmem:[#allocation2 + $0xb8] sm:$0xff] }
  0xbc   : > { %672 = vst.msk [vmem:[#allocation2 + $0xc0] sm:$0xff] %vm644_vm2, %v633_v51  ;;  %v616_v53 = vmax.f32 %v543_v52, 0.0 }
  0xbe   : > { %655 = vst.msk [vmem:[#allocation2 + $0x38] sm:$0xff] %vm644_vm2, %v616_v53 }
  0xbf   : > { %v587_v54 = vpop.f32.mrf.mxu3 }
  0xc0   : > { %v588_v55 = vadd.f32 %v4536_v22, %v587_v54 }
  0xc1   : > { %v544_v56 = vpop.f32.mrf.mxu0 }
  0xc2   : > { %v634_v58 = vmax.f32 %v588_v55, 0.0  ;;  %v545_v59 = vadd.f32 %v4536_v22, %v544_v56 }
  0xc3   : > { %v1606_v60 = vld [vmem:[#allocation2 + $0xc0] sm:$0xff] }
  0xc4   : > { %673 = vst.msk [vmem:[#allocation2 + $0xc8] sm:$0xff] %vm644_vm2, %v634_v58  ;;  %v617_v61 = vmax.f32 %v545_v59, 0.0  ;;  %v3888_v62 = vpack.i.bf16 %v1606_v60, %v1605_v57 }
  0xc6   : > { %656 = vst.msk [vmem:[#allocation2 + $0x40] sm:$0xff] %vm644_vm2, %v617_v61  ;;  %3889 = vrot.lane.b32.xlu1 %v3888_v62, %s4421_s24  ;;  %3894 = vrot.lane.b32.xlu2 %v3888_v62, %s4420_s23 }
  0xc7   : > { %v589_v63 = vpop.f32.mrf.mxu3 }
  0xc8   : > { %v590_v0 = vadd.f32 %v4536_v22, %v589_v63 }
  0xc9   : > { %v547_v1 = vpop.f32.mrf.mxu0 }
  0xca   : > { %v635_v2 = vmax.f32 %v590_v0, 0.0  ;;  %v548_v3 = vadd.f32 %v4536_v22, %v547_v1 }
  0xcb   : > { %v1607_v8 = vld [vmem:[#allocation2 + $0xc8] sm:$0xff] }
  0xcc   : > { %674 = vst.msk [vmem:[#allocation2 + $0xd0] sm:$0xff] %vm644_vm2, %v635_v2  ;;  %v618_v4 = vmax.f32 %v548_v3, 0.0 }
  0xce   : > { %657 = vst.msk [vmem:[#allocation2 + $0x48] sm:$0xff] %vm644_vm2, %v618_v4 }
  0xcf   : > { %v592_v5 = vpop.f32.mrf.mxu3 }
  0xd0   : > { %v593_v6 = vadd.f32 %v4536_v22, %v592_v5 }
  0xd1   : > { %v549_v7 = vpop.f32.mrf.mxu0 }
  0xd2   : > { %v636_v9 = vmax.f32 %v593_v6, 0.0  ;;  %v550_v10 = vadd.f32 %v4536_v22, %v549_v7 }
  0xd3   : > { %v1608_v11 = vld [vmem:[#allocation2 + $0xd0] sm:$0xff] }
  0xd4   : > { %675 = vst.msk [vmem:[#allocation2 + $0xd8] sm:$0xff] %vm644_vm2, %v636_v9  ;;  %v619_v12 = vmax.f32 %v550_v10, 0.0  ;;  %v4581_v13 = vpack.i.bf16 %v1608_v11, %v1607_v8 }
  0xd6   : > { %658 = vst.msk [vmem:[#allocation2 + $0x50] sm:$0xff] %vm644_vm2, %v619_v12  ;;  %3899 = vrot.lane.b32.xlu2 %v4581_v13, %s4421_s24  ;;  %v4640_v12 = vld [vmem:[#allocation2 + $0x2f] sm:$0xff] }
  0xd7   : > { %v594_v14 = vpop.f32.mrf.mxu3 }
  0xd8   : > { %v595_v15 = vadd.f32 %v4536_v22, %v594_v14  ;;  %v4642_v14 = vld [vmem:[#allocation2 + $0x1f] sm:$0xff] }
  0xd9   : > { %v552_v16 = vpop.f32.mrf.mxu0 }
  0xda   : > { %v637_v17 = vmax.f32 %v595_v15, 0.0  ;;  %v553_v18 = vadd.f32 %v4536_v22, %v552_v16  ;;  %v4645_v16 = vld [vmem:[#allocation2 + $0x27] sm:$0xff] }
  0xdb   : > { %v1609_v24 = vld [vmem:[#allocation2 + $0xd8] sm:$0xff] }
  0xdc   : > { %676 = vst.msk [vmem:[#allocation2 + $0xe0] sm:$0xff] %vm644_vm2, %v637_v17  ;;  %v620_v19 = vmax.f32 %v553_v18, 0.0  ;;  %v4647_v17 = vld [vmem:[#allocation2 + $0x17] sm:$0xff] }
  0xde   : > { %659 = vst.msk [vmem:[#allocation2 + $0x58] sm:$0xff] %vm644_vm2, %v620_v19  ;;  %v3958_v19 = vpack.i.bf16 %v4640_v12, %v4645_v16 }
  0xdf   : > { %v597_v20 = vpop.f32.mrf.mxu3 }
  0xe0   : > { %v598_v21 = vadd.f32 %v4536_v22, %v597_v20  ;;  %v3953_v20 = vpack.i.bf16 %v4642_v14, %v4647_v17 }
  0xe1   : > { %v554_v23 = vpop.f32.mrf.mxu0 }
  0xe2   : > { %v638_v25 = vmax.f32 %v598_v21, 0.0  ;;  %v555_v26 = vadd.f32 %v4536_v22, %v554_v23  ;;  %v4656_v23 = vld [vmem:[#allocation2 + $0x20] sm:$0xff] }
  0xe3   : > { %v1610_v27 = vld [vmem:[#allocation2 + $0xe0] sm:$0xff] }
  0xe4   : > { %677 = vst.msk [vmem:[#allocation2 + $0xe8] sm:$0xff] %vm644_vm2, %v638_v25  ;;  %v621_v28 = vmax.f32 %v555_v26, 0.0  ;;  %v3908_v29 = vpack.i.bf16 %v1610_v27, %v1609_v24  ;;  %v2290_v24 = vld [vmem:[#allocation2 + $0x31] sm:$0xff]  ;;  %v2289_v27 = vld [vmem:[#allocation2 + $0x29] sm:$0xff] }
  0xe5   : > { %v4659_v26 = vld [vmem:[#allocation2 + $0x18] sm:$0xff] }
  0xe6   : > { %660 = vst.msk [vmem:[#allocation2 + $0x60] sm:$0xff] %vm644_vm2, %v621_v28  ;;  %3909 = vrot.lane.b32.xlu1 %v3908_v29, %s4421_s24  ;;  %3914 = vrot.lane.b32.xlu2 %v3908_v29, %s4420_s23  ;;  %v3973_v29 = vpack.i.bf16 %v4656_v23, %v4659_v26 }
  0xe7   : > { %v599_v30 = vpop.f32.mrf.mxu3 }
  0xe8   : > { %v600_v31 = vadd.f32 %v4536_v22, %v599_v30  ;;  %v4663_v30 = vpack.i.bf16 %v2289_v27, %v2290_v24  ;;  %v4745_v27 = vld [vmem:[#allocation2 + $0x21] sm:$0xff] }
  0xe9   : > { %v557_v32 = vpop.f32.mrf.mxu0 }
  0xea   : > { %v639_v33 = vmax.f32 %v600_v31, 0.0  ;;  %v558_v34 = vadd.f32 %v4536_v22, %v557_v32  ;;  %v4669_v31 = vld [vmem:[#allocation2 + $0x3f] sm:$0xff]  ;;  %v4671_v32 = vld [vmem:[#allocation2 + $0x37] sm:$0xff] }
  0xeb   : > { %v4601_v39 = vld [vmem:[#allocation2 + $0xe8] sm:$0xff] }
  0xec   : > { %678 = vst.msk [vmem:[#allocation2 + $0xf0] sm:$0xff] %vm644_vm2, %v639_v33  ;;  %v622_v35 = vmax.f32 %v558_v34, 0.0 }
  0xee   : > { %661 = vst.msk [vmem:[#allocation2 + $0x68] sm:$0xff] %vm644_vm2, %v622_v35 }
  0xef   : > { %v602_v36 = vpop.f32.mrf.mxu3 }
  0xf0   : > { %v603_v37 = vadd.f32 %v4536_v22, %v602_v36 }
  0xf1   : > { %v559_v38 = vpop.f32.mrf.mxu0 }
  0xf2   : > { %v640_v40 = vmax.f32 %v603_v37, 0.0  ;;  %v560_v41 = vadd.f32 %v4536_v22, %v559_v38  ;;  %v1588_v37 = vld [vmem:[#allocation2 + $0x30] sm:$0xff]  ;;  %v2292_v38 = vld [vmem:[#allocation2 + $0x41] sm:$0xff] }
  0xf3   : > { %v4604_v43 = vld [vmem:[#allocation2 + $0xf0] sm:$0xff] }
  0xf4   : > { %679 = vst.msk [vmem:[#allocation2 + $0xf8] sm:$0xff] %vm644_vm2, %v640_v40  ;;  %v623_v44 = vmax.f32 %v560_v41, 0.0  ;;  %v4609_v46 = vpack.i.bf16 %v4604_v43, %v4601_v39  ;;  %v1587_v40 = vld [vmem:[#allocation2 + $0x28] sm:$0xff]  ;;  %v2291_v41 = vld [vmem:[#allocation2 + $0x39] sm:$0xff] }
  0xf6   : > { %662 = vst.msk [vmem:[#allocation2 + $0x70] sm:$0xff] %vm644_vm2, %v623_v44  ;;  %3924 = vrot.lane.b32.xlu1 %v4609_v46, %s4420_s23  ;;  %v4681_v44 = vpack.i.bf16 %v1588_v37, %v1587_v40  ;;  %v1593_v37 = vld [vmem:[#allocation2 + $0x58] sm:$0xff] }
  0xf7   : > { %v604_v48 = vpop.f32.mrf.mxu3 }
  0xf8   : > { %v605_v49 = vadd.f32 %v4536_v22, %v604_v48  ;;  %v4683_v48 = vpack.i.bf16 %v2291_v41, %v2292_v38 }
  0xf9   : > { %v562_v50 = vpop.f32.mrf.mxu0 }
  0xfa   : > { %v641_v51 = vmax.f32 %v605_v49, 0.0  ;;  %v563_v52 = vadd.f32 %v4536_v22, %v562_v50 }
  0xfb   : > { %v4619_v57 = vld [vmem:[#allocation2 + $0xf8] sm:$0xff] }
  0xfc   : > { %680 = vst.msk [vmem:[#allocation2 + $0x100] sm:$0xff] %vm644_vm2, %v641_v51  ;;  %v624_v53 = vmax.f32 %v563_v52, 0.0 }
  0xfd   : > { %v2297_v38 = vld [vmem:[#allocation2 + $0x69] sm:$0xff] }
  0xfe   : > { %663 = vst.msk [vmem:[#allocation2 + $0x78] sm:$0xff] %vm644_vm2, %v624_v53 }
  0xff   : > { %v607_v54 = vpop.f32.mrf.mxu3 }
 0x100   : > { %v608_v55 = vadd.f32 %v4536_v22, %v607_v54  ;;  %v4691_v54 = vld [vmem:[#allocation2 + $0x4f] sm:$0xff] }
 0x101   : > { %v564_v56 = vpop.f32.mrf.mxu0 }
 0x102   : > { %v642_v58 = vmax.f32 %v608_v55, 0.0  ;;  %v565_v59 = vadd.f32 %v4536_v22, %v564_v56 }
 0x103   : > { %v4622_v60 = vld [vmem:[#allocation2 + $0x100] sm:$0xff] }
 0x104   : > { %681 = vst.msk [vmem:[#allocation2 + $0x108] sm:$0xff] %vm644_vm2, %v642_v58  ;;  %v625_v61 = vmax.f32 %v565_v59, 0.0  ;;  %v4627_v62 = vpack.i.bf16 %v4622_v60, %v4619_v57  ;;  %v4695_v58 = vld [vmem:[#allocation2 + $0x47] sm:$0xff] }
 0x106   : > { %664 = vst.msk [vmem:[#allocation2 + $0x80] sm:$0xff] %vm644_vm2, %v625_v61  ;;  %3929 = vrot.lane.b32.xlu2 %v4627_v62, %s4421_s24 }
 0x107   : > { %v609_v63 = vpop.f32.mrf.mxu3 }
 0x108   : > { %v610_v0 = vadd.f32 %v4536_v22, %v609_v63 }
 0x109   : > { %v567_v1 = vpop.f32.mrf.mxu0 }
 0x10a   : > { %v643_v2 = vmax.f32 %v610_v0, 0.0  ;;  %v568_v3 = vadd.f32 %v4536_v22, %v567_v1  ;;  %v1590_v0 = vld [vmem:[#allocation2 + $0x40] sm:$0xff]  ;;  %v2294_v1 = vld [vmem:[#allocation2 + $0x51] sm:$0xff] }
 0x10b   : > { %v1615_v6 = vld [vmem:[#allocation2 + $0x108] sm:$0xff] }
 0x10c   : > { %682 = vst.msk [vmem:[#allocation2 + $0x110] sm:$0xff] %vm644_vm2, %v643_v2  ;;  %v626_v4 = vmax.f32 %v568_v3, 0.0  ;;  %v1589_v2 = vld [vmem:[#allocation2 + $0x38] sm:$0xff]  ;;  %v2293_v3 = vld [vmem:[#allocation2 + $0x49] sm:$0xff] }
 0x10e   : > { %665 = vst.msk [vmem:[#allocation2 + $0x88] sm:$0xff] %vm644_vm2, %v626_v4  ;;  %v4033_v4 = vpack.i.bf16 %v1590_v0, %v1589_v2 }
 0x111   : > { %v569_v5 = vpop.f32.mrf.mxu0 }
 0x112   : > { %v570_v7 = vadd.f32 %v4536_v22, %v569_v5  ;;  %v4711_v5 = vpack.i.bf16 %v2293_v3, %v2294_v1 }
 0x113   : > { %v1616_v8 = vld [vmem:[#allocation2 + $0x110] sm:$0xff] }
 0x114   : > { %v627_v9 = vmax.f32 %v570_v7, 0.0  ;;  %v3943_v10 = vpack.i.bf16 %v1616_v8, %v1615_v6  ;;  %v4718_v6 = vld [vmem:[#allocation2 + $0x5f] sm:$0xff]  ;;  %v4720_v7 = vld [vmem:[#allocation2 + $0x57] sm:$0xff] }
 0x115   : > { %v4048_v8 = vpack.i.bf16 %v4718_v6, %v4720_v7 }
 0x116   : > { %666 = vst.msk [vmem:[#allocation2 + $0x90] sm:$0xff] %vm644_vm2, %v627_v9  ;;  %3944 = vrot.lane.b32.xlu2 %v3943_v10, %s4420_s23  ;;  %3939 = vrot.lane.b32.xlu1 %v3943_v10, %s4421_s24  ;;  %v1592_v9 = vld [vmem:[#allocation2 + $0x50] sm:$0xff]  ;;  %v2296_v10 = vld [vmem:[#allocation2 + $0x61] sm:$0xff] }
 0x119   : > { %v572_v11 = vpop.f32.mrf.mxu0 }
 0x11a   : > { %v573_v15 = vadd.f32 %v4536_v22, %v572_v11  ;;  %v1617_v11 = vld [vmem:[#allocation2 + $0x118] sm:$0xff] }
 0x11c   : > { %v628_v18 = vmax.f32 %v573_v15, 0.0  ;;  %v1591_v15 = vld [vmem:[#allocation2 + $0x48] sm:$0xff] }
 0x11e   : > { %667 = vst.msk [vmem:[#allocation2 + $0x98] sm:$0xff] %vm644_vm2, %v628_v18  ;;  %3959 = vrot.lane.b32.xlu2 %v3958_v19, %s4421_s24  ;;  %3954 = vrot.lane.b32.xlu1 %v3953_v20, %s4420_s23  ;;  %v2295_v18 = vld [vmem:[#allocation2 + $0x59] sm:$0xff] }
 0x11f   : > { %v4732_v20 = vpack.i.bf16 %v2295_v18, %v2296_v10  ;;  %v3835_v10 = vld [vmem:[%s5908_s3 + $0x50] sm:$0xff]  ;;  %v1598_v18 = vld [vmem:[#allocation2 + $0x80] sm:$0xff] }
 0x121   : > { %v574_v21 = vpop.f32.mrf.mxu0 }
 0x122   : > { %v575_v25 = vadd.f32 %v4536_v22, %v574_v21  ;;  %v3988_v22 = vpack.i.bf16 %v4669_v31, %v4671_v32 }
 0x124   : > { %v629_v28 = vmax.f32 %v575_v25, 0.0  ;;  %v4743_v25 = vld [vmem:[#allocation2 + $0x67] sm:$0xff] }
 0x125   : > { %v1601_v33 = vld [vmem:[#allocation2 + $0x98] sm:$0xff] }
 0x126   : > { %668 = vst.msk [vmem:[#allocation2 + $0xa0] sm:$0xff] %vm644_vm2, %v629_v28  ;;  %3974 = vrot.lane.b32.xlu2 %v3973_v29, %s4420_s23  ;;  %3969 = vrot.lane.b32.xlu1 %v4663_v30, %s4421_s24  ;;  %v4749_v29 = vld [vmem:[#allocation2 + $0x19] sm:$0xff] }
 0x128   : > { %v3885_v36 = vpop.permute.xlu1 %3884 }
 0x129   : > { %v3887_v49 = vunpack.i.h.bf16 %v3885_v36  ;;  %v3886_v50 = vunpack.i.l.bf16 %v3885_v36  ;;  %v2298_v36 = vld [vmem:[#allocation2 + $0x71] sm:$0xff] }
 0x12a   : > { %v4760_v41 = vpack.i.bf16 %v2297_v38, %v2298_v36 }
 0x12b   : > { %v1863_v56 = vsel %vm644_vm2, %v1601_v33, %v3886_v50  ;;  %v4770_v50 = vld [vmem:[#allocation2 + $0x7f] sm:$0xff] }
 0x12c   : > { %5919 = vst [vmem:[#allocation4_spill] sm:$0xff] %v4770_v50 }
 0x12d   : > { %v1602_v34 = vld [vmem:[#allocation2 + $0xa0] sm:$0xff] }
 0x12e   : > { %3989 = vrot.lane.b32.xlu2 %v3988_v22, %s4421_s24  ;;  %3984 = vrot.lane.b32.xlu1 %v3958_v19, %s4420_s23  ;;  %v4677_v35 = vpack.i.bf16 %v1602_v34, %v1601_v33  ;;  %v1864_v55 = vsel %vm644_vm2, %v1602_v34, %v3887_v49  ;;  %v4730_v19 = vpack.i.bf16 %v1592_v9, %v1591_v15  ;;  %v1594_v34 = vld [vmem:[#allocation2 + $0x60] sm:$0xff]  ;;  %v3834_v15 = vld [vmem:[%s5908_s3 + $0x48] sm:$0xff] }
 0x12f   : > { %v3963_v33 = vpack.i.bf16 %v4749_v29, %v4745_v27  ;;  %v4758_v40 = vpack.i.bf16 %v1594_v34, %v1593_v37  ;;  %v1116_v9 = vld [vmem:[#allocation2 + $0x87] sm:$0xff]  ;;  %v683_v37 = vlaneseq }
 0x130   : > { %3874 = vrot.lane.b32.xlu0 %v4677_v35, %s4420_s23 }
 0x136   : > { %4004 = vrot.lane.b32.xlu2 %v4681_v44, %s4420_s23  ;;  %3999 = vrot.lane.b32.xlu1 %v4683_v48, %s4421_s24 }
 0x138   : > { %v3890_v51 = vpop.permute.xlu1 %3889  ;;  %3879 = vrot.lane.b32.xlu0 %v4559_v47, %s4421_s24  ;;  %v4018_v47 = vpack.i.bf16 %v4691_v54, %v4695_v58 }
 0x139   : > { %v3892_v52 = vunpack.i.h.bf16 %v3890_v51  ;;  %v3891_v53 = vunpack.i.l.bf16 %v3890_v51  ;;  %v4772_v51 = vld [vmem:[#allocation2 + $0x77] sm:$0xff] }
 0x13a   : > { %5920 = vst [vmem:[#allocation5_spill] sm:$0xff] %v4772_v51 }
 0x13b   : > { %v4698_v59 = vsel %vm1394_vm3, %v1863_v56, %v3891_v53  ;;  %v4701_v61 = vsel %vm1394_vm3, %v1864_v55, %v3892_v52  ;;  %v4108_v52 = vpack.i.bf16 %v4770_v50, %v4772_v51  ;;  %v1596_v55 = vld [vmem:[#allocation2 + $0x70] sm:$0xff]  ;;  %v2300_v56 = vld [vmem:[#allocation2 + $0x81] sm:$0xff] }
 0x13e   : > { %4019 = vrot.lane.b32.xlu2 %v4018_v47, %s4421_s24  ;;  %4014 = vrot.lane.b32.xlu1 %v3988_v22, %s4420_s23 }
 0x140   : > { %3904 = vrot.lane.b32.xlu0 %v4581_v13, %s4420_s23  ;;  %v4722_v13 = vpop.permute.xlu2 %3894 }
 0x146   : > { %4034 = vrot.lane.b32.xlu2 %v4033_v4, %s4420_s23  ;;  %4029 = vrot.lane.b32.xlu1 %v4711_v5, %s4421_s24 }
 0x148   : > { %3919 = vrot.lane.b32.xlu0 %v4609_v46, %s4421_s24  ;;  %v1618_v46 = vld [vmem:[#allocation2 + $0x120] sm:$0xff]  ;;  %v4734_v24 = vpop.permute.xlu2 %3899 }
 0x149   : > { %v3948_v21 = vpack.i.bf16 %v1618_v46, %v1617_v11 }
 0x14e   : > { %4049 = vrot.lane.b32.xlu2 %v4048_v8, %s4421_s24  ;;  %4044 = vrot.lane.b32.xlu1 %v4018_v47, %s4420_s23  ;;  %v1595_v47 = vld [vmem:[#allocation2 + $0x68] sm:$0xff] }
 0x14f   : > { %v4782_v0 = vpack.i.bf16 %v1596_v55, %v1595_v47  ;;  %v1119_v55 = vld [vmem:[#allocation2 + $0x9f] sm:$0xff]  ;;  %v4832_v47 = vshrl.u32 %v683_v37, 7 }
 0x150   : > { %3934 = vrot.lane.b32.xlu0 %v4627_v62, %s4420_s23  ;;  %v4741_v62 = vld [vmem:[#allocation2 + $0x6f] sm:$0xff]  ;;  %v4751_v22 = vpop.permute.xlu2 %3914  ;;  %v2304_v37 = vld [vmem:[#allocation2 + $0xa1] sm:$0xff] }
 0x151   : > { %v4078_v28 = vpack.i.bf16 %v4741_v62, %v4743_v25 }
 0x156   : > { %4064 = vrot.lane.b32.xlu2 %v4730_v19, %s4420_s23  ;;  %4059 = vrot.lane.b32.xlu1 %v4732_v20, %s4421_s24 }
 0x158   : > { %3949 = vrot.lane.b32.xlu0 %v3948_v21, %s4421_s24  ;;  %v4786_v2 = vpop.permute.xlu1 %3909  ;;  %v2302_v21 = vld [vmem:[#allocation2 + $0x91] sm:$0xff] }
 0x15e   : > { %4079 = vrot.lane.b32.xlu2 %v4078_v28, %s4421_s24  ;;  %4074 = vrot.lane.b32.xlu1 %v4048_v8, %s4420_s23  ;;  %v1117_v8 = vld [vmem:[#allocation2 + $0x8f] sm:$0xff] }
 0x15f   : > { %v4138_v11 = vpack.i.bf16 %v1117_v8, %v1116_v9 }
 0x160   : > { %3964 = vrot.lane.b32.xlu0 %v3963_v33, %s4420_s23  ;;  %v4766_v49 = vpop.permute.xlu2 %3929  ;;  %v2301_v33 = vld [vmem:[#allocation2 + $0x89] sm:$0xff] }
 0x161   : > { %5918 = vst [vmem:[#allocation3_spill] sm:$0xff] %v4766_v49  ;;  %v4814_v36 = vpack.i.bf16 %v2301_v33, %v2302_v21  ;;  %v3830_v21 = vld [vmem:[%s5908_s3 + $0x28] sm:$0xff] }
 0x166   : > { %4094 = vrot.lane.b32.xlu2 %v4758_v40, %s4420_s23  ;;  %4089 = vrot.lane.b32.xlu1 %v4760_v41, %s4421_s24 }
 0x168   : > { %3979 = vrot.lane.b32.xlu0 %v4681_v44, %s4421_s24  ;;  %v2299_v44 = vld [vmem:[#allocation2 + $0x79] sm:$0xff] }
 0x169   : > { %v4784_v1 = vpack.i.bf16 %v2299_v44, %v2300_v56  ;;  %v3832_v56 = vld [vmem:[%s5908_s3 + $0x38] sm:$0xff] }
 0x16a   : > { %v1118_v44 = vld [vmem:[#allocation2 + $0x97] sm:$0xff] }
 0x16b   : > { %v4173_v8 = vpack.i.bf16 %v1119_v55, %v1118_v44 }
 0x16e   : > { %4109 = vrot.lane.b32.xlu2 %v4108_v52, %s4421_s24  ;;  %4104 = vrot.lane.b32.xlu1 %v4078_v28, %s4420_s23  ;;  %v1597_v28 = vld [vmem:[#allocation2 + $0x78] sm:$0xff] }
 0x16f   : > { %v4812_v34 = vpack.i.bf16 %v1598_v18, %v1597_v28 }
 0x170   : > { %v4778_v53 = vpop.permute.xlu2 %3944  ;;  %3994 = vrot.lane.b32.xlu0 %v4663_v30, %s4420_s23  ;;  %v3836_v30 = vld [vmem:[%s5908_s3 + $0x58] sm:$0xff] }
 0x171   : > { %3856 = vmatpush.bf16.msra.mxu2 %v3836_v30  ;;  %2025 = vmatpush.bf16.msra.mxu1 %v3836_v30  ;;  %v3831_v30 = vld [vmem:[%s5908_s3 + $0x30] sm:$0xff] }
 0x175   : > { %3857 = vmatpush.bf16.msra.mxu2 %v3835_v10  ;;  %2026 = vmatpush.bf16.msra.mxu1 %v3835_v10  ;;  %v1100_v10 = vld [vmem:[#allocation2 + $0x7] sm:$0xff] }
 0x176   : > { %4124 = vrot.lane.b32.xlu2 %v4782_v0, %s4420_s23  ;;  %4119 = vrot.lane.b32.xlu1 %v4784_v1, %s4421_s24 }
 0x178   : > { %v4792_v3 = vpop.permute.xlu2 %3959  ;;  %4009 = vrot.lane.b32.xlu0 %v4033_v4, %s4421_s24  ;;  %v4803_v4 = vpop.permute.xlu1 %3924 }
 0x179   : > { %3858 = vmatpush.bf16.msra.mxu2 %v3834_v15  ;;  %2027 = vmatpush.bf16.msra.mxu1 %v3834_v15  ;;  %v1101_v15 = vld [vmem:[#allocation2 + $0xf] sm:$0xff]  ;;  %v3962_v55 = vunpack.i.h.bf16 %v4792_v3 }
 0x17e   : > { %4139 = vrot.lane.b32.xlu2 %v4138_v11, %s4421_s24  ;;  %4134 = vrot.lane.b32.xlu1 %v4108_v52, %s4420_s23 }
 0x180   : > { %4024 = vrot.lane.b32.xlu0 %v4683_v48, %s4420_s23  ;;  %v4807_v46 = vpop.permute.xlu2 %3974  ;;  %v3833_v48 = vld [vmem:[%s5908_s3 + $0x40] sm:$0xff] }
 0x181   : > { %3859 = vmatpush.bf16.msra.mxu2 %v3833_v48  ;;  %2028 = vmatpush.bf16.msra.mxu1 %v3833_v48  ;;  %v4847_v48 = vld [vmem:[#allocation2 + $0x90] sm:$0xff] }
 0x185   : > { %3860 = vmatpush.bf16.msra.mxu2 %v3832_v56  ;;  %2029 = vmatpush.bf16.msra.mxu1 %v3832_v56  ;;  %v3961_v56 = vunpack.i.l.bf16 %v4792_v3 }
 0x186   : > { %4154 = vrot.lane.b32.xlu2 %v4812_v34, %s4420_s23  ;;  %4149 = vrot.lane.b32.xlu1 %v4814_v36, %s4421_s24 }
 0x188   : > { %v4823_v38 = vpop.permute.xlu1 %3939  ;;  %4039 = vrot.lane.b32.xlu0 %v4730_v19, %s4421_s24  ;;  %v4827_v52 = vpop.permute.xlu2 %3989  ;;  %v720_v19 = vand.u32 15, %v4832_v47 }
 0x189   : > { %3861 = vmatpush.bf16.msra.mxu2 %v3831_v30  ;;  %2030 = vmatpush.bf16.msra.mxu1 %v3831_v30  ;;  %v1599_v30 = vld [vmem:[#allocation2 + $0x88] sm:$0xff] }
 0x18a   : > { %vm1427_vm4 = vcmp.ge.s32.totalorder %v720_v19, 1  ;;  %v4855_v51 = vpack.i.bf16 %v4847_v48, %v1599_v30 }
 0x18d   : > { %2198 = vmatpush.bf16.msrb.mxu2 %v3830_v21  ;;  %v1121_v21 = vld [vmem:[#allocation2 + $0xaf] sm:$0xff] }
 0x18e   : > { %4174 = vrot.lane.b32.xlu2 %v4173_v8, %s4421_s24  ;;  %4164 = vrot.lane.b32.xlu1 %v4138_v11, %s4420_s23  ;;  %v2303_v11 = vld [vmem:[#allocation2 + $0x99] sm:$0xff] }
 0x190   : > { %4054 = vrot.lane.b32.xlu0 %v4711_v5, %s4420_s23  ;;  %v4842_v9 = vpop.permute.xlu2 %4004  ;;  %v3955_v18 = vpop.permute.xlu1 %3954 }
 0x191   : > { %v3957_v28 = vunpack.i.h.bf16 %v3955_v18  ;;  %v3956_v33 = vunpack.i.l.bf16 %v3955_v18  ;;  %v4857_v18 = vpack.i.bf16 %v2303_v11, %v2304_v37  ;;  %v2305_v37 = vld [vmem:[#allocation2 + $0xa9] sm:$0xff] }
 0x193   : > { %v1363_v5 = vsel %vm644_vm2, %v1101_v15, %v3957_v28  ;;  %v1362_v44 = vsel %vm644_vm2, %v1100_v10, %v3956_v33  ;;  %v1120_v15 = vld [vmem:[#allocation2 + $0xa7] sm:$0xff]  ;;  %v686_v28 = vadd.s32 16, %v4832_v47 }
 0x194   : > { %v1395_v63 = vsel %vm1394_vm3, %v1362_v44, %v3961_v56  ;;  %v1396_v50 = vsel %vm1394_vm3, %v1363_v5, %v3962_v55  ;;  %v2306_v55 = vld [vmem:[#allocation2 + $0xb1] sm:$0xff]  ;;  %v3992_v56 = vunpack.i.h.bf16 %v4827_v52  ;;  %v3991_v5 = vunpack.i.l.bf16 %v4827_v52 }
 0x195   : > { %v1523_v49 = vsel %vm1427_vm4, %v1395_v63, 0.0  ;;  %v4198_v63 = vpack.i.bf16 %v1121_v21, %v1120_v15  ;;  %v734_v33 = vand.u32 15, %v686_v28  ;;  %v4208_v21 = vpack.i.bf16 %v2305_v37, %v2306_v55  ;;  %v2307_v37 = vld [vmem:[#allocation2 + $0xb9] sm:$0xff]  ;;  %v2308_v55 = vld [vmem:[#allocation2 + $0xc1] sm:$0xff] }
 0x196   : > { %4179 = vrot.lane.b32.xlu2 %v4855_v51, %s4420_s23  ;;  %4184 = vrot.lane.b32.xlu1 %v4857_v18, %s4421_s24  ;;  %v4864_v3 = vpack.c.bf16 %v1396_v50, %v1523_v49 }
 0x197   : > { %vm1429_vm5 = vcmp.ge.s32.totalorder %v734_v33, 1 }
 0x198   : > { %5921 = vst [vmem:[#allocation6_spill] sm:$0xff] %v4864_v3  ;;  %4069 = vrot.lane.b32.xlu0 %v4758_v40, %s4421_s24  ;;  %v4868_v19 = vpop.permute.xlu2 %4019  ;;  %v4870_v10 = vpop.permute.xlu1 %3969 }
 0x19e   : > { %4199 = vrot.lane.b32.xlu2 %v4198_v63, %s4421_s24  ;;  %4194 = vrot.lane.b32.xlu1 %v4173_v8, %s4420_s23 }
 0x1a0   : > { %4084 = vrot.lane.b32.xlu0 %v4732_v20, %s4420_s23  ;;  %v4877_v49 = vpop.permute.xlu2 %4034  ;;  %v3985_v40 = vpop.permute.xlu1 %3984  ;;  %v3842_v20 = vld [vmem:[%s5908_s3 + $0x88] sm:$0xff] }
 0x1a1   : > { %v3987_v50 = vunpack.i.h.bf16 %v3985_v40  ;;  %v3986_v11 = vunpack.i.l.bf16 %v3985_v40  ;;  %2854 = vmatpush.bf16.msrb.mxu3 %v3842_v20  ;;  %v4228_v20 = vpack.i.bf16 %v2307_v37, %v2308_v55  ;;  %v1124_v55 = vld [vmem:[#allocation2 + $0xc7] sm:$0xff] }
 0x1a2   : > { %v3875_v44 = vpop.permute.xlu0 %3874 }
 0x1a3   : > { %v1365_v8 = vsel %vm644_vm2, %v4642_v14, %v3987_v50  ;;  %v1364_v15 = vsel %vm644_vm2, %v4647_v17, %v3986_v11  ;;  %v3829_v14 = vld [vmem:[%s5908_s3 + $0x20] sm:$0xff]  ;;  %v3877_v33 = vunpack.i.h.bf16 %v3875_v44  ;;  %v3876_v50 = vunpack.i.l.bf16 %v3875_v44 }
 0x1a4   : > { %v1397_v28 = vsel %vm1394_vm3, %v1364_v15, %v3991_v5  ;;  %v1398_v40 = vsel %vm1394_vm3, %v1365_v8, %v3992_v56  ;;  %v3841_v17 = vld [vmem:[%s5908_s3 + $0x80] sm:$0xff]  ;;  %2199 = vmatpush.bf16.msrb.mxu2 %v3829_v14  ;;  %v688_v5 = vadd.s32 32, %v4832_v47 }
 0x1a5   : > { %v1525_v3 = vsel %vm1429_vm5, %v1397_v28, 0.0  ;;  %2855 = vmatpush.bf16.msrb.mxu3 %v3841_v17  ;;  %v1861_v44 = vsel %vm644_vm2, %v1599_v30, %v3876_v50  ;;  %v3839_v17 = vld [vmem:[%s5908_s3 + $0x70] sm:$0xff] }
 0x1a6   : > { %4224 = vrot.lane.b32.xlu2 %v4198_v63, %s4420_s23  ;;  %4209 = vrot.lane.b32.xlu1 %v4208_v21, %s4421_s24  ;;  %v4898_v52 = vpack.c.bf16 %v1398_v40, %v1525_v3  ;;  %v3840_v3 = vld [vmem:[%s5908_s3 + $0x78] sm:$0xff]  ;;  %v748_v30 = vand.u32 15, %v688_v5  ;;  %v4022_v5 = vunpack.i.h.bf16 %v4868_v19 }
 0x1a8   : > { %4099 = vrot.lane.b32.xlu0 %v4782_v0, %s4421_s24  ;;  %v4902_v11 = vpop.permute.xlu2 %4049  ;;  %v4904_v63 = vpop.permute.xlu1 %3999  ;;  %v1862_v0 = vsel %vm644_vm2, %v4847_v48, %v3877_v33  ;;  %vm1431_vm7 = vcmp.ge.s32.totalorder %v748_v30, 1  ;;  %v1127_v30 = vld [vmem:[#allocation2 + $0xdf] sm:$0xff] }
 0x1a9   : > { %2856 = vmatpush.bf16.msrb.mxu3 %v3840_v3  ;;  %v3838_v3 = vld [vmem:[%s5908_s3 + $0x68] sm:$0xff] }
 0x1aa   : > { %v3880_v56 = vpop.permute.xlu0 %3879 }
 0x1ab   : > { %v3882_v8 = vunpack.i.h.bf16 %v3880_v56  ;;  %v3881_v15 = vunpack.i.l.bf16 %v3880_v56  ;;  %v1125_v56 = vld [vmem:[#allocation2 + $0xcf] sm:$0xff] }
 0x1ad   : > { %v1893_v28 = vsel %vm1394_vm3, %v1861_v44, %v3881_v15  ;;  %v1894_v40 = vsel %vm1394_vm3, %v1862_v0, %v3882_v8  ;;  %2857 = vmatpush.bf16.msrb.mxu3 %v3839_v17  ;;  %v4238_v44 = vpack.i.bf16 %v1125_v56, %v1124_v55  ;;  %v1126_v17 = vld [vmem:[#allocation2 + $0xd7] sm:$0xff]  ;;  %v2312_v56 = vld [vmem:[#allocation2 + $0xe1] sm:$0xff] }
 0x1ae   : > { %4229 = vrot.lane.b32.xlu2 %v4228_v20, %s4421_s24  ;;  %4219 = vrot.lane.b32.xlu1 %v4208_v21, %s4420_s23  ;;  %v1917_v14 = vpack.c.bf16 %v1894_v40, %v1893_v28  ;;  %v4021_v21 = vunpack.i.l.bf16 %v4868_v19  ;;  %v2311_v55 = vld [vmem:[#allocation2 + $0xd9] sm:$0xff] }
 0x1b0   : > { %3647 = vmatmul.msk.bf16.vlgmr.msra.gmra.mxu2 %vm1974_vm6, %v1917_v14  ;;  %4114 = vrot.lane.b32.xlu0 %v4760_v41, %s4420_s23  ;;  %v4923_v48 = vpop.permute.xlu2 %4064  ;;  %v4015_v33 = vpop.permute.xlu1 %4014 }
 0x1b1   : > { %v4017_v50 = vunpack.i.h.bf16 %v4015_v33  ;;  %v4016_v37 = vunpack.i.l.bf16 %v4015_v33  ;;  %2858 = vmatpush.bf16.msrb.mxu3 %v3838_v3 }
 0x1b2   : > { %v4926_v8 = vpop.permute.xlu0 %3904 }
 0x1b3   : > { %v1367_v15 = vsel %vm644_vm2, %v4640_v12, %v4017_v50  ;;  %v1366_v41 = vsel %vm644_vm2, %v4645_v16, %v4016_v37  ;;  %v3837_v12 = vld [vmem:[%s5908_s3 + $0x60] sm:$0xff]  ;;  %v4258_v50 = vpack.i.bf16 %v1127_v30, %v1126_v17  ;;  %v3828_v37 = vld [vmem:[%s5908_s3 + $0x18] sm:$0xff] }
 0x1b4   : > { %v1399_v0 = vsel %vm1394_vm3, %v1366_v41, %v4021_v21  ;;  %v1400_v28 = vsel %vm1394_vm3, %v1367_v15, %v4022_v5  ;;  %2200 = vmatpush.bf16.msrb.mxu2 %v3828_v37  ;;  %v5922_v21 = vpack.c.bf16 %v4701_v61, %v4698_v59  ;;  %v3942_v59 = vunpack.i.h.bf16 %v4823_v38 }
 0x1b5   : > { %v1527_v40 = vsel %vm1431_vm7, %v1399_v0, 0.0  ;;  %2859 = vmatpush.bf16.msrb.mxu3 %v3837_v12  ;;  %v4052_v0 = vunpack.i.h.bf16 %v4902_v11  ;;  %v3941_v61 = vunpack.i.l.bf16 %v4823_v38 }
 0x1b6   : > { %4244 = vrot.lane.b32.xlu2 %v4228_v20, %s4420_s23  ;;  %4239 = vrot.lane.b32.xlu1 %v4238_v44, %s4421_s24  ;;  %v4940_v19 = vpack.c.bf16 %v1400_v28, %v1527_v40  ;;  %v690_v20 = vadd.s32 48, %v4832_v47  ;;  %v4268_v40 = vpack.i.bf16 %v2311_v55, %v2312_v56  ;;  %v3896_v56 = vunpack.i.l.bf16 %v4722_v13 }
 0x1b8   : > { %4129 = vrot.lane.b32.xlu0 %v4812_v34, %s4421_s24  ;;  %v4947_v16 = vpop.permute.xlu2 %4079  ;;  %v4949_v14 = vpop.permute.xlu1 %4029  ;;  %v762_v34 = vand.u32 15, %v690_v20 }
 0x1ba   : > { %v4951_v33 = vpop.permute.xlu0 %3919  ;;  %vm4969_vm8 = vcmp.ge.s32.totalorder %v762_v34, 1  ;;  %v3897_v34 = vunpack.i.h.bf16 %v4722_v13 }
 0x1bc   : > { %v1866_v12 = vsel %vm644_vm2, %v4554_v45, %v3897_v34 }
 0x1be   : > { %4259 = vrot.lane.b32.xlu2 %v4258_v50, %s4421_s24  ;;  %4254 = vrot.lane.b32.xlu1 %v4238_v44, %s4420_s23  ;;  %v4051_v44 = vunpack.i.l.bf16 %v4902_v11 }
 0x1c0   : > { %3648 = vmatmul.msk.bf16.gmra.mxu2 %vm1974_vm6, %v5922_v21  ;;  %4144 = vrot.lane.b32.xlu0 %v4784_v1, %s4420_s23  ;;  %v4965_v5 = vpop.permute.xlu2 %4094  ;;  %v4045_v15 = vpop.permute.xlu1 %4044  ;;  %v3902_v21 = vunpack.i.h.bf16 %v4734_v24 }
 0x1c1   : > { %v4047_v41 = vunpack.i.h.bf16 %v4045_v15  ;;  %v4046_v3 = vunpack.i.l.bf16 %v4045_v15  ;;  %v3901_v15 = vunpack.i.l.bf16 %v4734_v24 }
 0x1c2   : > { %v3935_v28 = vpop.permute.xlu0 %3934 }
 0x1c3   : > { %v1369_v1 = vsel %vm644_vm2, %v4669_v31, %v4047_v41  ;;  %v1368_v17 = vsel %vm644_vm2, %v4671_v32, %v4046_v3  ;;  %v3937_v30 = vunpack.i.h.bf16 %v3935_v28  ;;  %v3936_v20 = vunpack.i.l.bf16 %v3935_v28 }
 0x1c4   : > { %v1401_v11 = vsel %vm1394_vm3, %v1368_v17, %v4051_v44  ;;  %v1402_v37 = vsel %vm1394_vm3, %v1369_v1, %v4052_v0  ;;  %v2313_v0 = vld [vmem:[#allocation2 + $0xe9] sm:$0xff]  ;;  %v2314_v44 = vld [vmem:[#allocation2 + $0xf1] sm:$0xff]  ;;  %v1865_v28 = vsel %vm644_vm2, %v4551_v42, %v3896_v56  ;;  %v1898_v17 = vsel %vm1394_vm3, %v1866_v12, %v3902_v21 }
 0x1c5   : > { %v1529_v55 = vsel %vm4969_vm8, %v1401_v11, 0.0  ;;  %v1874_v38 = vsel %vm644_vm2, %v4604_v43, %v3937_v30  ;;  %v1873_v31 = vsel %vm644_vm2, %v4601_v39, %v3936_v20  ;;  %v3947_v43 = vunpack.i.h.bf16 %v4778_v53  ;;  %v1130_v56 = vld [vmem:[#allocation2 + $0xf7] sm:$0xff] }
 0x1c6   : > { %4274 = vrot.lane.b32.xlu2 %v4258_v50, %s4420_s23  ;;  %4269 = vrot.lane.b32.xlu1 %v4268_v40, %s4421_s24  ;;  %v4991_v32 = vpack.c.bf16 %v1402_v37, %v1529_v55  ;;  %v4996_v41 = vsel %vm1394_vm3, %v1873_v31, %v3941_v61  ;;  %v4999_v13 = vsel %vm1394_vm3, %v1874_v38, %v3942_v59  ;;  %v3946_v39 = vunpack.i.l.bf16 %v4778_v53  ;;  %v3827_v21 = vld [vmem:[%s5908_s3 + $0x10] sm:$0xff] }
 0x1c7   : > { %v1923_v24 = vpack.c.bf16 %v4999_v13, %v4996_v41  ;;  %v692_v53 = vadd.s32 64, %v4832_v47  ;;  %v1897_v1 = vsel %vm1394_vm3, %v1865_v28, %v3901_v15  ;;  %v1876_v30 = vsel %vm644_vm2, %v4622_v60, %v3947_v43  ;;  %2201 = vmatpush.bf16.msrb.mxu2 %v3827_v21  ;;  %v4371_v13 = vld [vmem:[#allocation2 + $0x8f] sm:$0xff] }
 0x1c8   : > { %4159 = vrot.lane.b32.xlu0 %v4855_v51, %s4421_s24  ;;  %v5005_v50 = vpop.permute.xlu2 %4109  ;;  %v5007_v3 = vpop.permute.xlu1 %4059  ;;  %v1875_v20 = vsel %vm644_vm2, %v4619_v57, %v3946_v39  ;;  %v4288_v11 = vpack.i.bf16 %v2313_v0, %v2314_v44  ;;  %v685_v42 = vadd.s32 8, %v4832_v47  ;;  %v1919_v34 = vpack.c.bf16 %v1898_v17, %v1897_v1  ;;  %v1131_v57 = vld [vmem:[#allocation2 + $0xff] sm:$0xff] }
 0x1c9   : > { %v776_v55 = vand.u32 15, %v692_v53  ;;  %v4082_v39 = vunpack.i.h.bf16 %v4947_v16  ;;  %v4081_v0 = vunpack.i.l.bf16 %v4947_v16  ;;  %v4298_v28 = vpack.i.bf16 %v1131_v57, %v1130_v56 }
 0x1ca   : > { %v3950_v59 = vpop.permute.xlu0 %3949  ;;  %v727_v43 = vand.u32 15, %v685_v42  ;;  %v3971_v42 = vunpack.i.l.bf16 %v4870_v10 }
 0x1cb   : > { %v3952_v61 = vunpack.i.h.bf16 %v3950_v59  ;;  %v3951_v51 = vunpack.i.l.bf16 %v3950_v59  ;;  %vm5043_vm9 = vcmp.ge.s32.totalorder %v776_v55, 1  ;;  %v3906_v59 = vunpack.i.l.bf16 %v4926_v8 }
 0x1cc   : > { %vm5057_vm10 = vcmp.le.s32.totalorder %v727_v43, 14  ;;  %v4357_v43 = vld [vmem:[#allocation2 + $0xc0] sm:$0xff] }
 0x1cd   : > { %v5024_v45 = vsel %vm1394_vm3, %v1875_v20, %v3951_v51  ;;  %v5027_v37 = vsel %vm1394_vm3, %v1876_v30, %v3952_v61  ;;  %v2285_v51 = vld [vmem:[#allocation2 + $0x9] sm:$0xff]  ;;  %v3972_v20 = vunpack.i.h.bf16 %v4870_v10  ;;  %v3911_v10 = vunpack.i.l.bf16 %v4786_v2 }
 0x1ce   : > { %4289 = vrot.lane.b32.xlu2 %v4288_v11, %s4421_s24  ;;  %4284 = vrot.lane.b32.xlu1 %v4268_v40, %s4420_s23  ;;  %v1924_v60 = vpack.c.bf16 %v5027_v37, %v5024_v45  ;;  %v4377_v45 = vld [vmem:[#allocation2 + $0x59] sm:$0xff] }
 0x1d0   : > { %3649 = vmatmul.msk.bf16.gmra.mxu2 %vm1974_vm6, %v1919_v34  ;;  %4169 = vrot.lane.b32.xlu0 %v4814_v36, %s4420_s23  ;;  %v5036_v38 = vpop.permute.xlu2 %4124  ;;  %v4075_v31 = vpop.permute.xlu1 %4074  ;;  %v3907_v36 = vunpack.i.h.bf16 %v4926_v8  ;;  %v2286_v34 = vld [vmem:[#allocation2 + $0x11] sm:$0xff] }
 0x1d1   : > { %v4077_v40 = vunpack.i.h.bf16 %v4075_v31  ;;  %v4076_v15 = vunpack.i.l.bf16 %v4075_v31  ;;  %v3977_v31 = vunpack.i.h.bf16 %v4807_v46 }
 0x1d2   : > { %v3965_v44 = vpop.permute.xlu0 %3964 }
 0x1d3   : > { %v1371_v53 = vsel %vm644_vm2, %v4691_v54, %v4077_v40  ;;  %v1370_v61 = vsel %vm644_vm2, %v4695_v58, %v4076_v15  ;;  %v3967_v1 = vunpack.i.h.bf16 %v3965_v44  ;;  %v3966_v17 = vunpack.i.l.bf16 %v3965_v44 }
 0x1d4   : > { %v1403_v16 = vsel %vm1394_vm3, %v1370_v61, %v4081_v0  ;;  %v1404_v30 = vsel %vm1394_vm3, %v1371_v53, %v4082_v39  ;;  %v3912_v58 = vunpack.i.h.bf16 %v4786_v2  ;;  %v3976_v15 = vunpack.i.l.bf16 %v4807_v46  ;;  %v4358_v0 = vld [vmem:[#allocation2 + $0xb8] sm:$0xff]  ;;  %v1132_v53 = vld [vmem:[#allocation2 + $0x107] sm:$0xff]  ;;  %v1133_v46 = vld [vmem:[#allocation2 + $0x10f] sm:$0xff] }
 0x1d5   : > { %v1531_v54 = vsel %vm5043_vm9, %v1403_v16, 0.0  ;;  %v2547_v55 = vsel %vm644_vm2, %v2285_v51, %v3967_v1  ;;  %v2548_v56 = vsel %vm644_vm2, %v2286_v34, %v3966_v17  ;;  %v1868_v39 = vsel %vm644_vm2, %v4357_v43, %v3907_v36  ;;  %v1583_v61 = vld [vmem:[#allocation2 + $0x8] sm:$0xff]  ;;  %v1584_v51 = vld [vmem:[#allocation2 + $0x10] sm:$0xff] }
 0x1d6   : > { %4304 = vrot.lane.b32.xlu2 %v4288_v11, %s4420_s23  ;;  %4299 = vrot.lane.b32.xlu1 %v4298_v28, %s4421_s24  ;;  %v5068_v57 = vpack.c.bf16 %v1404_v30, %v1531_v54  ;;  %v2580_v21 = vsel %vm1394_vm3, %v2548_v56, %v3971_v42  ;;  %v2579_v40 = vsel %vm1394_vm3, %v2547_v55, %v3972_v20  ;;  %v694_v36 = vadd.s32 80, %v4832_v47  ;;  %v2318_v43 = vld [vmem:[#allocation2 + $0x111] sm:$0xff] }
 0x1d7   : > { %v1867_v11 = vsel %vm644_vm2, %v4358_v0, %v3906_v59  ;;  %v2708_v12 = vsel %vm5057_vm10, %v2580_v21, 0.0  ;;  %v1846_v20 = vsel %vm644_vm2, %v1584_v51, %v3977_v31  ;;  %v1845_v42 = vsel %vm644_vm2, %v1583_v61, %v3976_v15  ;;  %v5098_v31 = vld [vmem:[#allocation2 + $0xbf] sm:$0xff]  ;;  %v2317_v15 = vld [vmem:[#allocation2 + $0x109] sm:$0xff] }
 0x1d8   : > { %4189 = vrot.lane.b32.xlu0 %v4677_v35, %s4421_s24  ;;  %v5079_v44 = vpop.permute.xlu2 %4139  ;;  %v5081_v2 = vpop.permute.xlu1 %4089  ;;  %v2739_v1 = vpack.c.bf16 %v2708_v12, %v2579_v40  ;;  %v1899_v30 = vsel %vm1394_vm3, %v1867_v11, %v3911_v10  ;;  %v1900_v35 = vsel %vm1394_vm3, %v1868_v39, %v3912_v58  ;;  %v4318_v34 = vpack.i.bf16 %v1133_v46, %v1132_v53  ;;  %v5096_v58 = vld [vmem:[#allocation2 + $0xb7] sm:$0xff] }
 0x1d9   : > { %v687_v55 = vadd.s32 24, %v4832_v47  ;;  %v1920_v56 = vpack.c.bf16 %v1900_v35, %v1899_v30  ;;  %v790_v21 = vand.u32 15, %v694_v36  ;;  %v5108_v11 = vpack.i.bf16 %v5098_v31, %v5096_v58 }
 0x1da   : > { %v3980_v16 = vpop.permute.xlu0 %3979  ;;  %3731 = vmatmul.msk.bf16.vlgmr.msrb.gmra.mxu3 %vm1974_vm6, %v2739_v1  ;;  %v3917_v53 = vunpack.i.h.bf16 %v4751_v22  ;;  %v4112_v61 = vunpack.i.h.bf16 %v5005_v50  ;;  %v4328_v36 = vpack.i.bf16 %v2317_v15, %v2318_v43 }
 0x1db   : > { %v3982_v17 = vunpack.i.h.bf16 %v3980_v16  ;;  %v3981_v59 = vunpack.i.l.bf16 %v3980_v16  ;;  %v741_v12 = vand.u32 15, %v687_v55  ;;  %vm5113_vm11 = vcmp.ge.s32.totalorder %v790_v21, 1  ;;  %v2319_v21 = vld [vmem:[#allocation2 + $0x119] sm:$0xff] }
 0x1dd   : > { %v1877_v8 = vsel %vm1394_vm3, %v1845_v42, %v3981_v59  ;;  %v1878_v54 = vsel %vm1394_vm3, %v1846_v20, %v3982_v17  ;;  %v4001_v20 = vunpack.i.l.bf16 %v4904_v63  ;;  %vm5125_vm12 = vcmp.le.s32.totalorder %v741_v12, 14 }
 0x1de   : > { %4319 = vrot.lane.b32.xlu2 %v4318_v34, %s4421_s24  ;;  %4314 = vrot.lane.b32.xlu1 %v4298_v28, %s4420_s23  ;;  %v1909_v10 = vpack.c.bf16 %v1878_v54, %v1877_v8 }
 0x1e0   : > { %3650 = vmatmul.msk.bf16.gmra.mxu2 %vm1974_vm6, %v1920_v56  ;;  %4204 = vrot.lane.b32.xlu0 %v4857_v18, %s4420_s23  ;;  %v4105_v40 = vpop.permute.xlu1 %4104  ;;  %v5103_v39 = vpop.permute.xlu2 %4154  ;;  %v4111_v18 = vunpack.i.l.bf16 %v5005_v50  ;;  %v4002_v50 = vunpack.i.h.bf16 %v4904_v63  ;;  %v3826_v63 = vld [vmem:[%s5908_s3 + $0x8] sm:$0xff]  ;;  %v3922_v56 = vunpack.i.h.bf16 %v4951_v33 }
 0x1e1   : > { %3639 = vmatmul.msk.bf16.vlgmr.msra.gmra.mxu1 %vm1974_vm6, %v1909_v10  ;;  %v4107_v28 = vunpack.i.h.bf16 %v4105_v40  ;;  %v4106_v0 = vunpack.i.l.bf16 %v4105_v40  ;;  %v4006_v40 = vunpack.i.l.bf16 %v4842_v9  ;;  %2202 = vmatpush.bf16.msrb.mxu2 %v3826_v63 }
 0x1e2   : > { %v3995_v51 = vpop.permute.xlu0 %3994 }
 0x1e3   : > { %v1373_v16 = vsel %vm644_vm2, %v4718_v6, %v4107_v28  ;;  %v1372_v1 = vsel %vm644_vm2, %v4720_v7, %v4106_v0  ;;  %v3997_v59 = vunpack.i.h.bf16 %v3995_v51  ;;  %v3996_v30 = vunpack.i.l.bf16 %v3995_v51  ;;  %v4360_v0 = vld [vmem:[#allocation2 + $0xc8] sm:$0xff] }
 0x1e4   : > { %v1405_v17 = vsel %vm1394_vm3, %v1372_v1, %v4111_v18  ;;  %v1406_v35 = vsel %vm1394_vm3, %v1373_v16, %v4112_v61  ;;  %v3916_v7 = vunpack.i.l.bf16 %v4751_v22  ;;  %v3921_v22 = vunpack.i.l.bf16 %v4951_v33  ;;  %v4359_v33 = vld [vmem:[#allocation2 + $0xd0] sm:$0xff] }
 0x1e5   : > { %v1533_v6 = vsel %vm5113_vm11, %v1405_v17, 0.0  ;;  %v2549_v8 = vsel %vm644_vm2, %v4749_v29, %v3997_v59  ;;  %v2550_v54 = vsel %vm644_vm2, %v4745_v27, %v3996_v30  ;;  %v2320_v27 = vld [vmem:[#allocation2 + $0x121] sm:$0xff]  ;;  %v1870_v28 = vsel %vm644_vm2, %v4359_v33, %v3917_v53 }
 0x1e6   : > { %4334 = vrot.lane.b32.xlu2 %v4318_v34, %s4420_s23  ;;  %4329 = vrot.lane.b32.xlu1 %v4328_v36, %s4421_s24  ;;  %v5141_v55 = vpack.c.bf16 %v1406_v35, %v1533_v6  ;;  %v2581_v10 = vsel %vm1394_vm3, %v2549_v8, %v4002_v50  ;;  %v2582_v29 = vsel %vm1394_vm3, %v2550_v54, %v4001_v20  ;;  %v4007_v34 = vunpack.i.h.bf16 %v4842_v9  ;;  %v5172_v8 = vld [vmem:[#allocation2 + $0xc9] sm:$0xff] }
 0x1e7   : > { %v2710_v43 = vsel %vm5125_vm12, %v2582_v29, 0.0  ;;  %v1869_v12 = vsel %vm644_vm2, %v4360_v0, %v3916_v7  ;;  %v4348_v51 = vpack.i.bf16 %v2319_v21, %v2320_v27  ;;  %v696_v9 = vadd.s32 96, %v4832_v47 }
 0x1e8   : > { %4214 = vrot.lane.b32.xlu0 %v5108_v11, %s4421_s24  ;;  %v5151_v15 = vpop.permute.xlu1 %4119  ;;  %v2740_v18 = vpack.c.bf16 %v2710_v43, %v2581_v10  ;;  %v5158_v46 = vpop.permute.xlu2 %4174  ;;  %v1901_v17 = vsel %vm1394_vm3, %v1869_v12, %v3921_v22  ;;  %v1902_v59 = vsel %vm1394_vm3, %v1870_v28, %v3922_v56  ;;  %v1848_v30 = vsel %vm644_vm2, %v4656_v23, %v4007_v34  ;;  %v5174_v23 = vld [vmem:[#allocation2 + $0xd1] sm:$0xff] }
 0x1e9   : > { %v1847_v53 = vsel %vm644_vm2, %v4659_v26, %v4006_v40  ;;  %v689_v20 = vadd.s32 40, %v4832_v47  ;;  %v1921_v42 = vpack.c.bf16 %v1902_v59, %v1901_v17  ;;  %v804_v7 = vand.u32 15, %v696_v9  ;;  %v4363_v59 = vld [vmem:[#allocation2 + $0xe0] sm:$0xff] }
 0x1ea   : > { %v4010_v61 = vpop.permute.xlu0 %4009  ;;  %3732 = vmatmul.msk.bf16.gmra.mxu3 %vm1974_vm6, %v2740_v18  ;;  %v4142_v56 = vunpack.i.h.bf16 %v5079_v44  ;;  %v4141_v22 = vunpack.i.l.bf16 %v5079_v44  ;;  %v4248_v29 = vpack.i.bf16 %v5172_v8, %v5174_v23  ;;  %v3926_v27 = vunpack.i.l.bf16 %v4803_v4 }
 0x1eb   : > { %v4012_v16 = vunpack.i.h.bf16 %v4010_v61  ;;  %v4011_v1 = vunpack.i.l.bf16 %v4010_v61  ;;  %vm5184_vm13 = vcmp.ge.s32.totalorder %v804_v7, 1  ;;  %v4032_v0 = vunpack.i.h.bf16 %v4949_v14 }
 0x1ec   : > { %v4031_v12 = vunpack.i.l.bf16 %v4949_v14 }
 0x1ed   : > { %v1879_v35 = vsel %vm1394_vm3, %v1847_v53, %v4011_v1  ;;  %v1880_v50 = vsel %vm1394_vm3, %v1848_v30, %v4012_v16  ;;  %v4362_v16 = vld [vmem:[#allocation2 + $0x31] sm:$0xff] }
 0x1ee   : > { %4344 = vrot.lane.b32.xlu1 %v4328_v36, %s4420_s23  ;;  %v1910_v6 = vpack.c.bf16 %v1880_v50, %v1879_v35  ;;  %4349 = vrot.lane.b32.xlu2 %v4348_v51, %s4421_s24  ;;  %v755_v36 = vand.u32 15, %v689_v20  ;;  %v4361_v51 = vld [vmem:[#allocation2 + $0x29] sm:$0xff]  ;;  %v4364_v50 = vld [vmem:[#allocation2 + $0xd8] sm:$0xff] }
 0x1ef   : > { %v1871_v20 = vsel %vm644_vm2, %v4364_v50, %v3926_v27  ;;  %v4366_v27 = vld [vmem:[#allocation2 + $0x28] sm:$0xff] }
 0x1f0   : > { %3651 = vmatmul.msk.bf16.gmra.mxu2 %vm1974_vm6, %v1921_v42  ;;  %4234 = vrot.lane.b32.xlu0 %v5108_v11, %s4420_s23  ;;  %v4135_v26 = vpop.permute.xlu1 %4134  ;;  %v3927_v11 = vunpack.i.h.bf16 %v4803_v4  ;;  %v5198_v61 = vpop.permute.xlu2 %4179  ;;  %vm5200_vm14 = vcmp.le.s32.totalorder %v755_v36, 14  ;;  %v4037_v42 = vunpack.i.h.bf16 %v4877_v49  ;;  %v698_v36 = vadd.s32 112, %v4832_v47  ;;  %v5252_v50 = vld [vmem:[#allocation2 + $0xef] sm:$0xff] }
 0x1f1   : > { %3640 = vmatmul.msk.bf16.gmra.mxu1 %vm1974_vm6, %v1910_v6  ;;  %v4137_v54 = vunpack.i.h.bf16 %v4135_v26  ;;  %v4136_v63 = vunpack.i.l.bf16 %v4135_v26  ;;  %v4036_v6 = vunpack.i.l.bf16 %v4877_v49 }
 0x1f2   : > { %v4025_v10 = vpop.permute.xlu0 %4024  ;;  %v1872_v30 = vsel %vm644_vm2, %v4363_v59, %v3927_v11  ;;  %v4365_v11 = vld [vmem:[#allocation2 + $0x30] sm:$0xff]  ;;  %v5940_v59 = vld [vmem:[#allocation4_spill] sm:$0xff] }
 0x1f3   : > { %v1375_v34 = vsel %vm644_vm2, %v4741_v62, %v4137_v54  ;;  %v1374_v40 = vsel %vm644_vm2, %v4743_v25, %v4136_v63  ;;  %v4027_v43 = vunpack.i.h.bf16 %v4025_v10  ;;  %v4026_v33 = vunpack.i.l.bf16 %v4025_v10  ;;  %v5937_v25 = vld [vmem:[#allocation3_spill] sm:$0xff] }
 0x1f4   : > { %v1407_v44 = vsel %vm1394_vm3, %v1374_v40, %v4141_v22  ;;  %v1408_v28 = vsel %vm1394_vm3, %v1375_v34, %v4142_v56  ;;  %v3932_v18 = vunpack.i.h.bf16 %v5937_v25  ;;  %v3931_v14 = vunpack.i.l.bf16 %v5937_v25  ;;  %v3825_v40 = vld [vmem:[%s5908_s3] sm:$0xff] }
 0x1f5   : > { %v1535_v62 = vsel %vm5184_vm13, %v1407_v44, 0.0  ;;  %v2551_v9 = vsel %vm644_vm2, %v4361_v51, %v4027_v43  ;;  %v2552_v1 = vsel %vm644_vm2, %v4362_v16, %v4026_v33  ;;  %v1850_v49 = vsel %vm644_vm2, %v4365_v11, %v4037_v42  ;;  %2203 = vmatpush.bf16.msrb.mxu2 %v3825_v40 }
 0x1f6   : > { %v5209_v17 = vpack.c.bf16 %v1408_v28, %v1535_v62  ;;  %v2583_v53 = vsel %vm1394_vm3, %v2551_v9, %v4032_v0  ;;  %v2584_v35 = vsel %vm1394_vm3, %v2552_v1, %v4031_v12  ;;  %v1903_v10 = vsel %vm1394_vm3, %v1871_v20, %v3931_v14 }
 0x1f7   : > { %v2712_v26 = vsel %vm5200_vm14, %v2584_v35, 0.0  ;;  %v1904_v21 = vsel %vm1394_vm3, %v1872_v30, %v3932_v18  ;;  %v1849_v34 = vsel %vm644_vm2, %v4366_v27, %v4036_v6  ;;  %v691_v33 = vadd.s32 56, %v4832_v47  ;;  %v5250_v35 = vld [vmem:[#allocation2 + $0xe7] sm:$0xff] }
 0x1f8   : > { %4249 = vrot.lane.b32.xlu0 %v4248_v29, %s4421_s24  ;;  %v5219_v7 = vpop.permute.xlu1 %4149  ;;  %v2741_v63 = vpack.c.bf16 %v2712_v26, %v2583_v53  ;;  %v1922_v28 = vpack.c.bf16 %v1904_v21, %v1903_v10  ;;  %v818_v12 = vand.u32 15, %v698_v36  ;;  %v5235_v4 = vpop.permute.xlu2 %4199  ;;  %v4176_v9 = vunpack.i.l.bf16 %v5158_v46  ;;  %v5941_v53 = vld [vmem:[#allocation5_spill] sm:$0xff] }
 0x1f9   : > { %v769_v51 = vand.u32 15, %v691_v33  ;;  %v4177_v14 = vunpack.i.h.bf16 %v5158_v46  ;;  %v4062_v20 = vunpack.i.h.bf16 %v5007_v3  ;;  %v4368_v10 = vld [vmem:[#allocation2 + $0x41] sm:$0xff]  ;;  %v4278_v11 = vpack.i.bf16 %v5252_v50, %v5250_v35 }
 0x1fa   : > { %v4040_v54 = vpop.permute.xlu0 %4039  ;;  %3733 = vmatmul.msk.bf16.gmra.mxu3 %vm1974_vm6, %v2741_v63  ;;  %vm5241_vm15 = vcmp.ge.s32.totalorder %v818_v12, 1  ;;  %v4066_v40 = vunpack.i.l.bf16 %v4923_v48  ;;  %v700_v12 = vadd.s32 128, %v4832_v47  ;;  %v695_v46 = vadd.s32 88, %v4832_v47 }
 0x1fb   : > { %v4042_v56 = vunpack.i.h.bf16 %v4040_v54  ;;  %v4041_v22 = vunpack.i.l.bf16 %v4040_v54  ;;  %v4061_v54 = vunpack.i.l.bf16 %v5007_v3  ;;  %vm5257_vm0 = vcmp.le.s32.totalorder %v769_v51, 14 }
 0x1fd   : > { %v1881_v44 = vsel %vm1394_vm3, %v1849_v34, %v4041_v22  ;;  %v1882_v43 = vsel %vm1394_vm3, %v1850_v49, %v4042_v56  ;;  %v4367_v56 = vld [vmem:[#allocation2 + $0x39] sm:$0xff]  ;;  %v4067_v34 = vunpack.i.h.bf16 %v4923_v48 }
 0x1fe   : > { %v1911_v0 = vpack.c.bf16 %v1882_v43, %v1881_v44 }
 0x200   : > { %3652 = vmatmul.msk.bf16.gmra.mxu2 %vm1974_vm6, %v1922_v28  ;;  %4264 = vrot.lane.b32.xlu0 %v4248_v29, %s4420_s23  ;;  %v4165_v62 = vpop.permute.xlu1 %4164  ;;  %v5279_v33 = vpop.permute.xlu2 %4224 }
 0x201   : > { %3641 = vmatmul.msk.bf16.gmra.mxu1 %vm1974_vm6, %v1911_v0  ;;  %v4167_v25 = vunpack.i.h.bf16 %v4165_v62  ;;  %v4166_v18 = vunpack.i.l.bf16 %v4165_v62 }
 0x202   : > { %v4055_v16 = vpop.permute.xlu0 %4054 }
 0x203   : > { %v1377_v30 = vsel %vm644_vm2, %v5940_v59, %v4167_v25  ;;  %v1376_v29 = vsel %vm644_vm2, %v5941_v53, %v4166_v18  ;;  %v4057_v6 = vunpack.i.h.bf16 %v4055_v16  ;;  %v4056_v26 = vunpack.i.l.bf16 %v4055_v16  ;;  %v4369_v18 = vld [vmem:[#allocation2 + $0x40] sm:$0xff] }
 0x204   : > { %v1409_v42 = vsel %vm1394_vm3, %v1376_v29, %v4176_v9  ;;  %v1410_v63 = vsel %vm1394_vm3, %v1377_v30, %v4177_v14  ;;  %v1852_v51 = vsel %vm644_vm2, %v4369_v18, %v4067_v34  ;;  %v4370_v9 = vld [vmem:[#allocation2 + $0x38] sm:$0xff]  ;;  %v693_v14 = vadd.s32 72, %v4832_v47 }
 0x205   : > { %v1537_v36 = vsel %vm5241_vm15, %v1409_v42, 0.0  ;;  %v2553_v22 = vsel %vm644_vm2, %v4367_v56, %v4057_v6  ;;  %v2554_v21 = vsel %vm644_vm2, %v4368_v10, %v4056_v26  ;;  %v1851_v48 = vsel %vm644_vm2, %v4370_v9, %v4066_v40  ;;  %v5304_v56 = vld [vmem:[#allocation2 + $0xf9] sm:$0xff] }
 0x206   : > { %v5268_v49 = vpack.c.bf16 %v1410_v63, %v1537_v36  ;;  %v2585_v3 = vsel %vm1394_vm3, %v2553_v22, %v4062_v20  ;;  %v2586_v27 = vsel %vm1394_vm3, %v2554_v21, %v4061_v54  ;;  %v832_v30 = vand.u32 15, %v700_v12  ;;  %v4372_v63 = vld [vmem:[#allocation2 + $0x87] sm:$0xff] }
 0x207   : > { %v2714_v43 = vsel %vm5257_vm0, %v2586_v27, 0.0  ;;  %v783_v42 = vand.u32 15, %v693_v14  ;;  %v4202_v6 = vunpack.i.h.bf16 %v5235_v4  ;;  %v4201_v26 = vunpack.i.l.bf16 %v5235_v4  ;;  %v5306_v22 = vld [vmem:[#allocation2 + $0x101] sm:$0xff] }
 0x208   : > { %4279 = vrot.lane.b32.xlu0 %v4278_v11, %s4421_s24  ;;  %v5275_v44 = vpop.permute.xlu1 %4184  ;;  %v2742_v0 = vpack.c.bf16 %v2714_v43, %v2585_v3  ;;  %vm5296_vm1 = vcmp.ge.s32.totalorder %v832_v30, 1  ;;  %v5300_v41 = vpop.permute.xlu2 %4229  ;;  %v4092_v3 = vunpack.i.h.bf16 %v5081_v2  ;;  %v4091_v27 = vunpack.i.l.bf16 %v5081_v2  ;;  %v4373_v43 = vld [vmem:[#allocation2 + $0x49] sm:$0xff] }
 0x209   : > { %vm5312_vm4 = vcmp.le.s32.totalorder %v783_v42, 14  ;;  %v4097_v9 = vunpack.i.h.bf16 %v4965_v5  ;;  %v4376_v42 = vld [vmem:[#allocation2 + $0x48] sm:$0xff] }
 0x20a   : > { %v4070_v28 = vpop.permute.xlu0 %4069  ;;  %3734 = vmatmul.msk.bf16.gmra.mxu3 %vm1974_vm6, %v2742_v0  ;;  %v4374_v0 = vld [vmem:[#allocation2 + $0x51] sm:$0xff] }
 0x20b   : > { %v4072_v62 = vunpack.i.h.bf16 %v4070_v28  ;;  %v4071_v25 = vunpack.i.l.bf16 %v4070_v28 }
 0x20d   : > { %v1883_v16 = vsel %vm1394_vm3, %v1851_v48, %v4071_v25  ;;  %v1884_v1 = vsel %vm1394_vm3, %v1852_v51, %v4072_v62  ;;  %v4308_v62 = vpack.i.bf16 %v5304_v56, %v5306_v22  ;;  %v3844_v51 = vld [vmem:[%s5910_s5 + $0x8] sm:$0xff]  ;;  %v4096_v48 = vunpack.i.l.bf16 %v4965_v5 }
 0x20e   : > { %v1912_v59 = vpack.c.bf16 %v1884_v1, %v1883_v16  ;;  %3131 = vmatpush.bf16.msrb.mxu0 %v3844_v51 }
 0x210   : > { %3653 = vmatmul.msk.bf16.gmra.mxu2 %vm1974_vm6, %v1923_v24  ;;  %4294 = vrot.lane.b32.xlu0 %v4278_v11, %s4420_s23  ;;  %v4195_v53 = vpop.permute.xlu1 %4194  ;;  %v5339_v5 = vpop.permute.xlu2 %4244 }
 0x211   : > { %3642 = vmatmul.msk.bf16.gmra.mxu1 %vm1974_vm6, %v1912_v59  ;;  %v4197_v29 = vunpack.i.h.bf16 %v4195_v53  ;;  %v4196_v20 = vunpack.i.l.bf16 %v4195_v53 }
 0x212   : > { %v4085_v54 = vpop.permute.xlu0 %4084 }
 0x213   : > { %v1379_v24 = vsel %vm644_vm2, %v4371_v13, %v4197_v29  ;;  %v1378_v36 = vsel %vm644_vm2, %v4372_v63, %v4196_v20  ;;  %v4087_v4 = vunpack.i.h.bf16 %v4085_v54  ;;  %v4086_v21 = vunpack.i.l.bf16 %v4085_v54  ;;  %v4375_v29 = vld [vmem:[#allocation2 + $0x50] sm:$0xff] }
 0x214   : > { %v1411_v10 = vsel %vm1394_vm3, %v1378_v36, %v4201_v26  ;;  %v1412_v11 = vsel %vm1394_vm3, %v1379_v24, %v4202_v6  ;;  %v1854_v20 = vsel %vm644_vm2, %v4375_v29, %v4097_v9  ;;  %v1853_v6 = vsel %vm644_vm2, %v4376_v42, %v4096_v48 }
 0x215   : > { %v1539_v40 = vsel %vm5296_vm1, %v1411_v10, 0.0  ;;  %v2555_v28 = vsel %vm644_vm2, %v4373_v43, %v4087_v4  ;;  %v2556_v12 = vsel %vm644_vm2, %v4374_v0, %v4086_v21  ;;  %v797_v63 = vand.u32 15, %v695_v46  ;;  %v1134_v10 = vld [vmem:[#allocation2 + $0x117] sm:$0xff]  ;;  %v1135_v4 = vld [vmem:[#allocation2 + $0x11f] sm:$0xff] }
 0x216   : > { %v5322_v25 = vpack.c.bf16 %v1412_v11, %v1539_v40  ;;  %v2587_v2 = vsel %vm1394_vm3, %v2555_v28, %v4092_v3  ;;  %v2588_v18 = vsel %vm1394_vm3, %v2556_v12, %v4091_v27  ;;  %v4122_v3 = vunpack.i.h.bf16 %v5151_v15 }
 0x217   : > { %v2716_v1 = vsel %vm5312_vm4, %v2588_v18, 0.0  ;;  %v4121_v27 = vunpack.i.l.bf16 %v5151_v15  ;;  %vm2622_vm5 = vcmp.le.s32.totalorder %v797_v63, 14  ;;  %v4338_v40 = vpack.i.bf16 %v1135_v4, %v1134_v10 }
 0x218   : > { %4309 = vrot.lane.b32.xlu0 %v4308_v62, %s4421_s24  ;;  %v5332_v16 = vpop.permute.xlu1 %4209  ;;  %v2743_v59 = vpack.c.bf16 %v2716_v1, %v2587_v2  ;;  %v4260_v43 = vpop.permute.xlu2 %4259  ;;  %v4127_v12 = vunpack.i.h.bf16 %v5036_v38  ;;  %v706_v9 = vadd.s32 176, %v4832_v47 }
 0x219   : > { %v4262_v10 = vunpack.i.h.bf16 %v4260_v43  ;;  %v4261_v4 = vunpack.i.l.bf16 %v4260_v43  ;;  %v4152_v43 = vunpack.i.h.bf16 %v5219_v7 }
 0x21a   : > { %v4100_v14 = vpop.permute.xlu0 %4099  ;;  %3735 = vmatmul.msk.bf16.gmra.mxu3 %vm1974_vm6, %v2743_v59 }
 0x21b   : > { %v4102_v30 = vunpack.i.h.bf16 %v4100_v14  ;;  %v4101_v53 = vunpack.i.l.bf16 %v4100_v14  ;;  %v4379_v14 = vld [vmem:[#allocation2 + $0x60] sm:$0xff] }
 0x21c   : > { %v1856_v59 = vsel %vm644_vm2, %v4379_v14, %v4127_v12 }
 0x21d   : > { %v1885_v26 = vsel %vm1394_vm3, %v1853_v6, %v4101_v53  ;;  %v1886_v54 = vsel %vm1394_vm3, %v1854_v20, %v4102_v30  ;;  %v4380_v30 = vld [vmem:[#allocation2 + $0x58] sm:$0xff]  ;;  %v697_v20 = vadd.s32 104, %v4832_v47  ;;  %v874_v6 = vand.u32 15, %v706_v9 }
 0x21e   : > { %v1913_v13 = vpack.c.bf16 %v1886_v54, %v1885_v26  ;;  %v5948_v54 = vld [vmem:[#allocation6_spill] sm:$0xff]  ;;  %v4157_v9 = vunpack.i.h.bf16 %v5103_v39 }
 0x21f   : > { %vm5375_vm7 = vcmp.ge.s32.totalorder %v874_v6, 1  ;;  %v4384_v6 = vld [vmem:[#allocation2 + $0x68] sm:$0xff] }
 0x220   : > { %3654 = vmatmul.msk.bf16.gmra.mxu2 %vm1974_vm6, %v1924_v60  ;;  %4324 = vrot.lane.b32.xlu0 %v4308_v62, %s4420_s23  ;;  %v5349_v24 = vpop.permute.xlu1 %4219  ;;  %v4378_v60 = vld [vmem:[#allocation2 + $0x61] sm:$0xff]  ;;  %v4126_v62 = vunpack.i.l.bf16 %v5036_v38  ;;  %v5372_v46 = vpop.permute.xlu2 %4274 }
 0x221   : > { %3643 = vmatmul.msk.bf16.gmra.mxu1 %vm1974_vm6, %v1913_v13 }
 0x222   : > { %v4115_v36 = vpop.permute.xlu0 %4114  ;;  %v1855_v53 = vsel %vm644_vm2, %v4380_v30, %v4126_v62 }
 0x223   : > { %v4117_v21 = vunpack.i.h.bf16 %v4115_v36  ;;  %v4116_v11 = vunpack.i.l.bf16 %v4115_v36  ;;  %v811_v36 = vand.u32 15, %v697_v20  ;;  %v4383_v20 = vld [vmem:[#allocation2 + $0x70] sm:$0xff] }
 0x225   : > { %v2557_v37 = vsel %vm644_vm2, %v4377_v45, %v4117_v21  ;;  %v2558_v34 = vsel %vm644_vm2, %v4378_v60, %v4116_v11  ;;  %vm2624_vm8 = vcmp.le.s32.totalorder %v811_v36, 14 }
 0x226   : > { %v2590_v28 = vsel %vm1394_vm3, %v2558_v34, %v4121_v27  ;;  %v2589_v0 = vsel %vm1394_vm3, %v2557_v37, %v4122_v3 }
 0x227   : > { %v2718_v2 = vsel %vm2622_vm5, %v2590_v28, 0.0  ;;  %v4151_v28 = vunpack.i.l.bf16 %v5219_v7  ;;  %v4156_v7 = vunpack.i.l.bf16 %v5103_v39 }
 0x228   : > { %4339 = vrot.lane.b32.xlu0 %v4338_v40, %s4421_s24  ;;  %v5361_v15 = vpop.permute.xlu1 %4239  ;;  %v2744_v51 = vpack.c.bf16 %v2718_v2, %v2589_v0  ;;  %v5401_v30 = vpop.permute.xlu2 %4289 }
 0x22a   : > { %v4130_v18 = vpop.permute.xlu0 %4129  ;;  %3736 = vmatmul.msk.bf16.gmra.mxu3 %vm1974_vm6, %v2744_v51 }
 0x22b   : > { %v4132_v48 = vunpack.i.h.bf16 %v4130_v18  ;;  %v4131_v1 = vunpack.i.l.bf16 %v4130_v18 }
 0x22d   : > { %v1887_v38 = vsel %vm1394_vm3, %v1855_v53, %v4131_v1  ;;  %v1888_v29 = vsel %vm1394_vm3, %v1856_v59, %v4132_v48 }
 0x22e   : > { %v1914_v42 = vpack.c.bf16 %v1888_v29, %v1887_v38 }
 0x230   : > { %v4255_v26 = vpop.permute.xlu1 %4254  ;;  %3679 = vmatmul.msk.bf16.vlgmr.msrb.gmra.mxu2 %vm1974_vm6, %v5948_v54 }
 0x231   : > { %3644 = vmatmul.msk.bf16.gmra.mxu1 %vm1974_vm6, %v1914_v42  ;;  %v4257_v13 = vunpack.i.h.bf16 %v4255_v26  ;;  %v4256_v63 = vunpack.i.l.bf16 %v4255_v26  ;;  %v1858_v42 = vsel %vm644_vm2, %v4383_v20, %v4157_v9  ;;  %v1857_v26 = vsel %vm644_vm2, %v4384_v6, %v4156_v7 }
 0x232   : > { %v4145_v21 = vpop.permute.xlu0 %4144 }
 0x233   : > { %v1385_v3 = vsel %vm644_vm2, %v5098_v31, %v4257_v13  ;;  %v1384_v27 = vsel %vm644_vm2, %v5096_v58, %v4256_v63  ;;  %v5383_v45 = vpop.f32.mrf.mxu2  ;;  %v4147_v60 = vunpack.i.h.bf16 %v4145_v21  ;;  %v4146_v34 = vunpack.i.l.bf16 %v4145_v21  ;;  %v4381_v31 = vld [vmem:[#allocation2 + $0x69] sm:$0xff]  ;;  %v4382_v58 = vld [vmem:[#allocation2 + $0x71] sm:$0xff] }
 0x234   : > { %v1417_v37 = vsel %vm1394_vm3, %v1384_v27, %v4261_v4  ;;  %v1418_v40 = vsel %vm1394_vm3, %v1385_v3, %v4262_v10  ;;  %v699_v13 = vadd.s32 120, %v4832_v47  ;;  %v4187_v27 = vunpack.i.h.bf16 %v5275_v44 }
 0x235   : > { %v1545_v0 = vsel %vm5375_vm7, %v1417_v37, 0.0  ;;  %v2559_v12 = vsel %vm644_vm2, %v4381_v31, %v4147_v60  ;;  %v2560_v62 = vsel %vm644_vm2, %v4382_v58, %v4146_v34  ;;  %v4186_v37 = vunpack.i.l.bf16 %v5275_v44  ;;  %v5420_v60 = vpop.permute.xlu2 %4304  ;;  %v4385_v34 = vld [vmem:[#allocation2 + $0x79] sm:$0xff] }
 0x236   : > { %v5393_v2 = vpack.c.bf16 %v1418_v40, %v1545_v0  ;;  %v2592_v18 = vsel %vm1394_vm3, %v2560_v62, %v4151_v28  ;;  %v2591_v51 = vsel %vm1394_vm3, %v2559_v12, %v4152_v43  ;;  %v825_v10 = vand.u32 15, %v699_v13  ;;  %v4386_v43 = vld [vmem:[#allocation2 + $0x81] sm:$0xff] }
 0x237   : > { %v2720_v1 = vsel %vm2624_vm8, %v2592_v18, 0.0  ;;  %v4182_v31 = vunpack.i.h.bf16 %v5198_v61  ;;  %v4181_v12 = vunpack.i.l.bf16 %v5198_v61  ;;  %v701_v61 = vadd.s32 136, %v4832_v47 }
 0x238   : > { %v5399_v48 = vpop.permute.xlu1 %4269  ;;  %v2745_v59 = vpack.c.bf16 %v2720_v1, %v2591_v51  ;;  %vm2626_vm9 = vcmp.le.s32.totalorder %v825_v10, 14  ;;  %v712_v51 = vadd.s32 224, %v4832_v47 }
 0x239   : > { %v839_v13 = vand.u32 15, %v701_v61 }
 0x23a   : > { %v4160_v14 = vpop.permute.xlu0 %4159  ;;  %3737 = vmatmul.msk.bf16.gmra.mxu3 %vm1974_vm6, %v2745_v59 }
 0x23b   : > { %v4162_v53 = vunpack.i.h.bf16 %v4160_v14  ;;  %v4161_v38 = vunpack.i.l.bf16 %v4160_v14  ;;  %v5403_v29 = vpop.f32.mrf.mxu2  ;;  %v4387_v14 = vld [vmem:[#allocation2 + $0x80] sm:$0xff]  ;;  %vm2628_vm11 = vcmp.le.s32.totalorder %v839_v13, 14 }
 0x23c   : > { %v1860_v59 = vsel %vm644_vm2, %v4387_v14, %v4182_v31 }
 0x23d   : > { %v1889_v39 = vsel %vm1394_vm3, %v1857_v26, %v4161_v38  ;;  %v1890_v54 = vsel %vm1394_vm3, %v1858_v42, %v4162_v53  ;;  %v4388_v53 = vld [vmem:[#allocation2 + $0x78] sm:$0xff]  ;;  %v916_v26 = vand.u32 15, %v712_v51 }
 0x23e   : > { %v1915_v63 = vpack.c.bf16 %v1890_v54, %v1889_v39  ;;  %v1859_v38 = vsel %vm644_vm2, %v4388_v53, %v4181_v12  ;;  %v4320_v39 = vpop.permute.xlu2 %4319  ;;  %v4226_v53 = vunpack.i.l.bf16 %v5279_v33 }
 0x23f   : > { %vm5444_vm10 = vcmp.ge.s32.totalorder %v916_v26, 1 }
 0x240   : > { %v5411_v36 = vpop.permute.xlu1 %4284  ;;  %3680 = vmatmul.msk.bf16.gmra.mxu2 %vm1974_vm6, %v4898_v52 }
 0x241   : > { %3645 = vmatmul.msk.bf16.gmra.mxu1 %vm1974_vm6, %v1915_v63  ;;  %v4212_v63 = vunpack.i.h.bf16 %v5332_v16 }
 0x242   : > { %v4170_v4 = vpop.permute.xlu0 %4169 }
 0x243   : > { %v5416_v21 = vpop.f32.mrf.mxu2  ;;  %v4172_v11 = vunpack.i.h.bf16 %v4170_v4  ;;  %v4171_v3 = vunpack.i.l.bf16 %v4170_v4 }
 0x245   : > { %v2561_v40 = vsel %vm644_vm2, %v4385_v34, %v4172_v11  ;;  %v2562_v52 = vsel %vm644_vm2, %v4386_v43, %v4171_v3  ;;  %v4322_v11 = vunpack.i.h.bf16 %v4320_v39  ;;  %v4321_v3 = vunpack.i.l.bf16 %v4320_v39 }
 0x246   : > { %v2594_v28 = vsel %vm1394_vm3, %v2562_v52, %v4186_v37  ;;  %v2593_v0 = vsel %vm1394_vm3, %v2561_v40, %v4187_v27  ;;  %v702_v37 = vadd.s32 144, %v4832_v47  ;;  %v703_v39 = vadd.s32 152, %v4832_v47 }
 0x247   : > { %v2722_v44 = vsel %vm2626_vm9, %v2594_v28, 0.0 }
 0x248   : > { %v5428_v58 = vpop.permute.xlu1 %4299  ;;  %v2746_v62 = vpack.c.bf16 %v2722_v44, %v2593_v0  ;;  %v4211_v0 = vunpack.i.l.bf16 %v5332_v16  ;;  %v4389_v44 = vld [vmem:[#allocation2 + $0x89] sm:$0xff]  ;;  %v846_v16 = vand.u32 15, %v702_v37  ;;  %v4222_v37 = vunpack.i.h.bf16 %v5349_v24 }
 0x24a   : > { %v4190_v18 = vpop.permute.xlu0 %4189  ;;  %3738 = vmatmul.msk.bf16.gmra.mxu3 %vm1974_vm6, %v2746_v62  ;;  %vm5467_vm12 = vcmp.ge.s32.totalorder %v846_v16, 1  ;;  %v4232_v16 = vunpack.i.h.bf16 %v5300_v41 }
 0x24b   : > { %v4192_v9 = vunpack.i.h.bf16 %v4190_v18  ;;  %v4191_v7 = vunpack.i.l.bf16 %v4190_v18  ;;  %v5431_v1 = vpop.f32.mrf.mxu2  ;;  %v4390_v18 = vld [vmem:[#allocation2 + $0x91] sm:$0xff] }
 0x24d   : > { %v1891_v20 = vsel %vm1394_vm3, %v1859_v38, %v4191_v7  ;;  %v1892_v42 = vsel %vm1394_vm3, %v1860_v59, %v4192_v9  ;;  %v4227_v59 = vunpack.i.h.bf16 %v5279_v33  ;;  %v704_v33 = vadd.s32 160, %v4832_v47 }
 0x24e   : > { %v1916_v6 = vpack.c.bf16 %v1892_v42, %v1891_v20 }
 0x250   : > { %v4315_v54 = vpop.permute.xlu1 %4314  ;;  %3681 = vmatmul.msk.bf16.gmra.mxu2 %vm1974_vm6, %v4940_v19 }
 0x251   : > { %3646 = vmatmul.msk.bf16.gmra.mxu1 %vm1974_vm6, %v1916_v6  ;;  %v4317_v10 = vunpack.i.h.bf16 %v4315_v54  ;;  %v4316_v4 = vunpack.i.l.bf16 %v4315_v54  ;;  %v4391_v54 = vld [vmem:[#allocation2 + $0x9f] sm:$0xff] }
 0x252   : > { %v4205_v27 = vpop.permute.xlu0 %4204  ;;  %v1381_v13 = vsel %vm644_vm2, %v4391_v54, %v4227_v59 }
 0x253   : > { %v1391_v40 = vsel %vm644_vm2, %v5252_v50, %v4317_v10  ;;  %v1390_v19 = vsel %vm644_vm2, %v5250_v35, %v4316_v4  ;;  %v4207_v43 = vunpack.i.h.bf16 %v4205_v27  ;;  %v4206_v52 = vunpack.i.l.bf16 %v4205_v27  ;;  %v5452_v28 = vpop.f32.mrf.mxu2 }
 0x254   : > { %v1423_v31 = vsel %vm1394_vm3, %v1390_v19, %v4321_v3  ;;  %v1424_v12 = vsel %vm1394_vm3, %v1391_v40, %v4322_v11  ;;  %v4221_v4 = vunpack.i.l.bf16 %v5349_v24  ;;  %v853_v40 = vand.u32 15, %v703_v39  ;;  %v3843_v19 = vld [vmem:[%s5910_s5] sm:$0xff] }
 0x255   : > { %v2563_v62 = vsel %vm644_vm2, %v4389_v44, %v4207_v43  ;;  %v2564_v50 = vsel %vm644_vm2, %v4390_v18, %v4206_v52  ;;  %v1551_v35 = vsel %vm5444_vm10, %v1423_v31, 0.0  ;;  %v860_v43 = vand.u32 15, %v704_v33  ;;  %v4393_v52 = vld [vmem:[#allocation2 + $0xa1] sm:$0xff]  ;;  %3132 = vmatpush.bf16.msrb.mxu0 %v3843_v19  ;;  %v4394_v44 = vld [vmem:[#allocation2 + $0x99] sm:$0xff] }
 0x256   : > { %v2596_v51 = vsel %vm1394_vm3, %v2564_v50, %v4211_v0  ;;  %v2595_v9 = vsel %vm1394_vm3, %v2563_v62, %v4212_v63  ;;  %v5463_v7 = vpack.c.bf16 %v1424_v12, %v1551_v35  ;;  %v4392_v63 = vld [vmem:[#allocation2 + $0x97] sm:$0xff]  ;;  %v2566_v0 = vsel %vm644_vm2, %v4393_v52, %v4221_v4 }
 0x257   : > { %v2724_v14 = vsel %vm2628_vm11, %v2596_v51, 0.0  ;;  %v1380_v10 = vsel %vm644_vm2, %v4392_v63, %v4226_v53  ;;  %v4231_v31 = vunpack.i.l.bf16 %v5300_v41  ;;  %v2565_v24 = vsel %vm644_vm2, %v4394_v44, %v4222_v37  ;;  %v4396_v53 = vld [vmem:[#allocation2 + $0xa7] sm:$0xff] }
 0x258   : > { %v2747_v38 = vpack.c.bf16 %v2724_v14, %v2595_v9  ;;  %vm5496_vm13 = vcmp.le.s32.totalorder %v853_v40, 14  ;;  %v4242_v51 = vunpack.i.h.bf16 %v5361_v15  ;;  %v4241_v9 = vunpack.i.l.bf16 %v5361_v15  ;;  %v4395_v14 = vld [vmem:[#allocation2 + $0xaf] sm:$0xff] }
 0x259   : > { %vm1447_vm14 = vcmp.ge.s32.totalorder %v860_v43, 1  ;;  %v705_v63 = vadd.s32 168, %v4832_v47  ;;  %v708_v43 = vadd.s32 192, %v4832_v47 }
 0x25a   : > { %v4215_v61 = vpop.permute.xlu0 %4214  ;;  %3739 = vmatmul.msk.bf16.gmra.mxu3 %vm1974_vm6, %v2747_v38 }
 0x25b   : > { %v4217_v42 = vunpack.i.h.bf16 %v4215_v61  ;;  %v4216_v6 = vunpack.i.l.bf16 %v4215_v61  ;;  %v5471_v26 = vpop.f32.mrf.mxu2  ;;  %v867_v33 = vand.u32 15, %v705_v63  ;;  %v888_v44 = vand.u32 15, %v708_v43 }
 0x25d   : > { %v1413_v11 = vsel %vm1394_vm3, %v1380_v10, %v4216_v6  ;;  %v1414_v3 = vsel %vm1394_vm3, %v1381_v13, %v4217_v42  ;;  %v2597_v42 = vsel %vm1394_vm3, %v2565_v24, %v4232_v16  ;;  %v4246_v10 = vunpack.i.l.bf16 %v5339_v5  ;;  %v4399_v16 = vld [vmem:[#allocation2 + $0xcf] sm:$0xff] }
 0x25e   : > { %v1541_v27 = vsel %vm5467_vm12, %v1413_v11, 0.0  ;;  %v4247_v11 = vunpack.i.h.bf16 %v5339_v5  ;;  %vm2632_vm15 = vcmp.le.s32.totalorder %v867_v33, 14  ;;  %v4277_v24 = vunpack.i.h.bf16 %v5372_v46  ;;  %v4401_v33 = vld [vmem:[#allocation2 + $0xc1] sm:$0xff] }
 0x25f   : > { %v5484_v34 = vpack.c.bf16 %v1414_v3, %v1541_v27  ;;  %v4397_v27 = vld [vmem:[#allocation2 + $0xb1] sm:$0xff]  ;;  %vm1451_vm0 = vcmp.ge.s32.totalorder %v888_v44, 1 }
 0x260   : > { %3682 = vmatmul.msk.bf16.gmra.mxu2 %vm1974_vm6, %v4991_v32  ;;  %v2598_v32 = vsel %vm1394_vm3, %v2566_v0, %v4231_v31  ;;  %v2568_v37 = vsel %vm644_vm2, %v4397_v27, %v4246_v10  ;;  %v4398_v0 = vld [vmem:[#allocation2 + $0xa9] sm:$0xff] }
 0x261   : > { %v2726_v6 = vsel %vm5496_vm13, %v2598_v32, 0.0  ;;  %v2567_v31 = vsel %vm644_vm2, %v4398_v0, %v4247_v11  ;;  %v4271_v11 = vunpack.i.l.bf16 %v5399_v48 }
 0x262   : > { %v4235_v12 = vpop.permute.xlu0 %4234  ;;  %v2748_v41 = vpack.c.bf16 %v2726_v6, %v2597_v42 }
 0x263   : > { %v4237_v62 = vunpack.i.h.bf16 %v4235_v12  ;;  %v4236_v18 = vunpack.i.l.bf16 %v4235_v12  ;;  %v5494_v50 = vpop.f32.mrf.mxu2  ;;  %v5527_v12 = vpop.f32.mrf.mxu3 }
 0x265   : > { %v1383_v59 = vsel %vm644_vm2, %v4395_v14, %v4237_v62  ;;  %v1382_v38 = vsel %vm644_vm2, %v4396_v53, %v4236_v18  ;;  %v4276_v62 = vunpack.i.l.bf16 %v5372_v46  ;;  %v1387_v14 = vsel %vm644_vm2, %v4399_v16, %v4277_v24  ;;  %v4404_v24 = vld [vmem:[#allocation2 + $0xd7] sm:$0xff] }
 0x266   : > { %v1415_v61 = vsel %vm1394_vm3, %v1382_v38, %v4241_v9  ;;  %v1416_v20 = vsel %vm1394_vm3, %v1383_v59, %v4242_v51  ;;  %v4400_v59 = vld [vmem:[#allocation2 + $0xc7] sm:$0xff]  ;;  %v707_v38 = vadd.s32 184, %v4832_v47 }
 0x267   : > { %v1543_v39 = vsel %vm1447_vm14, %v1415_v61, 0.0  ;;  %v1386_v53 = vsel %vm644_vm2, %v4400_v59, %v4276_v62  ;;  %v710_v61 = vadd.s32 208, %v4832_v47 }
 0x268   : > { %v5511_v15 = vpack.c.bf16 %v1416_v20, %v1543_v39  ;;  %v881_v63 = vand.u32 15, %v707_v38  ;;  %v4286_v38 = vunpack.i.l.bf16 %v5411_v36 }
 0x269   : > { %v902_v10 = vand.u32 15, %v710_v61  ;;  %v4287_v61 = vunpack.i.h.bf16 %v5411_v36  ;;  %v4292_v36 = vunpack.i.h.bf16 %v5401_v30 }
 0x26a   : > { %v4250_v54 = vpop.permute.xlu0 %4249  ;;  %3740 = vmatmul.msk.bf16.gmra.mxu3 %vm1974_vm6, %v2748_v41  ;;  %vm2634_vm1 = vcmp.le.s32.totalorder %v881_v63, 14 }
 0x26b   : > { %v5513_v13 = vpop.f32.mrf.mxu2  ;;  %v4251_v4 = vunpack.i.l.bf16 %v4250_v54  ;;  %v4252_v40 = vunpack.i.h.bf16 %v4250_v54  ;;  %v5543_v54 = vpop.f32.mrf.mxu3  ;;  %vm1453_vm4 = vcmp.ge.s32.totalorder %v902_v10, 1 }
 0x26d   : > { %v2600_v52 = vsel %vm1394_vm3, %v2568_v37, %v4251_v4  ;;  %v4302_v37 = vunpack.i.h.bf16 %v5428_v58 }
 0x26e   : > { %v2728_v5 = vsel %vm2632_vm15, %v2600_v52, 0.0 }
 0x270   : > { %3683 = vmatmul.msk.bf16.gmra.mxu2 %vm1974_vm6, %v5068_v57  ;;  %v2599_v57 = vsel %vm1394_vm3, %v2567_v31, %v4252_v40  ;;  %v4301_v40 = vunpack.i.l.bf16 %v5428_v58 }
 0x271   : > { %v2749_v18 = vpack.c.bf16 %v2728_v5, %v2599_v57  ;;  %v4272_v57 = vunpack.i.h.bf16 %v5399_v48  ;;  %v4403_v5 = vld [vmem:[#allocation2 + $0xdf] sm:$0xff] }
 0x272   : > { %v4265_v3 = vpop.permute.xlu0 %4264 }
 0x273   : > { %v5522_v19 = vpop.f32.mrf.mxu2  ;;  %v4266_v46 = vunpack.i.l.bf16 %v4265_v3  ;;  %v4267_v41 = vunpack.i.h.bf16 %v4265_v3  ;;  %v4402_v3 = vld [vmem:[#allocation2 + $0xb9] sm:$0xff] }
 0x275   : > { %v2570_v4 = vsel %vm644_vm2, %v4401_v33, %v4266_v46  ;;  %v2569_v31 = vsel %vm644_vm2, %v4402_v3, %v4267_v41  ;;  %v2571_v41 = vsel %vm644_vm2, %v5172_v8, %v4287_v61  ;;  %v2032_v33 = vpop.f32.mrf.mxu1 }
 0x27a   : > { %v4280_v35 = vpop.permute.xlu0 %4279  ;;  %3741 = vmatmul.msk.bf16.gmra.mxu3 %vm1974_vm6, %v2749_v18 }
 0x27b   : > { %v4282_v32 = vunpack.i.h.bf16 %v4280_v35  ;;  %v4281_v51 = vunpack.i.l.bf16 %v4280_v35  ;;  %v5532_v9 = vpop.f32.mrf.mxu2  ;;  %v2601_v35 = vsel %vm1394_vm3, %v2569_v31, %v4272_v57  ;;  %v4405_v31 = vld [vmem:[#allocation2 + $0xe1] sm:$0xff] }
 0x27d   : > { %v1419_v20 = vsel %vm1394_vm3, %v1386_v53, %v4281_v51  ;;  %v1420_v42 = vsel %vm1394_vm3, %v1387_v14, %v4282_v32  ;;  %v5563_v14 = vpop.f32.mrf.mxu3  ;;  %v709_v53 = vadd.s32 200, %v4832_v47 }
 0x27e   : > { %v1547_v6 = vsel %vm1451_vm0, %v1419_v20, 0.0  ;;  %v2572_v20 = vsel %vm644_vm2, %v5174_v23, %v4286_v38  ;;  %v4330_v38 = vpop.permute.xlu1 %4329 }
 0x27f   : > { %v5541_v39 = vpack.c.bf16 %v1420_v42, %v1547_v6  ;;  %v895_v46 = vand.u32 15, %v709_v53  ;;  %v4291_v42 = vunpack.i.l.bf16 %v5401_v30  ;;  %v4307_v30 = vunpack.i.h.bf16 %v5420_v60 }
 0x280   : > { %3684 = vmatmul.msk.bf16.gmra.mxu2 %vm1974_vm6, %v5141_v55  ;;  %v2602_v55 = vsel %vm1394_vm3, %v2570_v4, %v4271_v11 }
 0x281   : > { %v2730_v32 = vsel %vm2634_vm1, %v2602_v55, 0.0  ;;  %v2604_v63 = vsel %vm1394_vm3, %v2572_v20, %v4291_v42  ;;  %vm2636_vm5 = vcmp.le.s32.totalorder %v895_v46, 14  ;;  %v3852_v20 = vld [vmem:[%s5912_s7 + $0x38] sm:$0xff] }
 0x282   : > { %v4295_v27 = vpop.permute.xlu0 %4294  ;;  %v2750_v59 = vpack.c.bf16 %v2730_v32, %v2601_v35  ;;  %v2732_v4 = vsel %vm2636_vm5, %v2604_v63, 0.0  ;;  %v4407_v42 = vld [vmem:[#allocation2 + $0xf1] sm:$0xff]  ;;  %v4331_v63 = vunpack.i.l.bf16 %v4330_v38  ;;  %3330 = vmatpush.bf16.msrb.mxu1 %v3852_v20 }
 0x283   : > { %v4297_v43 = vunpack.i.h.bf16 %v4295_v27  ;;  %v4296_v52 = vunpack.i.l.bf16 %v4295_v27  ;;  %v5551_v0 = vpop.f32.mrf.mxu2  ;;  %v711_v27 = vadd.s32 216, %v4832_v47  ;;  %v3851_v20 = vld [vmem:[%s5912_s7 + $0x30] sm:$0xff] }
 0x285   : > { %v1389_v44 = vsel %vm644_vm2, %v4403_v5, %v4297_v43  ;;  %v1388_v62 = vsel %vm644_vm2, %v4404_v24, %v4296_v52  ;;  %v5581_v10 = vpop.f32.mrf.mxu3  ;;  %v2034_v43 = vpop.f32.mrf.mxu1  ;;  %v909_v52 = vand.u32 15, %v711_v27  ;;  %v4406_v24 = vld [vmem:[#allocation2 + $0xd9] sm:$0xff] }
 0x286   : > { %v1421_v58 = vsel %vm1394_vm3, %v1388_v62, %v4301_v40  ;;  %v1422_v18 = vsel %vm1394_vm3, %v1389_v44, %v4302_v37  ;;  %v4306_v40 = vunpack.i.l.bf16 %v5420_v60  ;;  %v2573_v62 = vsel %vm644_vm2, %v4406_v24, %v4307_v30  ;;  %3331 = vmatpush.bf16.msrb.mxu1 %v3851_v20 }
 0x287   : > { %v1549_v51 = vsel %vm1453_vm4, %v1421_v58, 0.0  ;;  %vm2638_vm7 = vcmp.le.s32.totalorder %v909_v52, 14 }
 0x288   : > { %v5561_v16 = vpack.c.bf16 %v1422_v18, %v1549_v51  ;;  %v2574_v55 = vsel %vm644_vm2, %v4405_v31, %v4306_v40  ;;  %v4332_v40 = vunpack.i.h.bf16 %v4330_v38  ;;  %v4345_v31 = vpop.permute.xlu1 %4344 }
 0x28a   : > { %3742 = vmatmul.msk.bf16.gmra.mxu3 %vm1974_vm6, %v2750_v59  ;;  %v4310_v37 = vpop.permute.xlu0 %4309  ;;  %v713_v59 = vadd.s32 232, %v4832_v47 }
 0x28b   : > { %v5565_v48 = vpop.f32.mrf.mxu2  ;;  %v4311_v3 = vunpack.i.l.bf16 %v4310_v37  ;;  %v4312_v57 = vunpack.i.h.bf16 %v4310_v37 }
 0x28c   : > { %v923_v46 = vand.u32 15, %v713_v59 }
 0x28d   : > { %v5589_v8 = vpop.f32.mrf.mxu3  ;;  %v2606_v44 = vsel %vm1394_vm3, %v2574_v55, %v4311_v3  ;;  %v2605_v58 = vsel %vm1394_vm3, %v2573_v62, %v4312_v57  ;;  %v5624_v57 = vld [vmem:[%s5909_s4] ss:$0 sm:$0xff]  ;;  %v715_v62 = vadd.s32 248, %v4832_v47 }
 0x28e   : > { %v2734_v18 = vsel %vm2638_vm7, %v2606_v44, 0.0  ;;  %vm2640_vm8 = vcmp.le.s32.totalorder %v923_v46, 14 }
 0x28f   : > { %v2752_v32 = vpack.c.bf16 %v2734_v18, %v2605_v58  ;;  %v4346_v18 = vunpack.i.l.bf16 %v4345_v31  ;;  %v937_v38 = vand.u32 15, %v715_v62 }
 0x290   : > { %3685 = vmatmul.msk.bf16.gmra.mxu2 %vm1974_vm6, %v5209_v17  ;;  %v2603_v17 = vsel %vm1394_vm3, %v2571_v41, %v4292_v36 }
 0x291   : > { %v2751_v11 = vpack.c.bf16 %v2732_v4, %v2603_v17  ;;  %vm2642_vm9 = vcmp.le.s32.totalorder %v937_v38, 14 }
 0x292   : > { %v4325_v60 = vpop.permute.xlu0 %4324 }
 0x293   : > { %v5576_v6 = vpop.f32.mrf.mxu2  ;;  %v4326_v53 = vunpack.i.l.bf16 %v4325_v60  ;;  %v4327_v61 = vunpack.i.h.bf16 %v4325_v60 }
 0x295   : > { %v5601_v35 = vpop.f32.mrf.mxu3  ;;  %v2576_v41 = vsel %vm644_vm2, %v4407_v42, %v4326_v53  ;;  %v4347_v53 = vunpack.i.h.bf16 %v4345_v31 }
 0x296   : > { %v2608_v37 = vsel %vm1394_vm3, %v2576_v41, %v4331_v63 }
 0x297   : > { %v2736_v30 = vsel %vm2640_vm8, %v2608_v37, 0.0 }
 0x29a   : > { %3743 = vmatmul.msk.bf16.gmra.mxu3 %vm1974_vm6, %v2751_v11  ;;  %v4408_v11 = vld [vmem:[#allocation2 + $0xe9] sm:$0xff] }
 0x29b   : > { %v5585_v23 = vpop.f32.mrf.mxu2  ;;  %v2575_v27 = vsel %vm644_vm2, %v4408_v11, %v4327_v61 }
 0x29c   : > { %v2607_v3 = vsel %vm1394_vm3, %v2575_v27, %v4332_v40 }
 0x29d   : > { %v5613_v36 = vpop.f32.mrf.mxu3  ;;  %v2753_v44 = vpack.c.bf16 %v2736_v30, %v2607_v3 }
 0x2a0   : > { %3686 = vmatmul.msk.bf16.gmra.mxu2 %vm1974_vm6, %v5268_v49  ;;  %v2037_v49 = vpop.f32.mrf.mxu1 }
 0x2a3   : > { %v5596_v5 = vpop.f32.mrf.mxu2 }
 0x2a5   : > { %v5627_v58 = vpop.f32.mrf.mxu3 }
 0x2a8   : > { %v2039_v17 = vpop.f32.mrf.mxu1 }
 0x2aa   : > { %3744 = vmatmul.msk.bf16.gmra.mxu3 %vm1974_vm6, %v2752_v32 }
 0x2ab   : > { %v5603_v51 = vpop.f32.mrf.mxu2 }
 0x2b0   : > { %3687 = vmatmul.msk.bf16.gmra.mxu2 %vm1974_vm6, %v5322_v25  ;;  %v5617_v25 = vpop.permute.xlu2 %4334  ;;  %v2042_v60 = vpop.f32.mrf.mxu1 }
 0x2b3   : > { %v2205_v4 = vpop.f32.mrf.mxu2 }
 0x2b4   : > { %v2206_v52 = vadd.f32 %v2205_v4, %v2032_v33  ;;  %v2577_v4 = vsel %vm644_vm2, %v5304_v56, %v4347_v53 }
 0x2b6   : > { %v2941_v55 = vadd.f32 %v5527_v12, %v2206_v52 }
 0x2b8   : > { %v4350_v32 = vpop.permute.xlu2 %4349  ;;  %v2977_v59 = vadd.f32 %v5624_v57, %v2941_v55  ;;  %v2044_v52 = vpop.f32.mrf.mxu1 }
 0x2b9   : > { %v4351_v61 = vunpack.i.l.bf16 %v4350_v32  ;;  %v4352_v63 = vunpack.i.h.bf16 %v4350_v32 }
 0x2ba   : > { %3745 = vmatmul.msk.bf16.gmra.mxu3 %vm1974_vm6, %v2753_v44  ;;  %v3009_v42 = vmax.f32 %v2977_v59, 0.0 }
 0x2bb   : > { %v2207_v24 = vpop.f32.mrf.mxu2  ;;  %v2609_v40 = vsel %vm1394_vm3, %v2577_v4, %v4352_v63 }
 0x2bc   : > { %v2208_v33 = vadd.f32 %v2207_v24, %v2034_v43  ;;  %v2578_v43 = vsel %vm644_vm2, %v5306_v22, %v4346_v18 }
 0x2bd   : > { %v2610_v11 = vsel %vm1394_vm3, %v2578_v43, %v4351_v61 }
 0x2be   : > { %v2942_v12 = vadd.f32 %v5543_v54, %v2208_v33  ;;  %v2738_v22 = vsel %vm2642_vm9, %v2610_v11, 0.0 }
 0x2bf   : > { %v2754_v3 = vpack.c.bf16 %v2738_v22, %v2609_v40 }
 0x2c0   : > { %v2978_v46 = vadd.f32 %v5624_v57, %v2942_v12  ;;  %3688 = vmatmul.msk.bf16.gmra.mxu2 %vm1974_vm6, %v5484_v34  ;;  %v5643_v34 = vpop.f32.mrf.mxu3  ;;  %v2047_v62 = vpop.f32.mrf.mxu1 }
 0x2c2   : > { %v3010_v41 = vmax.f32 %v2978_v46, 0.0 }
 0x2c3   : > { %v2210_v54 = vpop.f32.mrf.mxu2 }
 0x2c4   : > { %v3041_v27 = vpack.c.bf16 %v3010_v41, %v3009_v42  ;;  %v2211_v37 = vadd.f32 %v2210_v54, %v2037_v49 }
 0x2c6   : > { %3755 = vmatmul.msk.bf16.vlgmr.msrb.gmra.mxu0 %vm644_vm2, %v3041_v27  ;;  %v2943_v30 = vadd.f32 %v5563_v14, %v2211_v37  ;;  %v3850_v14 = vld [vmem:[%s5912_s7 + $0x28] sm:$0xff] }
 0x2c7   : > { %3332 = vmatpush.bf16.msrb.mxu1 %v3850_v14 }
 0x2c8   : > { %v2979_v55 = vadd.f32 %v5624_v57, %v2943_v30  ;;  %v2883_v24 = vpop.f32.mrf.mxu3  ;;  %v2049_v53 = vpop.f32.mrf.mxu1 }
 0x2ca   : > { %3746 = vmatmul.msk.bf16.gmra.mxu3 %vm1974_vm6, %v2754_v3  ;;  %v3011_v33 = vmax.f32 %v2979_v55, 0.0 }
 0x2cb   : > { %v2212_v31 = vpop.f32.mrf.mxu2 }
 0x2cc   : > { %v2213_v56 = vadd.f32 %v2212_v31, %v2039_v17 }
 0x2ce   : > { %v2944_v44 = vadd.f32 %v5581_v10, %v2213_v56 }
 0x2d0   : > { %v2980_v49 = vadd.f32 %v5624_v57, %v2944_v44  ;;  %3689 = vmatmul.msk.bf16.gmra.mxu2 %vm1974_vm6, %v5511_v15  ;;  %v2886_v10 = vpop.f32.mrf.mxu3  ;;  %v2052_v54 = vpop.f32.mrf.mxu1 }
 0x2d2   : > { %v3012_v18 = vmax.f32 %v2980_v49, 0.0 }
 0x2d3   : > { %v2215_v32 = vpop.f32.mrf.mxu2 }
 0x2d4   : > { %v3042_v59 = vpack.c.bf16 %v3012_v18, %v3011_v33  ;;  %v2216_v17 = vadd.f32 %v2215_v32, %v2042_v60 }
 0x2d6   : > { %3756 = vmatmul.msk.bf16.gmra.mxu0 %vm644_vm2, %v3042_v59  ;;  %v2945_v12 = vadd.f32 %v5589_v8, %v2216_v17  ;;  %v3849_v8 = vld [vmem:[%s5912_s7 + $0x20] sm:$0xff] }
 0x2d7   : > { %3333 = vmatpush.bf16.msrb.mxu1 %v3849_v8  ;;  %v4340_v8 = vpop.permute.xlu0 %4339 }
 0x2d8   : > { %v2981_v15 = vadd.f32 %v5624_v57, %v2945_v12  ;;  %v2888_v41 = vpop.f32.mrf.mxu3  ;;  %v2054_v22 = vpop.f32.mrf.mxu1 }
 0x2da   : > { %v3013_v43 = vmax.f32 %v2981_v15, 0.0 }
 0x2db   : > { %v2217_v38 = vpop.f32.mrf.mxu2 }
 0x2dc   : > { %v2218_v61 = vadd.f32 %v2217_v38, %v2044_v52 }
 0x2de   : > { %v2946_v46 = vadd.f32 %v5601_v35, %v2218_v61 }
 0x2e0   : > { %v2982_v20 = vadd.f32 %v5624_v57, %v2946_v46  ;;  %3690 = vmatmul.msk.bf16.gmra.mxu2 %vm1974_vm6, %v5393_v2  ;;  %v5669_v37 = vpop.f32.mrf.mxu3 }
 0x2e2   : > { %v3014_v42 = vmax.f32 %v2982_v20, 0.0 }
 0x2e3   : > { %v2220_v60 = vpop.f32.mrf.mxu2 }
 0x2e4   : > { %v3043_v63 = vpack.c.bf16 %v3014_v42, %v3013_v43  ;;  %v2221_v4 = vadd.f32 %v2220_v60, %v2047_v62  ;;  %v714_v60 = vadd.s32 240, %v4832_v47  ;;  %v4337_v47 = vunpack.i.h.bf16 %v5617_v25 }
 0x2e6   : > { %3757 = vmatmul.msk.bf16.gmra.mxu0 %vm644_vm2, %v3043_v63  ;;  %v2947_v35 = vadd.f32 %v5613_v36, %v2221_v4  ;;  %v3848_v36 = vld [vmem:[%s5912_s7 + $0x18] sm:$0xff] }
 0x2e7   : > { %3334 = vmatpush.bf16.msrb.mxu1 %v3848_v36 }
 0x2e8   : > { %v2983_v2 = vadd.f32 %v5624_v57, %v2947_v35  ;;  %v2893_v44 = vpop.f32.mrf.mxu3  ;;  %v4336_v35 = vunpack.i.l.bf16 %v5617_v25 }
 0x2ea   : > { %v3015_v3 = vmax.f32 %v2983_v2, 0.0 }
 0x2eb   : > { %v2222_v11 = vpop.f32.mrf.mxu2 }
 0x2ec   : > { %v2223_v27 = vadd.f32 %v2222_v11, %v2049_v53  ;;  %v930_v11 = vand.u32 15, %v714_v60 }
 0x2ee   : > { %v2948_v40 = vadd.f32 %v5627_v58, %v2223_v27  ;;  %v2057_v58 = vpop.f32.mrf.mxu1  ;;  %v4341_v27 = vunpack.i.l.bf16 %v4340_v8  ;;  %vm1457_vm10 = vcmp.ge.s32.totalorder %v930_v11, 1 }
 0x2f0   : > { %v2984_v52 = vadd.f32 %v5624_v57, %v2948_v40  ;;  %3691 = vmatmul.msk.bf16.gmra.mxu2 %vm1974_vm6, %v5541_v39  ;;  %v5685_v32 = vpop.f32.mrf.mxu3 }
 0x2f2   : > { %v3016_v30 = vmax.f32 %v2984_v52, 0.0 }
 0x2f3   : > { %v2225_v31 = vpop.f32.mrf.mxu2 }
 0x2f4   : > { %v3044_v56 = vpack.c.bf16 %v3016_v30, %v3015_v3  ;;  %v2226_v55 = vadd.f32 %v2225_v31, %v2052_v54  ;;  %v4342_v3 = vunpack.i.h.bf16 %v4340_v8 }
 0x2f6   : > { %3758 = vmatmul.msk.bf16.gmra.mxu0 %vm644_vm2, %v3044_v56  ;;  %v2949_v49 = vadd.f32 %v5643_v34, %v2226_v55  ;;  %v2059_v12 = vpop.f32.mrf.mxu1  ;;  %v3847_v34 = vld [vmem:[%s5912_s7 + $0x10] sm:$0xff]  ;;  %v4410_v56 = vld [vmem:[#allocation2 + $0xff] sm:$0xff] }
 0x2f7   : > { %3335 = vmatpush.bf16.msrb.mxu1 %v3847_v34  ;;  %v1393_v36 = vsel %vm644_vm2, %v4410_v56, %v4337_v47 }
 0x2f8   : > { %v2985_v39 = vadd.f32 %v5624_v57, %v2949_v49  ;;  %v2898_v46 = vpop.f32.mrf.mxu3  ;;  %v1426_v25 = vsel %vm1394_vm3, %v1393_v36, %v4342_v3 }
 0x2fa   : > { %v3017_v59 = vmax.f32 %v2985_v39, 0.0 }
 0x2fb   : > { %v2227_v62 = vpop.f32.mrf.mxu2 }
 0x2fc   : > { %v2228_v33 = vadd.f32 %v2227_v62, %v2054_v22 }
 0x2fe   : > { %v2950_v18 = vadd.f32 %v2883_v24, %v2228_v33 }
 0x300   : > { %v2986_v14 = vadd.f32 %v5624_v57, %v2950_v18  ;;  %3692 = vmatmul.msk.bf16.gmra.mxu2 %vm1974_vm6, %v5561_v16  ;;  %v2062_v16 = vpop.f32.mrf.mxu1  ;;  %v2901_v40 = vpop.f32.mrf.mxu3 }
 0x302   : > { %v3018_v17 = vmax.f32 %v2986_v14, 0.0 }
 0x303   : > { %v2230_v53 = vpop.f32.mrf.mxu2 }
 0x304   : > { %v3045_v38 = vpack.c.bf16 %v3018_v17, %v3017_v59  ;;  %v2231_v61 = vadd.f32 %v2230_v53, %v2057_v58 }
 0x306   : > { %3759 = vmatmul.msk.bf16.gmra.mxu0 %vm644_vm2, %v3045_v38  ;;  %v2951_v24 = vadd.f32 %v2886_v10, %v2231_v61 }
 0x308   : > { %v2987_v43 = vadd.f32 %v5624_v57, %v2951_v24  ;;  %v2064_v30 = vpop.f32.mrf.mxu1  ;;  %v2903_v14 = vpop.f32.mrf.mxu3 }
 0x30a   : > { %v3019_v54 = vmax.f32 %v2987_v43, 0.0 }
 0x30b   : > { %v2232_v15 = vpop.f32.mrf.mxu2 }
 0x30c   : > { %v2233_v20 = vadd.f32 %v2232_v15, %v2059_v12 }
 0x30e   : > { %v2952_v42 = vadd.f32 %v2888_v41, %v2233_v20  ;;  %v3846_v41 = vld [vmem:[%s5912_s7 + $0x8] sm:$0xff] }
 0x30f   : > { %3336 = vmatpush.bf16.msrb.mxu1 %v3846_v41 }
 0x310   : > { %v2988_v63 = vadd.f32 %v5624_v57, %v2952_v42  ;;  %3693 = vmatmul.msk.bf16.gmra.mxu2 %vm1974_vm6, %v5463_v7  ;;  %v4409_v7 = vld [vmem:[#allocation2 + $0xf7] sm:$0xff]  ;;  %v2067_v17 = vpop.f32.mrf.mxu1  ;;  %v2906_v24 = vpop.f32.mrf.mxu3 }
 0x311   : > { %v1392_v52 = vsel %vm644_vm2, %v4409_v7, %v4336_v35 }
 0x312   : > { %v3020_v4 = vmax.f32 %v2988_v63, 0.0  ;;  %v1425_v31 = vsel %vm1394_vm3, %v1392_v52, %v4341_v27 }
 0x313   : > { %v2235_v10 = vpop.f32.mrf.mxu2  ;;  %v1553_v58 = vsel %vm1457_vm10, %v1425_v31, 0.0 }
 0x314   : > { %v3046_v2 = vpack.c.bf16 %v3020_v4, %v3019_v54  ;;  %v2236_v22 = vadd.f32 %v2235_v10, %v2062_v16  ;;  %v1570_v33 = vpack.c.bf16 %v1426_v25, %v1553_v58 }
 0x316   : > { %3760 = vmatmul.msk.bf16.gmra.mxu0 %vm644_vm2, %v3046_v2  ;;  %v2953_v55 = vadd.f32 %v5669_v37, %v2236_v22  ;;  %v3845_v37 = vld [vmem:[%s5912_s7] sm:$0xff] }
 0x317   : > { %3337 = vmatpush.bf16.msrb.mxu1 %v3845_v37 }
 0x318   : > { %v2989_v39 = vadd.f32 %v5624_v57, %v2953_v55  ;;  %v2069_v15 = vpop.f32.mrf.mxu1  ;;  %v2908_v4 = vpop.f32.mrf.mxu3 }
 0x31a   : > { %v3021_v12 = vmax.f32 %v2989_v39, 0.0 }
 0x31b   : > { %v2237_v49 = vpop.f32.mrf.mxu2 }
 0x31c   : > { %v2238_v62 = vadd.f32 %v2237_v49, %v2064_v30 }
 0x31e   : > { %v2954_v18 = vadd.f32 %v2893_v44, %v2238_v62 }
 0x320   : > { %v2990_v59 = vadd.f32 %v5624_v57, %v2954_v18  ;;  %3694 = vmatmul.msk.bf16.gmra.mxu2 %vm1974_vm6, %v1570_v33  ;;  %v2911_v2 = vpop.f32.mrf.mxu3 }
 0x322   : > { %v3022_v53 = vmax.f32 %v2990_v59, 0.0 }
 0x323   : > { %v2240_v38 = vpop.f32.mrf.mxu2 }
 0x324   : > { %v3047_v34 = vpack.c.bf16 %v3022_v53, %v3021_v12  ;;  %v2241_v61 = vadd.f32 %v2240_v38, %v2067_v17 }
 0x326   : > { %3761 = vmatmul.msk.bf16.gmra.mxu0 %vm644_vm2, %v3047_v34  ;;  %v2955_v44 = vadd.f32 %v5685_v32, %v2241_v61 }
 0x328   : > { %v2991_v43 = vadd.f32 %v5624_v57, %v2955_v44 }
 0x32a   : > { %v3023_v63 = vmax.f32 %v2991_v43, 0.0 }
 0x32b   : > { %v2242_v20 = vpop.f32.mrf.mxu2 }
 0x32c   : > { %v2243_v16 = vadd.f32 %v2242_v20, %v2069_v15 }
 0x32e   : > { %v2956_v42 = vadd.f32 %v2898_v46, %v2243_v16 }
 0x330   : > { %v2992_v60 = vadd.f32 %v5624_v57, %v2956_v42 }
 0x332   : > { %v3024_v8 = vmax.f32 %v2992_v60, 0.0 }
 0x333   : > { %v2245_v54 = vpop.f32.mrf.mxu2 }
 0x334   : > { %v3048_v35 = vpack.c.bf16 %v3024_v8, %v3023_v63  ;;  %v2246_v10 = vadd.f32 %v2245_v54, %v5383_v45  ;;  %v5726_v45 = vld [vmem:[%s5911_s6] ss:$0 sm:$0xff] }
 0x336   : > { %3762 = vmatmul.msk.bf16.gmra.mxu0 %vm644_vm2, %v3048_v35  ;;  %v2957_v11 = vadd.f32 %v2901_v40, %v2246_v10 }
 0x338   : > { %v2993_v41 = vadd.f32 %v5624_v57, %v2957_v11 }
 0x33a   : > { %v3025_v22 = vmax.f32 %v2993_v41, 0.0 }
 0x33b   : > { %v2247_v27 = vpop.f32.mrf.mxu2 }
 0x33c   : > { %v2248_v32 = vadd.f32 %v2247_v27, %v5403_v29  ;;  %v2913_v29 = vpop.f32.mrf.mxu3 }
 0x33e   : > { %v2958_v47 = vadd.f32 %v2903_v14, %v2248_v32 }
 0x340   : > { %v2994_v46 = vadd.f32 %v5624_v57, %v2958_v47 }
 0x342   : > { %v3026_v7 = vmax.f32 %v2994_v46, 0.0 }
 0x343   : > { %v2250_v52 = vpop.f32.mrf.mxu2  ;;  %v3134_v3 = vpop.f32.mrf.mxu0 }
 0x344   : > { %v3049_v30 = vpack.c.bf16 %v3026_v7, %v3025_v22  ;;  %v2251_v31 = vadd.f32 %v2250_v52, %v5416_v21  ;;  %v3135_v56 = vadd.f32 %v5726_v45, %v3134_v3  ;;  %v2916_v14 = vpop.f32.mrf.mxu3 }
 0x346   : > { %3763 = vmatmul.msk.bf16.gmra.mxu0 %vm644_vm2, %v3049_v30  ;;  %v2959_v40 = vadd.f32 %v2906_v24, %v2251_v31  ;;  %v3214_v21 = vmax.f32 %v3135_v56, 0.0 }
 0x348   : > { %v2995_v49 = vadd.f32 %v5624_v57, %v2959_v40 }
 0x34a   : > { %v3027_v59 = vmax.f32 %v2995_v49, 0.0 }
 0x34b   : > { %v2252_v36 = vpop.f32.mrf.mxu2  ;;  %v3136_v55 = vpop.f32.mrf.mxu0 }
 0x34c   : > { %v2253_v25 = vadd.f32 %v2252_v36, %v5431_v1  ;;  %v3137_v58 = vadd.f32 %v5726_v45, %v3136_v55  ;;  %v2918_v44 = vpop.f32.mrf.mxu3 }
 0x34e   : > { %v2960_v62 = vadd.f32 %v2908_v4, %v2253_v25  ;;  %v3215_v33 = vmax.f32 %v3137_v58, 0.0 }
 0x350   : > { %v2996_v39 = vadd.f32 %v5624_v57, %v2960_v62  ;;  %v3246_v18 = vpack.c.bf16 %v3215_v33, %v3214_v21 }
 0x352   : > { %v3028_v17 = vmax.f32 %v2996_v39, 0.0  ;;  %3338 = vmatmul.bf16.vlgmr.msrb.gmra.mxu1 %v3246_v18 }
 0x353   : > { %v2255_v12 = vpop.f32.mrf.mxu2  ;;  %v3139_v53 = vpop.f32.mrf.mxu0 }
 0x354   : > { %v3050_v38 = vpack.c.bf16 %v3028_v17, %v3027_v59  ;;  %v2256_v34 = vadd.f32 %v2255_v12, %v5452_v28  ;;  %v3140_v37 = vadd.f32 %v5726_v45, %v3139_v53  ;;  %v2921_v11 = vpop.f32.mrf.mxu3 }
 0x356   : > { %3764 = vmatmul.msk.bf16.gmra.mxu0 %vm644_vm2, %v3050_v38  ;;  %v2961_v1 = vadd.f32 %v2911_v2, %v2256_v34  ;;  %v3216_v43 = vmax.f32 %v3140_v37, 0.0 }
 0x358   : > { %v2997_v16 = vadd.f32 %v5624_v57, %v2961_v1 }
 0x35a   : > { %v3029_v8 = vmax.f32 %v2997_v16, 0.0 }
 0x35b   : > { %v2257_v61 = vpop.f32.mrf.mxu2  ;;  %v3141_v24 = vpop.f32.mrf.mxu0 }
 0x35c   : > { %v2258_v15 = vadd.f32 %v2257_v61, %v5471_v26  ;;  %v3142_v20 = vadd.f32 %v5726_v45, %v3141_v24  ;;  %v2923_v30 = vpop.f32.mrf.mxu3 }
 0x35e   : > { %v2962_v42 = vadd.f32 %v2913_v29, %v2258_v15  ;;  %v3217_v60 = vmax.f32 %v3142_v20, 0.0 }
 0x360   : > { %v2998_v63 = vadd.f32 %v5624_v57, %v2962_v42  ;;  %v3247_v28 = vpack.c.bf16 %v3217_v60, %v3216_v43 }
 0x362   : > { %v3030_v54 = vmax.f32 %v2998_v63, 0.0  ;;  %3343 = vmatmul.bf16.gmra.mxu1 %v3247_v28 }
 0x363   : > { %v2260_v4 = vpop.f32.mrf.mxu2  ;;  %v3144_v35 = vpop.f32.mrf.mxu0 }
 0x364   : > { %v3051_v10 = vpack.c.bf16 %v3030_v54, %v3029_v8  ;;  %v2261_v27 = vadd.f32 %v2260_v4, %v5494_v50  ;;  %v3145_v32 = vadd.f32 %v5726_v45, %v3144_v35 }
 0x366   : > { %3765 = vmatmul.msk.bf16.gmra.mxu0 %vm644_vm2, %v3051_v10  ;;  %v2963_v26 = vadd.f32 %v2916_v14, %v2261_v27  ;;  %v3218_v7 = vmax.f32 %v3145_v32, 0.0 }
 0x368   : > { %v2999_v22 = vadd.f32 %v5624_v57, %v2963_v26 }
 0x36a   : > { %v3031_v29 = vmax.f32 %v2999_v22, 0.0 }
 0x36b   : > { %v2262_v2 = vpop.f32.mrf.mxu2  ;;  %v3146_v41 = vpop.f32.mrf.mxu0 }
 0x36c   : > { %v2263_v47 = vadd.f32 %v2262_v2, %v5513_v13  ;;  %v3147_v46 = vadd.f32 %v5726_v45, %v3146_v41  ;;  %v2926_v13 = vpop.f32.mrf.mxu3 }
 0x36e   : > { %v2964_v52 = vadd.f32 %v2918_v44, %v2263_v47  ;;  %v3219_v3 = vmax.f32 %v3147_v46, 0.0 }
 0x370   : > { %v3000_v31 = vadd.f32 %v5624_v57, %v2964_v52  ;;  %v3248_v50 = vpack.c.bf16 %v3219_v3, %v3218_v7 }
 0x372   : > { %v3032_v40 = vmax.f32 %v3000_v31, 0.0  ;;  %3348 = vmatmul.bf16.gmra.mxu1 %v3248_v50 }
 0x373   : > { %v2265_v56 = vpop.f32.mrf.mxu2  ;;  %v3149_v36 = vpop.f32.mrf.mxu0 }
 0x374   : > { %v3052_v55 = vpack.c.bf16 %v3032_v40, %v3031_v29  ;;  %v2266_v25 = vadd.f32 %v2265_v56, %v5522_v19  ;;  %v3150_v49 = vadd.f32 %v5726_v45, %v3149_v36  ;;  %v2928_v37 = vpop.f32.mrf.mxu3 }
 0x376   : > { %3766 = vmatmul.msk.bf16.gmra.mxu0 %vm644_vm2, %v3052_v55  ;;  %v2965_v58 = vadd.f32 %v2921_v11, %v2266_v25  ;;  %v3220_v14 = vmax.f32 %v3150_v49, 0.0 }
 0x378   : > { %v3001_v18 = vadd.f32 %v5624_v57, %v2965_v58 }
 0x37a   : > { %v3033_v53 = vmax.f32 %v3001_v18, 0.0 }
 0x37b   : > { %v2267_v21 = vpop.f32.mrf.mxu2  ;;  %v3151_v62 = vpop.f32.mrf.mxu0 }
 0x37c   : > { %v2268_v33 = vadd.f32 %v2267_v21, %v5532_v9  ;;  %v3152_v39 = vadd.f32 %v5726_v45, %v3151_v62  ;;  %v2931_v42 = vpop.f32.mrf.mxu3 }
 0x37e   : > { %v2966_v59 = vadd.f32 %v2923_v30, %v2268_v33  ;;  %v3221_v17 = vmax.f32 %v3152_v39, 0.0 }
 0x380   : > { %v3002_v12 = vadd.f32 %v5624_v57, %v2966_v59  ;;  %v3249_v19 = vpack.c.bf16 %v3221_v17, %v3220_v14 }
 0x382   : > { %v3034_v38 = vmax.f32 %v3002_v12, 0.0  ;;  %3353 = vmatmul.bf16.gmra.mxu1 %v3249_v19 }
 0x383   : > { %v2270_v34 = vpop.f32.mrf.mxu2  ;;  %v3154_v1 = vpop.f32.mrf.mxu0 }
 0x384   : > { %v3053_v61 = vpack.c.bf16 %v3034_v38, %v3033_v53  ;;  %v2271_v24 = vadd.f32 %v2270_v34, %v5551_v0  ;;  %v3155_v44 = vadd.f32 %v5726_v45, %v3154_v1 }
 0x386   : > { %3767 = vmatmul.msk.bf16.gmra.mxu0 %vm644_vm2, %v3053_v61  ;;  %v2967_v9 = vadd.f32 %v2926_v13, %v2271_v24  ;;  %v3222_v63 = vmax.f32 %v3155_v44, 0.0 }
 0x388   : > { %v3003_v60 = vadd.f32 %v5624_v57, %v2967_v9 }
 0x38a   : > { %v3035_v4 = vmax.f32 %v3003_v60, 0.0 }
 0x38b   : > { %v2272_v15 = vpop.f32.mrf.mxu2  ;;  %v3156_v20 = vpop.f32.mrf.mxu0 }
 0x38c   : > { %v2273_v16 = vadd.f32 %v2272_v15, %v5565_v48  ;;  %v3157_v43 = vadd.f32 %v5726_v45, %v3156_v20  ;;  %v2933_v48 = vpop.f32.mrf.mxu3  ;;  %v5785_v20 = vld [vmem:[%s5913_s8] ss:$0 sm:$0xff] }
 0x38e   : > { %v2968_v28 = vadd.f32 %v2928_v37, %v2273_v16  ;;  %v3223_v8 = vmax.f32 %v3157_v43, 0.0 }
 0x390   : > { %v3004_v54 = vadd.f32 %v5624_v57, %v2968_v28  ;;  %v3250_v0 = vpack.c.bf16 %v3223_v8, %v3222_v63 }
 0x392   : > { %v3036_v35 = vmax.f32 %v3004_v54, 0.0  ;;  %3358 = vmatmul.bf16.gmra.mxu1 %v3250_v0 }
 0x393   : > { %v2275_v10 = vpop.f32.mrf.mxu2  ;;  %v3159_v11 = vpop.f32.mrf.mxu0 }
 0x394   : > { %v3054_v27 = vpack.c.bf16 %v3036_v35, %v3035_v4  ;;  %v2276_v26 = vadd.f32 %v2275_v10, %v5576_v6  ;;  %v3160_v2 = vadd.f32 %v5726_v45, %v3159_v11  ;;  %v2936_v50 = vpop.f32.mrf.mxu3 }
 0x396   : > { %3768 = vmatmul.msk.bf16.gmra.mxu0 %vm644_vm2, %v3054_v27  ;;  %v2969_v32 = vadd.f32 %v2931_v42, %v2276_v26  ;;  %v3224_v52 = vmax.f32 %v3160_v2, 0.0 }
 0x398   : > { %v3005_v7 = vadd.f32 %v5624_v57, %v2969_v32 }
 0x39a   : > { %v3037_v29 = vmax.f32 %v3005_v7, 0.0 }
 0x39b   : > { %v2277_v41 = vpop.f32.mrf.mxu2  ;;  %v3161_v47 = vpop.f32.mrf.mxu0 }
 0x39c   : > { %v2278_v46 = vadd.f32 %v2277_v41, %v5585_v23  ;;  %v3162_v22 = vadd.f32 %v5726_v45, %v3161_v47  ;;  %v2938_v33 = vpop.f32.mrf.mxu3 }
 0x39e   : > { %v2970_v3 = vadd.f32 %v2933_v48, %v2278_v46  ;;  %v3225_v30 = vmax.f32 %v3162_v22, 0.0 }
 0x3a0   : > { %v3006_v31 = vadd.f32 %v5624_v57, %v2970_v3  ;;  %v3251_v6 = vpack.c.bf16 %v3225_v30, %v3224_v52 }
 0x3a2   : > { %v3038_v40 = vmax.f32 %v3006_v31, 0.0  ;;  %3363 = vmatmul.bf16.gmra.mxu1 %v3251_v6 }
 0x3a3   : > { %v2280_v56 = vpop.f32.mrf.mxu2  ;;  %v3164_v36 = vpop.f32.mrf.mxu0 }
 0x3a4   : > { %v3055_v55 = vpack.c.bf16 %v3038_v40, %v3037_v29  ;;  %v2281_v25 = vadd.f32 %v2280_v56, %v5596_v5  ;;  %v3165_v13 = vadd.f32 %v5726_v45, %v3164_v36 }
 0x3a6   : > { %3769 = vmatmul.msk.bf16.gmra.mxu0 %vm644_vm2, %v3055_v55  ;;  %v2971_v23 = vadd.f32 %v2936_v50, %v2281_v25  ;;  %v3226_v18 = vmax.f32 %v3165_v13, 0.0 }
 0x3a8   : > { %v3007_v39 = vadd.f32 %v5624_v57, %v2971_v23 }
 0x3aa   : > { %v3039_v12 = vmax.f32 %v3007_v39, 0.0 }
 0x3ab   : > { %v2282_v58 = vpop.f32.mrf.mxu2  ;;  %v3166_v49 = vpop.f32.mrf.mxu0 }
 0x3ac   : > { %v2283_v21 = vadd.f32 %v2282_v58, %v5603_v51  ;;  %v3167_v62 = vadd.f32 %v5726_v45, %v3166_v49 }
 0x3ae   : > { %v2972_v14 = vadd.f32 %v2938_v33, %v2283_v21  ;;  %v3227_v59 = vmax.f32 %v3167_v62, 0.0 }
 0x3b0   : > { %v3008_v17 = vadd.f32 %v5624_v57, %v2972_v14  ;;  %v3252_v5 = vpack.c.bf16 %v3227_v59, %v3226_v18 }
 0x3b2   : > { %v3040_v19 = vmax.f32 %v3008_v17, 0.0  ;;  %3368 = vmatmul.bf16.gmra.mxu1 %v3252_v5 }
 0x3b3   : > { %v3169_v53 = vpop.f32.mrf.mxu0 }
 0x3b4   : > { %v3056_v38 = vpack.c.bf16 %v3040_v19, %v3039_v12  ;;  %v3170_v51 = vadd.f32 %v5726_v45, %v3169_v53 }
 0x3b6   : > { %3770 = vmatmul.msk.bf16.gmra.mxu0 %vm644_vm2, %v3056_v38  ;;  %v3228_v37 = vmax.f32 %v3170_v51, 0.0 }
 0x3bb   : > { %v3171_v34 = vpop.f32.mrf.mxu0 }
 0x3bc   : > { %v3172_v1 = vadd.f32 %v5726_v45, %v3171_v34 }
 0x3be   : > { %v3229_v61 = vmax.f32 %v3172_v1, 0.0 }
 0x3c0   : > { %v3253_v24 = vpack.c.bf16 %v3229_v61, %v3228_v37 }
 0x3c2   : > { %3373 = vmatmul.bf16.gmra.mxu1 %v3253_v24 }
 0x3c3   : > { %v3174_v9 = vpop.f32.mrf.mxu0 }
 0x3c4   : > { %v3175_v57 = vadd.f32 %v5726_v45, %v3174_v9 }
 0x3c6   : > { %v3230_v16 = vmax.f32 %v3175_v57, 0.0 }
 0x3cb   : > { %v3176_v44 = vpop.f32.mrf.mxu0 }
 0x3cc   : > { %v3177_v15 = vadd.f32 %v5726_v45, %v3176_v44 }
 0x3ce   : > { %v3231_v43 = vmax.f32 %v3177_v15, 0.0 }
 0x3cf   : > { %v3339_v42 = vpop.f32.mrf.mxu1 }
 0x3d0   : > { %v3254_v60 = vpack.c.bf16 %v3231_v43, %v3230_v16  ;;  %v3340_v63 = vadd.f32 %v5785_v20, %v3339_v42 }
 0x3d2   : > { %3419 = vst.msk [vmem:[%s5790_s16] sm:$0xff] %vm644_vm2, %v3340_v63  ;;  %3378 = vmatmul.bf16.gmra.mxu1 %v3254_v60 }
 0x3d3   : > { %v3179_v28 = vpop.f32.mrf.mxu0 }
 0x3d4   : > { %v3180_v0 = vadd.f32 %v5726_v45, %v3179_v28 }
 0x3d6   : > { %v3232_v10 = vmax.f32 %v3180_v0, 0.0 }
 0x3d7   : > { %v3341_v8 = vpop.f32.mrf.mxu1 }
 0x3d8   : > { %v3342_v54 = vadd.f32 %v5785_v20, %v3341_v8 }
 0x3da   : > { %3420 = vst.msk [vmem:[%s5790_s16 + $0x8] sm:$0xff] %vm644_vm2, %v3342_v54 }
 0x3db   : > { %v3181_v4 = vpop.f32.mrf.mxu0 }
 0x3dc   : > { %v3182_v35 = vadd.f32 %v5726_v45, %v3181_v4 }
 0x3de   : > { %v3233_v11 = vmax.f32 %v3182_v35, 0.0 }
 0x3df   : > { %v3344_v27 = vpop.f32.mrf.mxu1 }
 0x3e0   : > { %v3255_v26 = vpack.c.bf16 %v3233_v11, %v3232_v10  ;;  %v3345_v48 = vadd.f32 %v5785_v20, %v3344_v27 }
 0x3e2   : > { %3421 = vst.msk [vmem:[%s5790_s16 + $0x10] sm:$0xff] %vm644_vm2, %v3345_v48  ;;  %3383 = vmatmul.bf16.gmra.mxu1 %v3255_v26 }
 0x3e3   : > { %v3184_v32 = vpop.f32.mrf.mxu0 }
 0x3e4   : > { %v3185_v47 = vadd.f32 %v5726_v45, %v3184_v32 }
 0x3e6   : > { %v3234_v7 = vmax.f32 %v3185_v47, 0.0 }
 0x3e7   : > { %v3346_v2 = vpop.f32.mrf.mxu1 }
 0x3e8   : > { %v3347_v41 = vadd.f32 %v5785_v20, %v3346_v2 }
 0x3ea   : > { %3422 = vst.msk [vmem:[%s5790_s16 + $0x18] sm:$0xff] %vm644_vm2, %v3347_v41 }
 0x3eb   : > { %v3186_v46 = vpop.f32.mrf.mxu0 }
 0x3ec   : > { %v3187_v22 = vadd.f32 %v5726_v45, %v3186_v46 }
 0x3ee   : > { %v3235_v52 = vmax.f32 %v3187_v22, 0.0 }
 0x3ef   : > { %v3349_v3 = vpop.f32.mrf.mxu1 }
 0x3f0   : > { %v3256_v30 = vpack.c.bf16 %v3235_v52, %v3234_v7  ;;  %v3350_v31 = vadd.f32 %v5785_v20, %v3349_v3 }
 0x3f2   : > { %3423 = vst.msk [vmem:[%s5790_s16 + $0x20] sm:$0xff] %vm644_vm2, %v3350_v31  ;;  %3388 = vmatmul.bf16.gmra.mxu1 %v3256_v30 }
 0x3f3   : > { %v3189_v6 = vpop.f32.mrf.mxu0 }
 0x3f4   : > { %v3190_v40 = vadd.f32 %v5726_v45, %v3189_v6 }
 0x3f6   : > { %v3236_v55 = vmax.f32 %v3190_v40, 0.0 }
 0x3f7   : > { %v3351_v50 = vpop.f32.mrf.mxu1 }
 0x3f8   : > { %v3352_v29 = vadd.f32 %v5785_v20, %v3351_v50 }
 0x3fa   : > { %3424 = vst.msk [vmem:[%s5790_s16 + $0x28] sm:$0xff] %vm644_vm2, %v3352_v29 }
 0x3fb   : > { %v3191_v56 = vpop.f32.mrf.mxu0 }
 0x3fc   : > { %v3192_v36 = vadd.f32 %v5726_v45, %v3191_v56 }
 0x3fe   : > { %v3237_v25 = vmax.f32 %v3192_v36, 0.0 }
 0x3ff   : > { %v3354_v23 = vpop.f32.mrf.mxu1 }
 0x400   : > { %v3257_v13 = vpack.c.bf16 %v3237_v25, %v3236_v55  ;;  %v3355_v58 = vadd.f32 %v5785_v20, %v3354_v23 }
 0x402   : > { %3425 = vst.msk [vmem:[%s5790_s16 + $0x30] sm:$0xff] %vm644_vm2, %v3355_v58  ;;  %3393 = vmatmul.bf16.gmra.mxu1 %v3257_v13 }
 0x403   : > { %v3194_v49 = vpop.f32.mrf.mxu0 }
 0x404   : > { %v3195_v33 = vadd.f32 %v5726_v45, %v3194_v49 }
 0x406   : > { %v3238_v14 = vmax.f32 %v3195_v33, 0.0 }
 0x407   : > { %v3356_v21 = vpop.f32.mrf.mxu1 }
 0x408   : > { %v3357_v62 = vadd.f32 %v5785_v20, %v3356_v21 }
 0x40a   : > { %3426 = vst.msk [vmem:[%s5790_s16 + $0x38] sm:$0xff] %vm644_vm2, %v3357_v62 }
 0x40b   : > { %v3196_v39 = vpop.f32.mrf.mxu0 }
 0x40c   : > { %v3197_v18 = vadd.f32 %v5726_v45, %v3196_v39 }
 0x40e   : > { %v3239_v59 = vmax.f32 %v3197_v18, 0.0 }
 0x40f   : > { %v3359_v17 = vpop.f32.mrf.mxu1 }
 0x410   : > { %v3258_v5 = vpack.c.bf16 %v3239_v59, %v3238_v14  ;;  %v3360_v12 = vadd.f32 %v5785_v20, %v3359_v17 }
 0x412   : > { %3427 = vst.msk [vmem:[%s5790_s16 + $0x40] sm:$0xff] %vm644_vm2, %v3360_v12  ;;  %3398 = vmatmul.bf16.gmra.mxu1 %v3258_v5 }
 0x413   : > { %v3199_v19 = vpop.f32.mrf.mxu0 }
 0x414   : > { %v3200_v51 = vadd.f32 %v5726_v45, %v3199_v19 }
 0x416   : > { %v3240_v37 = vmax.f32 %v3200_v51, 0.0 }
 0x417   : > { %v3361_v53 = vpop.f32.mrf.mxu1 }
 0x418   : > { %v3362_v38 = vadd.f32 %v5785_v20, %v3361_v53 }
 0x41a   : > { %3428 = vst.msk [vmem:[%s5790_s16 + $0x48] sm:$0xff] %vm644_vm2, %v3362_v38 }
 0x41b   : > { %v3201_v34 = vpop.f32.mrf.mxu0 }
 0x41c   : > { %v3202_v1 = vadd.f32 %v5726_v45, %v3201_v34 }
 0x41e   : > { %v3241_v61 = vmax.f32 %v3202_v1, 0.0 }
 0x41f   : > { %v3364_v24 = vpop.f32.mrf.mxu1 }
 0x420   : > { %v3259_v9 = vpack.c.bf16 %v3241_v61, %v3240_v37  ;;  %v3365_v57 = vadd.f32 %v5785_v20, %v3364_v24 }
 0x422   : > { %3429 = vst.msk [vmem:[%s5790_s16 + $0x50] sm:$0xff] %vm644_vm2, %v3365_v57  ;;  %3403 = vmatmul.bf16.gmra.mxu1 %v3259_v9 }
 0x423   : > { %v3204_v44 = vpop.f32.mrf.mxu0 }
 0x424   : > { %v3205_v43 = vadd.f32 %v5726_v45, %v3204_v44 }
 0x426   : > { %v3242_v63 = vmax.f32 %v3205_v43, 0.0 }
 0x427   : > { %v3366_v15 = vpop.f32.mrf.mxu1 }
 0x428   : > { %v3367_v16 = vadd.f32 %v5785_v20, %v3366_v15 }
 0x42a   : > { %3430 = vst.msk [vmem:[%s5790_s16 + $0x58] sm:$0xff] %vm644_vm2, %v3367_v16 }
 0x42b   : > { %v3206_v42 = vpop.f32.mrf.mxu0 }
 0x42c   : > { %v3207_v60 = vadd.f32 %v5726_v45, %v3206_v42 }
 0x42e   : > { %v3243_v28 = vmax.f32 %v3207_v60, 0.0 }
 0x42f   : > { %v3369_v8 = vpop.f32.mrf.mxu1 }
 0x430   : > { %v3260_v54 = vpack.c.bf16 %v3243_v28, %v3242_v63  ;;  %v3370_v0 = vadd.f32 %v5785_v20, %v3369_v8 }
 0x432   : > { %3431 = vst.msk [vmem:[%s5790_s16 + $0x60] sm:$0xff] %vm644_vm2, %v3370_v0  ;;  %3408 = vmatmul.bf16.gmra.mxu1 %v3260_v54 }
 0x433   : > { %v3209_v4 = vpop.f32.mrf.mxu0 }
 0x434   : > { %v3210_v11 = vadd.f32 %v5726_v45, %v3209_v4 }
 0x436   : > { %v3244_v48 = vmax.f32 %v3210_v11, 0.0 }
 0x437   : > { %v3371_v35 = vpop.f32.mrf.mxu1 }
 0x438   : > { %v3372_v10 = vadd.f32 %v5785_v20, %v3371_v35 }
 0x43a   : > { %3432 = vst.msk [vmem:[%s5790_s16 + $0x68] sm:$0xff] %vm644_vm2, %v3372_v10 }
 0x43b   : > { %v3211_v27 = vpop.f32.mrf.mxu0 }
 0x43c   : > { %v3212_v26 = vadd.f32 %v5726_v45, %v3211_v27 }
 0x43e   : > { %v3245_v32 = vmax.f32 %v3212_v26, 0.0 }
 0x43f   : > { %v3374_v2 = vpop.f32.mrf.mxu1 }
 0x440   : > { %v3261_v41 = vpack.c.bf16 %v3245_v32, %v3244_v48  ;;  %v3375_v47 = vadd.f32 %v5785_v20, %v3374_v2 }
 0x442   : > { %3433 = vst.msk [vmem:[%s5790_s16 + $0x70] sm:$0xff] %vm644_vm2, %v3375_v47  ;;  %3413 = vmatmul.bf16.gmra.mxu1 %v3261_v41 }
 0x447   : > { %v3376_v46 = vpop.f32.mrf.mxu1 }
 0x448   : > { %v3377_v22 = vadd.f32 %v5785_v20, %v3376_v46 }
 0x44a   : > { %3434 = vst.msk [vmem:[%s5790_s16 + $0x78] sm:$0xff] %vm644_vm2, %v3377_v22 }
 0x44f   : > { %v3379_v7 = vpop.f32.mrf.mxu1 }
 0x450   : > { %v3380_v45 = vadd.f32 %v5785_v20, %v3379_v7 }
 0x452   : > { %3435 = vst.msk [vmem:[%s5790_s16 + $0x80] sm:$0xff] %vm644_vm2, %v3380_v45 }
 0x457   : > { %v3381_v52 = vpop.f32.mrf.mxu1 }
 0x458   : > { %v3382_v3 = vadd.f32 %v5785_v20, %v3381_v52 }
 0x45a   : > { %3436 = vst.msk [vmem:[%s5790_s16 + $0x88] sm:$0xff] %vm644_vm2, %v3382_v3 }
 0x45f   : > { %v3384_v30 = vpop.f32.mrf.mxu1 }
 0x460   : > { %v3385_v31 = vadd.f32 %v5785_v20, %v3384_v30 }
 0x462   : > { %3437 = vst.msk [vmem:[%s5790_s16 + $0x90] sm:$0xff] %vm644_vm2, %v3385_v31 }
 0x467   : > { %v3386_v6 = vpop.f32.mrf.mxu1 }
 0x468   : > { %v3387_v50 = vadd.f32 %v5785_v20, %v3386_v6 }
 0x46a   : > { %3438 = vst.msk [vmem:[%s5790_s16 + $0x98] sm:$0xff] %vm644_vm2, %v3387_v50 }
 0x46f   : > { %v3389_v29 = vpop.f32.mrf.mxu1 }
 0x470   : > { %v3390_v40 = vadd.f32 %v5785_v20, %v3389_v29 }
 0x472   : > { %3439 = vst.msk [vmem:[%s5790_s16 + $0xa0] sm:$0xff] %vm644_vm2, %v3390_v40 }
 0x477   : > { %v3391_v56 = vpop.f32.mrf.mxu1 }
 0x478   : > { %v3392_v36 = vadd.f32 %v5785_v20, %v3391_v56 }
 0x47a   : > { %3440 = vst.msk [vmem:[%s5790_s16 + $0xa8] sm:$0xff] %vm644_vm2, %v3392_v36 }
 0x47f   : > { %v3394_v55 = vpop.f32.mrf.mxu1 }
 0x480   : > { %v3395_v25 = vadd.f32 %v5785_v20, %v3394_v55 }
 0x482   : > { %3441 = vst.msk [vmem:[%s5790_s16 + $0xb0] sm:$0xff] %vm644_vm2, %v3395_v25 }
 0x487   : > { %v3396_v23 = vpop.f32.mrf.mxu1 }
 0x488   : > { %v3397_v13 = vadd.f32 %v5785_v20, %v3396_v23 }
 0x48a   : > { %3442 = vst.msk [vmem:[%s5790_s16 + $0xb8] sm:$0xff] %vm644_vm2, %v3397_v13 }
 0x48f   : > { %v3399_v58 = vpop.f32.mrf.mxu1 }
 0x490   : > { %v3400_v49 = vadd.f32 %v5785_v20, %v3399_v58 }
 0x492   : > { %3443 = vst.msk [vmem:[%s5790_s16 + $0xc0] sm:$0xff] %vm644_vm2, %v3400_v49 }
 0x497   : > { %v3401_v21 = vpop.f32.mrf.mxu1 }
 0x498   : > { %v3402_v62 = vadd.f32 %v5785_v20, %v3401_v21 }
 0x49a   : > { %3444 = vst.msk [vmem:[%s5790_s16 + $0xc8] sm:$0xff] %vm644_vm2, %v3402_v62 }
 0x49f   : > { %v3404_v33 = vpop.f32.mrf.mxu1 }
 0x4a0   : > { %v3405_v39 = vadd.f32 %v5785_v20, %v3404_v33 }
 0x4a2   : > { %3445 = vst.msk [vmem:[%s5790_s16 + $0xd0] sm:$0xff] %vm644_vm2, %v3405_v39 }
 0x4a7   : > { %v3406_v18 = vpop.f32.mrf.mxu1 }
 0x4a8   : > { %v3407_v14 = vadd.f32 %v5785_v20, %v3406_v18 }
 0x4aa   : > { %3446 = vst.msk [vmem:[%s5790_s16 + $0xd8] sm:$0xff] %vm644_vm2, %v3407_v14 }
 0x4af   : > { %v3409_v59 = vpop.f32.mrf.mxu1 }
 0x4b0   : > { %v3410_v17 = vadd.f32 %v5785_v20, %v3409_v59 }
 0x4b2   : > { %3447 = vst.msk [vmem:[%s5790_s16 + $0xe0] sm:$0xff] %vm644_vm2, %v3410_v17 }
 0x4b7   : > { %v3411_v5 = vpop.f32.mrf.mxu1 }
 0x4b8   : > { %v3412_v12 = vadd.f32 %v5785_v20, %v3411_v5 }
 0x4ba   : > { %3448 = vst.msk [vmem:[%s5790_s16 + $0xe8] sm:$0xff] %vm644_vm2, %v3412_v12 }
 0x4bf   : > { %v3414_v19 = vpop.f32.mrf.mxu1 }
 0x4c0   : > { %v3415_v53 = vadd.f32 %v5785_v20, %v3414_v19 }
 0x4c2   : > { %3449 = vst.msk [vmem:[%s5790_s16 + $0xf0] sm:$0xff] %vm644_vm2, %v3415_v53 }
 0x4c7   : > { %v3416_v38 = vpop.f32.mrf.mxu1 }
 0x4c8   : > { %v3417_v51 = vadd.f32 %v5785_v20, %v3416_v38 }
 0x4ca   : > { %3450 = vst.msk [vmem:[%s5790_s16 + $0xf8] sm:$0xff] %vm644_vm2, %v3417_v51 }
 0x4cb PF: > { %s19_s30 = sadd.s32 1, %s4417_s30  }
 0x4cc   : > { %p16_p4 = scmp.ge.s32.totalorder %s19_s30, 4  }
 0x4ce   :  { %18 = sbr.rel (!%p16_p4) target bundleno = 1 (0x1), region = 88 }

</bundles_post_ra>
